<compile_context>
chip_gen: v5e
topology: v5e:2x2
jax: 0.10.0
libtpu: 0.0.40
codegen_flags: <defaults>
</compile_context>

<pallas_src>
import functools
import numpy as np
import jax
import jax.numpy as jnp
from jax.experimental import pallas as pl
from jax.experimental.pallas import tpu as pltpu

EPS = 1e-5


def _rms(x):
    # RMS normalization (no mean subtraction), matches LayerNorm._norm in the reference.
    return x * jax.lax.rsqrt(jnp.mean(x * x, axis=-1, keepdims=True) + EPS)


def _pick_s_tile(S, T, target_rows=512):
    """Largest divisor of S such that s_tile*T stays near target_rows (VMEM friendly)."""
    limit = max(1, target_rows // max(T, 1))
    best = 1
    for d in range(1, S + 1):
        if S % d == 0 and d <= limit:
            best = d
    if (best * T) % 8 != 0:          # keep the block's sublane dim a multiple of 8
        best = S                      # full-extent block is always legal
    return best


def _pick_head_tile(n, limit, quantum):
    """Largest divisor of n <= limit that is a multiple of quantum; fall back to n."""
    best = None
    for d in range(1, n + 1):
        if n % d == 0 and d <= limit and d % quantum == 0:
            best = d
    return best if best is not None else n


# ----------------------------------------------------------------------------
# Fused transformer block kernel:
#   RMSNorm -> MHA -> residual -> RMSNorm -> SwiGLU MLP -> residual
# x_ref / o_ref are (S_TILE*T, C) slabs; weights are resident bf16.
# ----------------------------------------------------------------------------
def block_kernel(x_ref, ln1_ref, wqkv_ref, wproj_ref, ln2_ref, wfc_ref, wfp_ref,
                 o_ref, *, n_head, s_tile, seq):
    C = x_ref.shape[-1]
    D = C // n_head

    x = x_ref[...]                                                     # (N, C) f32 residual

    # --- attention sub-block -------------------------------------------------
    h = (_rms(x) * ln1_ref[...]).astype(jnp.bfloat16)
    qkv = jnp.dot(h, wqkv_ref[...], preferred_element_type=jnp.float32)   # (N, 3C) f32
    qkv = qkv.reshape(s_tile, seq, 3 * C)
    q = qkv[:, :, 0 * C:1 * C]        # attn softmax scale is pre-folded into W_qkv
    k = qkv[:, :, 1 * C:2 * C]
    v = qkv[:, :, 2 * C:3 * C]

    heads = []
    for hh in range(n_head):          # static unroll; per-head work is S_TILE-batched
        sl = slice(hh * D, (hh + 1) * D)
        qh = q[:, :, sl].astype(jnp.bfloat16)
        kh = k[:, :, sl].astype(jnp.bfloat16)
        vh = v[:, :, sl].astype(jnp.bfloat16)
        s = jnp.einsum('btd,bsd->bts', qh, kh,
                       preferred_element_type=jnp.float32)             # (s_tile, T, T)
        s = s - jnp.max(s, axis=-1, keepdims=True)
        probs = jnp.exp(s)
        probs = probs * pl.reciprocal(jnp.sum(probs, axis=-1, keepdims=True), approx=True)
        heads.append(jnp.einsum('bts,bsd->btd', probs.astype(jnp.bfloat16), vh,
                                preferred_element_type=jnp.float32))   # (s_tile, T, D)
    y = jnp.concatenate(heads, axis=-1).reshape(s_tile * seq, C)       # (N, C) f32
    attn = jnp.dot(y.astype(jnp.bfloat16), wproj_ref[...],
                   preferred_element_type=jnp.float32)                 # ONE full-width proj
    x1 = x + attn

    # --- MLP sub-block (SwiGLU) ----------------------------------------------
    h2 = (_rms(x1) * ln2_ref[...]).astype(jnp.bfloat16)
    ff = jnp.dot(h2, wfc_ref[...], preferred_element_type=jnp.float32)   # (N, 4C)
    a = ff[:, :2 * C]
    g = ff[:, 2 * C:]
    gated = (a * (g * (1.0 / (1.0 + jnp.exp(-g))))).astype(jnp.bfloat16)  # h * silu(gate)
    mlp = jnp.dot(gated, wfp_ref[...], preferred_element_type=jnp.float32)

    o_ref[...] = x1 + mlp


def run_block(x2d, p, *, n_head, attn_scale, seq, s_tile):
    NT, C = x2d.shape
    S = NT // seq
    assert S * seq == NT and S % s_tile == 0
    rows = s_tile * seq

    # bf16 weights; fold the softmax scale into the Q columns of W_qkv (trace time).
    wqkv = jnp.concatenate([p['wqkv'][:, :C] * attn_scale, p['wqkv'][:, C:]],
                           axis=1).astype(jnp.bfloat16)
    wproj = p['wproj'].astype(jnp.bfloat16)
    wfc = p['wfc'].astype(jnp.bfloat16)
    wfp = p['wfp'].astype(jnp.bfloat16)

    kernel = functools.partial(block_kernel, n_head=n_head, s_tile=s_tile, seq=seq)
    # TODO(synk): for production-sized C on v7x (64 MiB VMEM), add pipeline_mode=pl.Buffered(1)
    # on the constant-index weight specs and/or a K-split grid axis for wfc/wfp.
    return pl.pallas_call(
        kernel,
        out_shape=jax.ShapeDtypeStruct((NT, C), jnp.float32),
        grid_spec=pltpu.PrefetchScalarGridSpec(
            num_scalar_prefetch=0,
            grid=(S // s_tile,),
            in_specs=[
                pl.BlockSpec((rows, C), lambda i: (i, 0)),        # x slab
                pl.BlockSpec((1, C), lambda i: (0, 0)),           # ln1 weight
                pl.BlockSpec((C, 3 * C), lambda i: (0, 0)),       # W_qkv (bf16, scale folded)
                pl.BlockSpec((C, C), lambda i: (0, 0)),           # W_proj (bf16)
                pl.BlockSpec((1, C), lambda i: (0, 0)),           # ln2 weight
                pl.BlockSpec((C, 4 * C), lambda i: (0, 0)),       # W_fc (bf16)
                pl.BlockSpec((2 * C, C), lambda i: (0, 0)),       # W_fc_proj (bf16)
            ],
            out_specs=pl.BlockSpec((rows, C), lambda i: (i, 0)),
        ),
        compiler_params=pltpu.CompilerParams(dimension_semantics=("parallel",)),
        input_output_aliases={0: 0},   # in-place residual update (x + delta)
    )(x2d, p['ln1'][None, :], wqkv, wproj, p['ln2'][None, :], wfc, wfp)


# ----------------------------------------------------------------------------
# Fused final RMSNorm + lm_head (+ lr_scale) kernel, tiled over (N, V)
# ----------------------------------------------------------------------------
def head_kernel(x_ref, lnf_ref, wlm_ref, o_ref, *, lr_scale):
    h = (_rms(x_ref[...]) * lnf_ref[...]).astype(jnp.bfloat16)
    o_ref[...] = jnp.dot(h, wlm_ref[...],
                         preferred_element_type=jnp.float32) * lr_scale


def run_head(x_nc, lnf_w, wlm_bf16, lr_scale, *, tn, tv):
    N, C = x_nc.shape
    V = wlm_bf16.shape[1]
    kernel = functools.partial(head_kernel, lr_scale=lr_scale)
    return pl.pallas_call(
        kernel,
        out_shape=jax.ShapeDtypeStruct((N, V), jnp.float32),
        grid_spec=pltpu.PrefetchScalarGridSpec(
            num_scalar_prefetch=0,
            grid=(N // tn, V // tv),
            in_specs=[
                pl.BlockSpec((tn, C), lambda i, j: (i, 0)),
                pl.BlockSpec((1, C), lambda i, j: (0, 0)),
                pl.BlockSpec((C, tv), lambda i, j: (0, j)),
            ],
            out_specs=pl.BlockSpec((tn, tv), lambda i, j: (i, j)),
        ),
        compiler_params=pltpu.CompilerParams(
            dimension_semantics=("parallel", "parallel")),
    )(x_nc, lnf_w[None, :], wlm_bf16)


# ----------------------------------------------------------------------------
# OLT2D forward (glue: embedding gather, layout-tracked W/L re-layout, final head)
# ----------------------------------------------------------------------------
def olt2d_forward(idx, params, cfg):
    B, L, W = idx.shape
    C = cfg['n_embd']
    # embedding lookup (gather) kept in plain JAX -- not a Pallas hot path
    x = params['wte'][idx].astype(jnp.float32)                    # (B, L, W, C)
    # dropout(p) in eval mode -> identity

    # layout: 'W' => x stored as (B, L, W, C), 'L' => x stored as (B, W, L, C)
    cur = 'W'
    for li, ltype in enumerate(cfg['layer_types']):
        # transpose_shard_2d_ddp between differing layer types is identity on a single
        # device; only one layout transpose per type transition is performed here.
        # TODO(synk): could fold this relayout into a strided-DMA index_map instead of an XLA transpose.
        if ltype != cur:
            x = jnp.transpose(x, (0, 2, 1, 3))
            cur = ltype
        p = params['blocks'][li]
        if ltype == 'W':
            S, T = B * L, W
        else:
            S, T = B * W, L
        s_tile = _pick_s_tile(S, T)
        x2 = x.reshape(S * T, C)
        out = run_block(x2, p, n_head=cfg['n_head'], attn_scale=cfg['attn_scale'],
                        seq=T, s_tile=s_tile)
        x = out.reshape(x.shape)
    if cur == 'L':
        x = jnp.transpose(x, (0, 2, 1, 3))                        # back to (B, L, W, C)

    N = B * L * W
    emb_flat = x.reshape(N, C)
    tn = _pick_head_tile(N, 256, 8)
    tv = _pick_head_tile(params['wlm'].shape[1], 512, 128)
    logits_flat = run_head(emb_flat, params['lnf'], params['wlm'].astype(jnp.bfloat16),
                           cfg['lr_scale'], tn=tn, tv=tv)
    return logits_flat.reshape(B, L, W, -1)


# ----------------------------------------------------------------------------
# Pure-JAX reference (same math, bf16-rounded weights, f32 activations) for a
# correctness spot-check.
# ----------------------------------------------------------------------------
def _bf16_round(w):
    return w.astype(jnp.bfloat16).astype(jnp.float32)


def ref_block(x, p, n_head, attn_scale):
    S, T, C = x.shape
    D = C // n_head
    h = _rms(x) * p['ln1']
    qkv = h @ _bf16_round(p['wqkv'])
    q, k, v = jnp.split(qkv, 3, axis=-1)
    q = q.reshape(S, T, n_head, D)
    k = k.reshape(S, T, n_head, D)
    v = v.reshape(S, T, n_head, D)
    s = jnp.einsum('bthd,bshd->bhts', q, k) * attn_scale
    a = jax.nn.softmax(s, axis=-1)
    y = jnp.einsum('bhts,bshd->bthd', a, v).reshape(S, T, C)
    x = x + y @ _bf16_round(p['wproj'])
    h2 = _rms(x) * p['ln2']
    ff = h2 @ _bf16_round(p['wfc'])
    aa, g = jnp.split(ff, 2, axis=-1)
    return x + (aa * jax.nn.silu(g)) @ _bf16_round(p['wfp'])


def ref_forward(idx, params, cfg):
    B, L, W = idx.shape
    C = cfg['n_embd']
    x = params['wte'][idx].astype(jnp.float32)
    for li, ltype in enumerate(cfg['layer_types']):
        p = params['blocks'][li]
        if ltype == 'W':
            x = ref_block(x.reshape(B * L, W, C), p, cfg['n_head'],
                          cfg['attn_scale']).reshape(B, L, W, C)
        else:
            x2 = jnp.transpose(x, (0, 2, 1, 3)).reshape(B * W, L, C)
            out = ref_block(x2, p, cfg['n_head'], cfg['attn_scale'])
            x = jnp.transpose(out.reshape(B, W, L, C), (0, 2, 1, 3))
    emb = _rms(x) * params['lnf']
    logits = (emb.reshape(B * L * W, C) @ _bf16_round(params['wlm'])) * cfg['lr_scale']
    return logits.reshape(B, L, W, -1)


# ----------------------------------------------------------------------------
if __name__ == "__main__":
    # small config consistent with the module: idx is (B, L, W) token grid
    B, L, W = 2, 8, 8
    vocab_size = 64
    n_embd = 32
    n_head = 4
    n_layer = 2
    freq = 1  # 'alternate' composition

    # layer composition ("alternate", freq=1) -> W, L
    layer_types = []
    for i in range(n_layer):
        cycle = freq + 1
        layer_types.append('L' if (i % cycle) == freq else 'W')

    cfg = dict(
        n_embd=n_embd,
        n_head=n_head,
        layer_types=layer_types,
        attn_scale=8.0 / n_embd,        # softmax_scale = 8 / n_embd (as in reference)
        lr_scale=32.0 / n_embd,         # config.lr_scale
    )
    param_std = 1.0 / np.sqrt(n_embd)   # config.param_std

    key = jax.random.PRNGKey(0)
    keys = jax.random.split(key, 3 + 4 * n_layer)
    ki = iter(keys)

    params = {
        'wte': jax.random.normal(next(ki), (vocab_size, n_embd), jnp.float32),  # nn.Embedding default N(0,1)
        'lnf': jnp.ones((n_embd,), jnp.float32),
        'wlm': jax.random.normal(next(ki), (n_embd, vocab_size), jnp.float32) * 1e-5,
        'blocks': [],
    }
    for _ in range(n_layer):
        blk = {
            'ln1': jnp.ones((n_embd,), jnp.float32),
            'wqkv': jax.random.normal(next(ki), (n_embd, 3 * n_embd), jnp.float32) * param_std,
            'wproj': jax.random.normal(next(ki), (n_embd, n_embd), jnp.float32) * param_std,
            'ln2': jnp.ones((n_embd,), jnp.float32),
            'wfc': jax.random.normal(next(ki), (n_embd, 4 * n_embd), jnp.float32) * param_std,
            'wfp': jax.random.normal(next(ki), (2 * n_embd, n_embd), jnp.float32) * (param_std / np.sqrt(2.0)),
        }
        params['blocks'].append(blk)

    idx = jax.random.randint(jax.random.PRNGKey(42), (B, L, W), 0, vocab_size, jnp.int32)

    forward = jax.jit(lambda i, p: olt2d_forward(i, p, cfg))
    logits = jax.block_until_ready(forward(idx, params))
    assert logits.shape == (B, L, W, vocab_size)

    # correctness spot-check against a pure-JAX reference using the same bf16-rounded
    # weights (kernel uses bf16 matmul operands with f32 accumulation)
    ref = jax.block_until_ready(ref_forward(idx, params, cfg))
    np.testing.assert_allclose(np.asarray(logits), np.asarray(ref), rtol=5e-2, atol=5e-6)

    print("KERNEL_OK")
</pallas_src>

<mosaic_0001>
module attributes {stable_mosaic.version = 11 : i64} {
  func.func @block_kernel(%arg0: i32, %arg1: memref<128x32xf32, #tpu.memory_space<vmem>>, %arg2: memref<1x32xf32, #tpu.memory_space<vmem>>, %arg3: memref<32x96xbf16, #tpu.memory_space<vmem>>, %arg4: memref<32x32xbf16, #tpu.memory_space<vmem>>, %arg5: memref<1x32xf32, #tpu.memory_space<vmem>>, %arg6: memref<32x128xbf16, #tpu.memory_space<vmem>>, %arg7: memref<64x32xbf16, #tpu.memory_space<vmem>>, %arg8: memref<128x32xf32, #tpu.memory_space<vmem>>) attributes {dimension_semantics = [#tpu.dimension_semantics<parallel>], iteration_bounds = array<i64: 1>, scalar_prefetch = 0 : i64, scratch_operands = 0 : i64, tpu.core_type = #tpu.core_type<tc>, window_params = [{transform_indices = @transform_0, window_bounds = array<i64: 128, 32>}, {pipeline_mode = #tpu.pipeline_mode<synchronous>, transform_indices = @transform_1, window_bounds = array<i64: 1, 32>}, {pipeline_mode = #tpu.pipeline_mode<synchronous>, transform_indices = @transform_2, window_bounds = array<i64: 32, 96>}, {pipeline_mode = #tpu.pipeline_mode<synchronous>, transform_indices = @transform_3, window_bounds = array<i64: 32, 32>}, {pipeline_mode = #tpu.pipeline_mode<synchronous>, transform_indices = @transform_4, window_bounds = array<i64: 1, 32>}, {pipeline_mode = #tpu.pipeline_mode<synchronous>, transform_indices = @transform_5, window_bounds = array<i64: 32, 128>}, {pipeline_mode = #tpu.pipeline_mode<synchronous>, transform_indices = @transform_6, window_bounds = array<i64: 64, 32>}, {transform_indices = @transform_7, window_bounds = array<i64: 128, 32>}]} {
    %c0 = arith.constant 0 : index
    %c0_0 = arith.constant 0 : index
    %0 = vector.load %arg1[%c0, %c0_0] : memref<128x32xf32, #tpu.memory_space<vmem>>, vector<128x32xf32>
    %1 = arith.mulf %0, %0 : vector<128x32xf32>
    %cst = arith.constant dense<0.000000e+00> : vector<128xf32>
    %2 = vector.multi_reduction <add>, %1, %cst [1] : vector<128x32xf32> to vector<128xf32>
    %3 = vector.shape_cast %2 : vector<128xf32> to vector<128x1xf32>
    %cst_1 = arith.constant 3.200000e+01 : f32
    %4 = vector.broadcast %cst_1 : f32 to vector<128x1xf32>
    %5 = arith.divf %3, %4 : vector<128x1xf32>
    %cst_2 = arith.constant 9.99999974E-6 : f32
    %6 = vector.broadcast %cst_2 : f32 to vector<128x1xf32>
    %7 = arith.addf %5, %6 : vector<128x1xf32>
    %8 = math.rsqrt %7 : vector<128x1xf32>
    %9 = vector.broadcast %8 : vector<128x1xf32> to vector<128x32xf32>
    %10 = arith.mulf %0, %9 : vector<128x32xf32>
    %c0_3 = arith.constant 0 : index
    %c0_4 = arith.constant 0 : index
    %11 = vector.load %arg2[%c0_3, %c0_4] : memref<1x32xf32, #tpu.memory_space<vmem>>, vector<1x32xf32>
    %12 = vector.broadcast %11 : vector<1x32xf32> to vector<128x32xf32>
    %13 = arith.mulf %10, %12 : vector<128x32xf32>
    %14 = arith.truncf %13 : vector<128x32xf32> to vector<128x32xbf16>
    %c0_5 = arith.constant 0 : index
    %c0_6 = arith.constant 0 : index
    %15 = vector.load %arg3[%c0_5, %c0_6] : memref<32x96xbf16, #tpu.memory_space<vmem>>, vector<32x96xbf16>
    %cst_7 = arith.constant dense<0.000000e+00> : vector<128x96xf32>
    %16 = tpu.matmul %14, %15, %cst_7 {dimension_numbers = #tpu.dot_dimension_numbers<[1], [0], [0], [1], [0, 0, 1, 1], [], []>} : vector<128x32xbf16>, vector<32x96xbf16>, vector<128x96xf32> -> vector<128x96xf32>
    %17 = vector.shape_cast %16 : vector<128x96xf32> to vector<16x8x96xf32>
    %18 = vector.extract_strided_slice %17 {offsets = [0, 0, 0], sizes = [16, 8, 32], strides = [1, 1, 1]} : vector<16x8x96xf32> to vector<16x8x32xf32>
    %19 = vector.extract_strided_slice %17 {offsets = [0, 0, 32], sizes = [16, 8, 32], strides = [1, 1, 1]} : vector<16x8x96xf32> to vector<16x8x32xf32>
    %20 = vector.extract_strided_slice %17 {offsets = [0, 0, 64], sizes = [16, 8, 32], strides = [1, 1, 1]} : vector<16x8x96xf32> to vector<16x8x32xf32>
    %21 = vector.extract_strided_slice %18 {offsets = [0, 0, 0], sizes = [16, 8, 8], strides = [1, 1, 1]} : vector<16x8x32xf32> to vector<16x8x8xf32>
    %22 = arith.truncf %21 : vector<16x8x8xf32> to vector<16x8x8xbf16>
    %23 = vector.extract_strided_slice %19 {offsets = [0, 0, 0], sizes = [16, 8, 8], strides = [1, 1, 1]} : vector<16x8x32xf32> to vector<16x8x8xf32>
    %24 = arith.truncf %23 : vector<16x8x8xf32> to vector<16x8x8xbf16>
    %25 = vector.extract_strided_slice %20 {offsets = [0, 0, 0], sizes = [16, 8, 8], strides = [1, 1, 1]} : vector<16x8x32xf32> to vector<16x8x8xf32>
    %26 = arith.truncf %25 : vector<16x8x8xf32> to vector<16x8x8xbf16>
    "tpu.trace_start"() <{level = 10 : i32, message = "btd,bsd->bts"}> : () -> ()
    %cst_8 = arith.constant dense<0.000000e+00> : vector<16x8x8xf32>
    %27 = tpu.matmul %22, %24, %cst_8 {dimension_numbers = #tpu.dot_dimension_numbers<[2], [2], [1], [1], [0, 0, 0, 1, 1, 1], [0], [0]>} : vector<16x8x8xbf16>, vector<16x8x8xbf16>, vector<16x8x8xf32> -> vector<16x8x8xf32>
    "tpu.trace_stop"() : () -> ()
    %cst_9 = arith.constant dense<0xFF800000> : vector<16x8xf32>
    %28 = vector.multi_reduction <maximumf>, %27, %cst_9 [2] : vector<16x8x8xf32> to vector<16x8xf32>
    %29 = vector.shape_cast %28 : vector<16x8xf32> to vector<16x8x1xf32>
    %30 = vector.broadcast %29 : vector<16x8x1xf32> to vector<16x8x8xf32>
    %31 = arith.subf %27, %30 : vector<16x8x8xf32>
    %32 = math.exp %31 : vector<16x8x8xf32>
    %cst_10 = arith.constant dense<0.000000e+00> : vector<16x8xf32>
    %33 = vector.multi_reduction <add>, %32, %cst_10 [2] : vector<16x8x8xf32> to vector<16x8xf32>
    %34 = vector.shape_cast %33 : vector<16x8xf32> to vector<16x8x1xf32>
    %35 = tpu.reciprocal %34 {approx = true} : vector<16x8x1xf32> -> vector<16x8x1xf32>
    %36 = vector.broadcast %35 : vector<16x8x1xf32> to vector<16x8x8xf32>
    %37 = arith.mulf %32, %36 : vector<16x8x8xf32>
    %38 = arith.truncf %37 : vector<16x8x8xf32> to vector<16x8x8xbf16>
    "tpu.trace_start"() <{level = 10 : i32, message = "bts,bsd->btd"}> : () -> ()
    %cst_11 = arith.constant dense<0.000000e+00> : vector<16x8x8xf32>
    %39 = tpu.matmul %38, %26, %cst_11 {dimension_numbers = #tpu.dot_dimension_numbers<[2], [1], [1], [2], [0, 0, 0, 1, 1, 2], [0], [0]>} : vector<16x8x8xbf16>, vector<16x8x8xbf16>, vector<16x8x8xf32> -> vector<16x8x8xf32>
    "tpu.trace_stop"() : () -> ()
    %40 = vector.extract_strided_slice %18 {offsets = [0, 0, 8], sizes = [16, 8, 8], strides = [1, 1, 1]} : vector<16x8x32xf32> to vector<16x8x8xf32>
    %41 = arith.truncf %40 : vector<16x8x8xf32> to vector<16x8x8xbf16>
    %42 = vector.extract_strided_slice %19 {offsets = [0, 0, 8], sizes = [16, 8, 8], strides = [1, 1, 1]} : vector<16x8x32xf32> to vector<16x8x8xf32>
    %43 = arith.truncf %42 : vector<16x8x8xf32> to vector<16x8x8xbf16>
    %44 = vector.extract_strided_slice %20 {offsets = [0, 0, 8], sizes = [16, 8, 8], strides = [1, 1, 1]} : vector<16x8x32xf32> to vector<16x8x8xf32>
    %45 = arith.truncf %44 : vector<16x8x8xf32> to vector<16x8x8xbf16>
    "tpu.trace_start"() <{level = 10 : i32, message = "btd,bsd->bts"}> : () -> ()
    %cst_12 = arith.constant dense<0.000000e+00> : vector<16x8x8xf32>
    %46 = tpu.matmul %41, %43, %cst_12 {dimension_numbers = #tpu.dot_dimension_numbers<[2], [2], [1], [1], [0, 0, 0, 1, 1, 1], [0], [0]>} : vector<16x8x8xbf16>, vector<16x8x8xbf16>, vector<16x8x8xf32> -> vector<16x8x8xf32>
    "tpu.trace_stop"() : () -> ()
    %cst_13 = arith.constant dense<0xFF800000> : vector<16x8xf32>
    %47 = vector.multi_reduction <maximumf>, %46, %cst_13 [2] : vector<16x8x8xf32> to vector<16x8xf32>
    %48 = vector.shape_cast %47 : vector<16x8xf32> to vector<16x8x1xf32>
    %49 = vector.broadcast %48 : vector<16x8x1xf32> to vector<16x8x8xf32>
    %50 = arith.subf %46, %49 : vector<16x8x8xf32>
    %51 = math.exp %50 : vector<16x8x8xf32>
    %cst_14 = arith.constant dense<0.000000e+00> : vector<16x8xf32>
    %52 = vector.multi_reduction <add>, %51, %cst_14 [2] : vector<16x8x8xf32> to vector<16x8xf32>
    %53 = vector.shape_cast %52 : vector<16x8xf32> to vector<16x8x1xf32>
    %54 = tpu.reciprocal %53 {approx = true} : vector<16x8x1xf32> -> vector<16x8x1xf32>
    %55 = vector.broadcast %54 : vector<16x8x1xf32> to vector<16x8x8xf32>
    %56 = arith.mulf %51, %55 : vector<16x8x8xf32>
    %57 = arith.truncf %56 : vector<16x8x8xf32> to vector<16x8x8xbf16>
    "tpu.trace_start"() <{level = 10 : i32, message = "bts,bsd->btd"}> : () -> ()
    %cst_15 = arith.constant dense<0.000000e+00> : vector<16x8x8xf32>
    %58 = tpu.matmul %57, %45, %cst_15 {dimension_numbers = #tpu.dot_dimension_numbers<[2], [1], [1], [2], [0, 0, 0, 1, 1, 2], [0], [0]>} : vector<16x8x8xbf16>, vector<16x8x8xbf16>, vector<16x8x8xf32> -> vector<16x8x8xf32>
    "tpu.trace_stop"() : () -> ()
    %59 = vector.extract_strided_slice %18 {offsets = [0, 0, 16], sizes = [16, 8, 8], strides = [1, 1, 1]} : vector<16x8x32xf32> to vector<16x8x8xf32>
    %60 = arith.truncf %59 : vector<16x8x8xf32> to vector<16x8x8xbf16>
    %61 = vector.extract_strided_slice %19 {offsets = [0, 0, 16], sizes = [16, 8, 8], strides = [1, 1, 1]} : vector<16x8x32xf32> to vector<16x8x8xf32>
    %62 = arith.truncf %61 : vector<16x8x8xf32> to vector<16x8x8xbf16>
    %63 = vector.extract_strided_slice %20 {offsets = [0, 0, 16], sizes = [16, 8, 8], strides = [1, 1, 1]} : vector<16x8x32xf32> to vector<16x8x8xf32>
    %64 = arith.truncf %63 : vector<16x8x8xf32> to vector<16x8x8xbf16>
    "tpu.trace_start"() <{level = 10 : i32, message = "btd,bsd->bts"}> : () -> ()
    %cst_16 = arith.constant dense<0.000000e+00> : vector<16x8x8xf32>
    %65 = tpu.matmul %60, %62, %cst_16 {dimension_numbers = #tpu.dot_dimension_numbers<[2], [2], [1], [1], [0, 0, 0, 1, 1, 1], [0], [0]>} : vector<16x8x8xbf16>, vector<16x8x8xbf16>, vector<16x8x8xf32> -> vector<16x8x8xf32>
    "tpu.trace_stop"() : () -> ()
    %cst_17 = arith.constant dense<0xFF800000> : vector<16x8xf32>
    %66 = vector.multi_reduction <maximumf>, %65, %cst_17 [2] : vector<16x8x8xf32> to vector<16x8xf32>
    %67 = vector.shape_cast %66 : vector<16x8xf32> to vector<16x8x1xf32>
    %68 = vector.broadcast %67 : vector<16x8x1xf32> to vector<16x8x8xf32>
    %69 = arith.subf %65, %68 : vector<16x8x8xf32>
    %70 = math.exp %69 : vector<16x8x8xf32>
    %cst_18 = arith.constant dense<0.000000e+00> : vector<16x8xf32>
    %71 = vector.multi_reduction <add>, %70, %cst_18 [2] : vector<16x8x8xf32> to vector<16x8xf32>
    %72 = vector.shape_cast %71 : vector<16x8xf32> to vector<16x8x1xf32>
    %73 = tpu.reciprocal %72 {approx = true} : vector<16x8x1xf32> -> vector<16x8x1xf32>
    %74 = vector.broadcast %73 : vector<16x8x1xf32> to vector<16x8x8xf32>
    %75 = arith.mulf %70, %74 : vector<16x8x8xf32>
    %76 = arith.truncf %75 : vector<16x8x8xf32> to vector<16x8x8xbf16>
    "tpu.trace_start"() <{level = 10 : i32, message = "bts,bsd->btd"}> : () -> ()
    %cst_19 = arith.constant dense<0.000000e+00> : vector<16x8x8xf32>
    %77 = tpu.matmul %76, %64, %cst_19 {dimension_numbers = #tpu.dot_dimension_numbers<[2], [1], [1], [2], [0, 0, 0, 1, 1, 2], [0], [0]>} : vector<16x8x8xbf16>, vector<16x8x8xbf16>, vector<16x8x8xf32> -> vector<16x8x8xf32>
    "tpu.trace_stop"() : () -> ()
    %78 = vector.extract_strided_slice %18 {offsets = [0, 0, 24], sizes = [16, 8, 8], strides = [1, 1, 1]} : vector<16x8x32xf32> to vector<16x8x8xf32>
    %79 = arith.truncf %78 : vector<16x8x8xf32> to vector<16x8x8xbf16>
    %80 = vector.extract_strided_slice %19 {offsets = [0, 0, 24], sizes = [16, 8, 8], strides = [1, 1, 1]} : vector<16x8x32xf32> to vector<16x8x8xf32>
    %81 = arith.truncf %80 : vector<16x8x8xf32> to vector<16x8x8xbf16>
    %82 = vector.extract_strided_slice %20 {offsets = [0, 0, 24], sizes = [16, 8, 8], strides = [1, 1, 1]} : vector<16x8x32xf32> to vector<16x8x8xf32>
    %83 = arith.truncf %82 : vector<16x8x8xf32> to vector<16x8x8xbf16>
    "tpu.trace_start"() <{level = 10 : i32, message = "btd,bsd->bts"}> : () -> ()
    %cst_20 = arith.constant dense<0.000000e+00> : vector<16x8x8xf32>
    %84 = tpu.matmul %79, %81, %cst_20 {dimension_numbers = #tpu.dot_dimension_numbers<[2], [2], [1], [1], [0, 0, 0, 1, 1, 1], [0], [0]>} : vector<16x8x8xbf16>, vector<16x8x8xbf16>, vector<16x8x8xf32> -> vector<16x8x8xf32>
    "tpu.trace_stop"() : () -> ()
    %cst_21 = arith.constant dense<0xFF800000> : vector<16x8xf32>
    %85 = vector.multi_reduction <maximumf>, %84, %cst_21 [2] : vector<16x8x8xf32> to vector<16x8xf32>
    %86 = vector.shape_cast %85 : vector<16x8xf32> to vector<16x8x1xf32>
    %87 = vector.broadcast %86 : vector<16x8x1xf32> to vector<16x8x8xf32>
    %88 = arith.subf %84, %87 : vector<16x8x8xf32>
    %89 = math.exp %88 : vector<16x8x8xf32>
    %cst_22 = arith.constant dense<0.000000e+00> : vector<16x8xf32>
    %90 = vector.multi_reduction <add>, %89, %cst_22 [2] : vector<16x8x8xf32> to vector<16x8xf32>
    %91 = vector.shape_cast %90 : vector<16x8xf32> to vector<16x8x1xf32>
    %92 = tpu.reciprocal %91 {approx = true} : vector<16x8x1xf32> -> vector<16x8x1xf32>
    %93 = vector.broadcast %92 : vector<16x8x1xf32> to vector<16x8x8xf32>
    %94 = arith.mulf %89, %93 : vector<16x8x8xf32>
    %95 = arith.truncf %94 : vector<16x8x8xf32> to vector<16x8x8xbf16>
    "tpu.trace_start"() <{level = 10 : i32, message = "bts,bsd->btd"}> : () -> ()
    %cst_23 = arith.constant dense<0.000000e+00> : vector<16x8x8xf32>
    %96 = tpu.matmul %95, %83, %cst_23 {dimension_numbers = #tpu.dot_dimension_numbers<[2], [1], [1], [2], [0, 0, 0, 1, 1, 2], [0], [0]>} : vector<16x8x8xbf16>, vector<16x8x8xbf16>, vector<16x8x8xf32> -> vector<16x8x8xf32>
    "tpu.trace_stop"() : () -> ()
    %97 = tpu.concatenate %39, %58, %77, %96 in 2 : vector<16x8x8xf32>, vector<16x8x8xf32>, vector<16x8x8xf32>, vector<16x8x8xf32> -> vector<16x8x32xf32>
    %98 = vector.shape_cast %97 : vector<16x8x32xf32> to vector<128x32xf32>
    %99 = arith.truncf %98 : vector<128x32xf32> to vector<128x32xbf16>
    %c0_24 = arith.constant 0 : index
    %c0_25 = arith.constant 0 : index
    %100 = vector.load %arg4[%c0_24, %c0_25] : memref<32x32xbf16, #tpu.memory_space<vmem>>, vector<32x32xbf16>
    %cst_26 = arith.constant dense<0.000000e+00> : vector<128x32xf32>
    %101 = tpu.matmul %99, %100, %cst_26 {dimension_numbers = #tpu.dot_dimension_numbers<[1], [0], [0], [1], [0, 0, 1, 1], [], []>} : vector<128x32xbf16>, vector<32x32xbf16>, vector<128x32xf32> -> vector<128x32xf32>
    %102 = arith.addf %0, %101 : vector<128x32xf32>
    %103 = arith.mulf %102, %102 : vector<128x32xf32>
    %cst_27 = arith.constant dense<0.000000e+00> : vector<128xf32>
    %104 = vector.multi_reduction <add>, %103, %cst_27 [1] : vector<128x32xf32> to vector<128xf32>
    %105 = vector.shape_cast %104 : vector<128xf32> to vector<128x1xf32>
    %cst_28 = arith.constant 3.200000e+01 : f32
    %106 = vector.broadcast %cst_28 : f32 to vector<128x1xf32>
    %107 = arith.divf %105, %106 : vector<128x1xf32>
    %cst_29 = arith.constant 9.99999974E-6 : f32
    %108 = vector.broadcast %cst_29 : f32 to vector<128x1xf32>
    %109 = arith.addf %107, %108 : vector<128x1xf32>
    %110 = math.rsqrt %109 : vector<128x1xf32>
    %111 = vector.broadcast %110 : vector<128x1xf32> to vector<128x32xf32>
    %112 = arith.mulf %102, %111 : vector<128x32xf32>
    %c0_30 = arith.constant 0 : index
    %c0_31 = arith.constant 0 : index
    %113 = vector.load %arg5[%c0_30, %c0_31] : memref<1x32xf32, #tpu.memory_space<vmem>>, vector<1x32xf32>
    %114 = vector.broadcast %113 : vector<1x32xf32> to vector<128x32xf32>
    %115 = arith.mulf %112, %114 : vector<128x32xf32>
    %116 = arith.truncf %115 : vector<128x32xf32> to vector<128x32xbf16>
    %c0_32 = arith.constant 0 : index
    %c0_33 = arith.constant 0 : index
    %117 = vector.load %arg6[%c0_32, %c0_33] : memref<32x128xbf16, #tpu.memory_space<vmem>>, vector<32x128xbf16>
    %cst_34 = arith.constant dense<0.000000e+00> : vector<128x128xf32>
    %118 = tpu.matmul %116, %117, %cst_34 {dimension_numbers = #tpu.dot_dimension_numbers<[1], [0], [0], [1], [0, 0, 1, 1], [], []>} : vector<128x32xbf16>, vector<32x128xbf16>, vector<128x128xf32> -> vector<128x128xf32>
    %119 = vector.extract_strided_slice %118 {offsets = [0, 0], sizes = [128, 64], strides = [1, 1]} : vector<128x128xf32> to vector<128x64xf32>
    %120 = vector.extract_strided_slice %118 {offsets = [0, 64], sizes = [128, 64], strides = [1, 1]} : vector<128x128xf32> to vector<128x64xf32>
    %cst_35 = arith.constant 0.000000e+00 : f32
    %121 = vector.broadcast %cst_35 : f32 to vector<128x64xf32>
    %122 = arith.subf %121, %120 : vector<128x64xf32>
    %123 = math.exp %122 : vector<128x64xf32>
    %cst_36 = arith.constant 1.000000e+00 : f32
    %124 = vector.broadcast %cst_36 : f32 to vector<128x64xf32>
    %125 = arith.addf %124, %123 : vector<128x64xf32>
    %cst_37 = arith.constant 1.000000e+00 : f32
    %126 = vector.broadcast %cst_37 : f32 to vector<128x64xf32>
    %127 = arith.divf %126, %125 : vector<128x64xf32>
    %128 = arith.mulf %120, %127 : vector<128x64xf32>
    %129 = arith.mulf %119, %128 : vector<128x64xf32>
    %130 = arith.truncf %129 : vector<128x64xf32> to vector<128x64xbf16>
    %c0_38 = arith.constant 0 : index
    %c0_39 = arith.constant 0 : index
    %131 = vector.load %arg7[%c0_38, %c0_39] : memref<64x32xbf16, #tpu.memory_space<vmem>>, vector<64x32xbf16>
    %cst_40 = arith.constant dense<0.000000e+00> : vector<128x32xf32>
    %132 = tpu.matmul %130, %131, %cst_40 {dimension_numbers = #tpu.dot_dimension_numbers<[1], [0], [0], [1], [0, 0, 1, 1], [], []>} : vector<128x64xbf16>, vector<64x32xbf16>, vector<128x32xf32> -> vector<128x32xf32>
    %133 = arith.addf %102, %132 : vector<128x32xf32>
    %c0_41 = arith.constant 0 : index
    %c0_42 = arith.constant 0 : index
    %134 = vector.load %arg8[%c0_41, %c0_42] : memref<128x32xf32, #tpu.memory_space<vmem>>, vector<128x32xf32>
    tpu.vector_store %arg8[%c0_41, %c0_42], %133 {strides = array<i32>} : memref<128x32xf32, #tpu.memory_space<vmem>>, vector<128x32xf32>,
    return
  }
  func.func @transform_0(%arg0: i32) -> (i32, i32) {
    %c0_i32 = arith.constant 0 : i32
    %c0_i32_0 = arith.constant 0 : i32
    return %arg0, %c0_i32 : i32, i32
  }
  func.func @transform_1(%arg0: i32) -> (i32, i32) {
    %c0_i32 = arith.constant 0 : i32
    %c0_i32_0 = arith.constant 0 : i32
    %c0_i32_1 = arith.constant 0 : i32
    return %c0_i32, %c0_i32_0 : i32, i32
  }
  func.func @transform_2(%arg0: i32) -> (i32, i32) {
    %c0_i32 = arith.constant 0 : i32
    %c0_i32_0 = arith.constant 0 : i32
    %c0_i32_1 = arith.constant 0 : i32
    return %c0_i32, %c0_i32_0 : i32, i32
  }
  func.func @transform_3(%arg0: i32) -> (i32, i32) {
    %c0_i32 = arith.constant 0 : i32
    %c0_i32_0 = arith.constant 0 : i32
    %c0_i32_1 = arith.constant 0 : i32
    return %c0_i32, %c0_i32_0 : i32, i32
  }
  func.func @transform_4(%arg0: i32) -> (i32, i32) {
    %c0_i32 = arith.constant 0 : i32
    %c0_i32_0 = arith.constant 0 : i32
    %c0_i32_1 = arith.constant 0 : i32
    return %c0_i32, %c0_i32_0 : i32, i32
  }
  func.func @transform_5(%arg0: i32) -> (i32, i32) {
    %c0_i32 = arith.constant 0 : i32
    %c0_i32_0 = arith.constant 0 : i32
    %c0_i32_1 = arith.constant 0 : i32
    return %c0_i32, %c0_i32_0 : i32, i32
  }
  func.func @transform_6(%arg0: i32) -> (i32, i32) {
    %c0_i32 = arith.constant 0 : i32
    %c0_i32_0 = arith.constant 0 : i32
    %c0_i32_1 = arith.constant 0 : i32
    return %c0_i32, %c0_i32_0 : i32, i32
  }
  func.func @transform_7(%arg0: i32) -> (i32, i32) {
    %c0_i32 = arith.constant 0 : i32
    %c0_i32_0 = arith.constant 0 : i32
    return %arg0, %c0_i32 : i32, i32
  }
}

module attributes {stable_mosaic.version = 11 : i64} {
  func.func @head_kernel(%arg0: i32, %arg1: i32, %arg2: memref<128x32xf32, #tpu.memory_space<vmem>>, %arg3: memref<1x32xf32, #tpu.memory_space<vmem>>, %arg4: memref<32x64xbf16, #tpu.memory_space<vmem>>, %arg5: memref<128x64xf32, #tpu.memory_space<vmem>>) attributes {dimension_semantics = [#tpu.dimension_semantics<parallel>, #tpu.dimension_semantics<parallel>], iteration_bounds = array<i64: 1, 1>, scalar_prefetch = 0 : i64, scratch_operands = 0 : i64, tpu.core_type = #tpu.core_type<tc>, window_params = [{transform_indices = @transform_0, window_bounds = array<i64: 128, 32>}, {pipeline_mode = #tpu.pipeline_mode<synchronous>, transform_indices = @transform_1, window_bounds = array<i64: 1, 32>}, {transform_indices = @transform_2, window_bounds = array<i64: 32, 64>}, {transform_indices = @transform_3, window_bounds = array<i64: 128, 64>}]} {
    %c0 = arith.constant 0 : index
    %c0_0 = arith.constant 0 : index
    %0 = vector.load %arg2[%c0, %c0_0] : memref<128x32xf32, #tpu.memory_space<vmem>>, vector<128x32xf32>
    %1 = arith.mulf %0, %0 : vector<128x32xf32>
    %cst = arith.constant dense<0.000000e+00> : vector<128xf32>
    %2 = vector.multi_reduction <add>, %1, %cst [1] : vector<128x32xf32> to vector<128xf32>
    %3 = vector.shape_cast %2 : vector<128xf32> to vector<128x1xf32>
    %cst_1 = arith.constant 3.200000e+01 : f32
    %4 = vector.broadcast %cst_1 : f32 to vector<128x1xf32>
    %5 = arith.divf %3, %4 : vector<128x1xf32>
    %cst_2 = arith.constant 9.99999974E-6 : f32
    %6 = vector.broadcast %cst_2 : f32 to vector<128x1xf32>
    %7 = arith.addf %5, %6 : vector<128x1xf32>
    %8 = math.rsqrt %7 : vector<128x1xf32>
    %9 = vector.broadcast %8 : vector<128x1xf32> to vector<128x32xf32>
    %10 = arith.mulf %0, %9 : vector<128x32xf32>
    %c0_3 = arith.constant 0 : index
    %c0_4 = arith.constant 0 : index
    %11 = vector.load %arg3[%c0_3, %c0_4] : memref<1x32xf32, #tpu.memory_space<vmem>>, vector<1x32xf32>
    %12 = vector.broadcast %11 : vector<1x32xf32> to vector<128x32xf32>
    %13 = arith.mulf %10, %12 : vector<128x32xf32>
    %14 = arith.truncf %13 : vector<128x32xf32> to vector<128x32xbf16>
    %c0_5 = arith.constant 0 : index
    %c0_6 = arith.constant 0 : index
    %15 = vector.load %arg4[%c0_5, %c0_6] : memref<32x64xbf16, #tpu.memory_space<vmem>>, vector<32x64xbf16>
    %cst_7 = arith.constant dense<0.000000e+00> : vector<128x64xf32>
    %16 = tpu.matmul %14, %15, %cst_7 {dimension_numbers = #tpu.dot_dimension_numbers<[1], [0], [0], [1], [0, 0, 1, 1], [], []>} : vector<128x32xbf16>, vector<32x64xbf16>, vector<128x64xf32> -> vector<128x64xf32>
    %cst_8 = arith.constant 1.000000e+00 : f32
    %17 = vector.broadcast %cst_8 : f32 to vector<128x64xf32>
    %18 = arith.mulf %16, %17 : vector<128x64xf32>
    %c0_9 = arith.constant 0 : index
    %c0_10 = arith.constant 0 : index
    %19 = vector.load %arg5[%c0_9, %c0_10] : memref<128x64xf32, #tpu.memory_space<vmem>>, vector<128x64xf32>
    tpu.vector_store %arg5[%c0_9, %c0_10], %18 {strides = array<i32>} : memref<128x64xf32, #tpu.memory_space<vmem>>, vector<128x64xf32>,
    return
  }
  func.func @transform_0(%arg0: i32, %arg1: i32) -> (i32, i32) {
    %c0_i32 = arith.constant 0 : i32
    %c0_i32_0 = arith.constant 0 : i32
    return %arg0, %c0_i32 : i32, i32
  }
  func.func @transform_1(%arg0: i32, %arg1: i32) -> (i32, i32) {
    %c0_i32 = arith.constant 0 : i32
    %c0_i32_0 = arith.constant 0 : i32
    %c0_i32_1 = arith.constant 0 : i32
    return %c0_i32, %c0_i32_0 : i32, i32
  }
  func.func @transform_2(%arg0: i32, %arg1: i32) -> (i32, i32) {
    %c0_i32 = arith.constant 0 : i32
    %c0_i32_0 = arith.constant 0 : i32
    return %c0_i32, %arg1 : i32, i32
  }
  func.func @transform_3(%arg0: i32, %arg1: i32) -> (i32, i32) {
    %c0_i32 = arith.constant 0 : i32
    return %arg0, %arg1 : i32, i32
  }
}

</mosaic_0001>

<bundles_post_ra>
// kernel: _lambda_.5
= control target key start
LH: loop header
LB: loop body
LE: loop exit
PB: predicated region body
PF: predicated region fallthrough
CT: control target
= control target key end

     0   :  { %vm48_vm0 = vcmask 261120   ;;  %s1127_s0 = inlined_call_operand.vmem [shape: f32[128,32], index: 0, kind: input, shape index: {}]   ;;  %s1128_s1 = inlined_call_operand.vmem [shape: f32[1,32], index: 1, kind: input, shape index: {}]   ;;  %s1129_s2 = inlined_call_operand.vmem [shape: bf16[32,64], index: 2, kind: input, shape index: {}]   ;;  %s1130_s3 = inlined_call_operand.hbm [shape: f32[128,64], index: 3, kind: output, shape index: {}]  }
   0x1   :  { %v580_v0 = vld [vmem:[%s1127_s0 + $0x60] sm:$0xff]  ;;  %v601_v6 = vld [vmem:[%s1127_s0 + $0x68] sm:$0xff] }
   0x2   :  { %v585_v1 = vld [vmem:[%s1127_s0 + $0x40] sm:$0xff]  ;;  %v44_v3 = vmul.f32 %v580_v0, %v580_v0  ;;  %v606_v7 = vld [vmem:[%s1127_s0 + $0x48] sm:$0xff]  ;;  %v45_v12 = vmul.f32 %v601_v6, %v601_v6 }
   0x3   :  { %v590_v2 = vld [vmem:[%s1127_s0] sm:$0xff]  ;;  %v40_v4 = vmul.f32 %v585_v1, %v585_v1  ;;  %v614_v11 = vld [vmem:[%s1127_s0 + $0x8] sm:$0xff]  ;;  %v41_v13 = vmul.f32 %v606_v7, %v606_v7 }
   0x4   :  { %v32_v5 = vmul.f32 %v590_v2, %v590_v2  ;;  %v85_v8 = vsel %vm48_vm0, %v44_v3, 0.0 }
   0x5   :  { %v73_v9 = vsel %vm48_vm0, %v40_v4, 0.0  ;;  %86 = vadd.xlane.f32.xlu1 %v85_v8 }
   0x6   :  { %v49_v10 = vsel %vm48_vm0, %v32_v5, 0.0  ;;  %74 = vadd.xlane.f32.xlu0 %v73_v9 }
   0x7   :  { %50 = vadd.xlane.f32.xlu2 %v49_v10 }
   0x8   :  { %8 = vsyncpa [#allocation3], 0  ;;  %v33_v14 = vmul.f32 %v614_v11, %v614_v11  ;;  %v88_v15 = vsel %vm48_vm0, %v45_v12, 0.0  ;;  %v76_v16 = vsel %vm48_vm0, %v41_v13, 0.0  ;;  %v628_v18 = vld [vmem:[%s1127_s0 + $0x28] sm:$0xff]  ;;  %v633_v19 = vld [vmem:[%s1127_s0 + $0x20] sm:$0xff] }
   0x9   :  { %v638_v20 = vld [vmem:[%s1127_s0 + $0x50] sm:$0xff]  ;;  %v37_v21 = vmul.f32 %v628_v18, %v628_v18  ;;  %v36_v22 = vmul.f32 %v633_v19, %v633_v19  ;;  %v657_v28 = vld [vmem:[%s1127_s0 + $0x58] sm:$0xff]  ;;  %v553_v48 = vmov 32.0   ;;  %v481_v61 = vld [vmem:[%s1129_s2 + $0x8] sm:$0xff]  ;;  %s452_s24 = sshll.u32 %s1130_s3, 4  ;;  %s555_s25 = smov 128   ;;  %s453_s24 = int_to_ptr.hbm [resolvable:$true] %s452_s24 }
   0xa   :  { %v52_v17 = vsel %vm48_vm0, %v33_v14, 0.0  ;;  %v42_v23 = vmul.f32 %v638_v20, %v638_v20  ;;  %v652_v27 = vld [vmem:[%s1127_s0 + $0x70] sm:$0xff]  ;;  %v662_v29 = vld [vmem:[%s1127_s0 + $0x78] sm:$0xff]  ;;  %v43_v31 = vmul.f32 %v657_v28, %v657_v28  ;;  %493 = vrcp.f32 %v553_v48  ;;  %386 = vmatpush.bf16.msra.mxu0 %v481_v61  ;;  %483 = vmatpush.bf16.msra.mxu2 %v481_v61  ;;  %v480_v4 = vld [vmem:[%s1129_s2] sm:$0xff]  ;;  %s556_s26 = smov 8  }
   0xb   :  { %v64_v24 = vsel %vm48_vm0, %v37_v21, 0.0  ;;  %v61_v25 = vsel %vm48_vm0, %v36_v22, 0.0  ;;  %v46_v30 = vmul.f32 %v652_v27, %v652_v27  ;;  %v47_v32 = vmul.f32 %v662_v29, %v662_v29  ;;  %v676_v36 = vld [vmem:[%s1127_s0 + $0x18] sm:$0xff]  ;;  %v681_v37 = vld [vmem:[%s1127_s0 + $0x10] sm:$0xff]  ;;  %484 = vmatpush.bf16.msra.mxu3 %v481_v61  ;;  %482 = vmatpush.bf16.msra.mxu1 %v481_v61 }
   0xc   :  { %v79_v26 = vsel %vm48_vm0, %v42_v23, 0.0  ;;  %v82_v34 = vsel %vm48_vm0, %v43_v31, 0.0  ;;  %v686_v38 = vld [vmem:[%s1127_s0 + $0x30] sm:$0xff]  ;;  %v35_v39 = vmul.f32 %v676_v36, %v676_v36  ;;  %v34_v40 = vmul.f32 %v681_v37, %v681_v37  ;;  %v700_v45 = vld [vmem:[%s1127_s0 + $0x38] sm:$0xff] }
   0xd   :  { %89 = vadd.xlane.f32.xlu1 %v88_v15  ;;  %v91_v33 = vsel %vm48_vm0, %v46_v30, 0.0  ;;  %v94_v35 = vsel %vm48_vm0, %v47_v32, 0.0  ;;  %v38_v41 = vmul.f32 %v686_v38, %v686_v38  ;;  %v39_v46 = vmul.f32 %v700_v45, %v700_v45 }
   0xe   :  { %77 = vadd.xlane.f32.xlu0 %v76_v16  ;;  %v58_v42 = vsel %vm48_vm0, %v35_v39, 0.0  ;;  %v55_v43 = vsel %vm48_vm0, %v34_v40, 0.0  ;;  %387 = vmatpush.bf16.msra.mxu0 %v480_v4 }
   0xf   :  { %53 = vadd.xlane.f32.xlu2 %v52_v17  ;;  %v67_v44 = vsel %vm48_vm0, %v38_v41, 0.0  ;;  %v70_v47 = vsel %vm48_vm0, %v39_v46, 0.0  ;;  %486 = vmatpush.bf16.msra.mxu2 %v480_v4 }
  0x10   :  { %v494_v49 = vpop.eup %493  ;;  %487 = vmatpush.bf16.msra.mxu3 %v480_v4  ;;  %485 = vmatpush.bf16.msra.mxu1 %v480_v4 }
  0x11   :  { %v98_v50 = vmul.f32 32.0, %v494_v49  ;;  %vm102_vm1 = vweird.f32 %v494_v49 }
  0x13   :  { %v99_v51 = vsub.f32 1.0, %v98_v50 }
  0x15   :  { %65 = vadd.xlane.f32.xlu1 %v64_v24  ;;  %v100_v52 = vmul.f32 %v494_v49, %v99_v51 }
  0x16   :  { %62 = vadd.xlane.f32.xlu0 %v61_v25 }
  0x17   :  { %80 = vadd.xlane.f32.xlu2 %v79_v26  ;;  %v101_v53 = vadd.f32 %v494_v49, %v100_v52 }
  0x19   :  { %v705_v54 = vsel %vm102_vm1, %v494_v49, %v101_v53 }
  0x1d   :  { %92 = vadd.xlane.f32.xlu1 %v91_v33 }
  0x1e   :  { %83 = vadd.xlane.f32.xlu0 %v82_v34 }
  0x1f   :  { %95 = vadd.xlane.f32.xlu2 %v94_v35 }
  0x25   :  { %59 = vadd.xlane.f32.xlu1 %v58_v42 }
  0x26   :  { %56 = vadd.xlane.f32.xlu0 %v55_v43 }
  0x27   :  { %68 = vadd.xlane.f32.xlu2 %v67_v44 }
  0x2e   :  { %71 = vadd.xlane.f32.xlu0 %v70_v47 }
  0x78   :  { %v87_v55 = vpop.xlane.xlu1 %86 }
  0x79   :  { %v75_v56 = vpop.xlane.xlu0 %74  ;;  %v116_v57 = vmul.f32 %v705_v54, %v87_v55 }
  0x7a   :  { %v112_v58 = vmul.f32 %v705_v54, %v75_v56  ;;  %v51_v59 = vpop.xlane.xlu2 %50 }
  0x7b   :  { %v104_v60 = vmul.f32 %v705_v54, %v51_v59  ;;  %v713_v62 = vadd.f32 1e-05, %v116_v57 }
  0x7c   :  { %v715_v63 = vadd.f32 1e-05, %v112_v58 }
  0x7d   :  { %v717_v3 = vadd.f32 1e-05, %v104_v60  ;;  %495 = vrsqrt.f32 %v713_v62  ;;  %vm262_vm2 = vweird.f32 %v713_v62 }
  0x7e   :  { %497 = vrsqrt.f32 %v715_v63  ;;  %vm222_vm5 = vweird.f32 %v715_v63 }
  0x7f   :  { %499 = vrsqrt.f32 %v717_v3  ;;  %vm142_vm3 = vweird.f32 %v717_v3 }
  0x80   :  { %v90_v5 = vpop.xlane.xlu1 %89 }
  0x81   :  { %v78_v8 = vpop.xlane.xlu0 %77  ;;  %v117_v9 = vmul.f32 %v705_v54, %v90_v5 }
  0x82   :  { %v113_v10 = vmul.f32 %v705_v54, %v78_v8  ;;  %v54_v12 = vpop.xlane.xlu2 %53 }
  0x83   :  { %v105_v13 = vmul.f32 %v705_v54, %v54_v12  ;;  %v728_v14 = vpop.eup %495  ;;  %v730_v15 = vadd.f32 1e-05, %v117_v9 }
  0x84   :  { %v732_v16 = vadd.f32 1e-05, %v113_v10  ;;  %v734_v17 = vpop.eup %497  ;;  %v257_v21 = vmul.f32 %v728_v14, %v713_v62  ;;  %vm263_vm4 = vweird.f32 %v728_v14 }
  0x85   :  { %v738_v22 = vadd.f32 1e-05, %v105_v13  ;;  %v740_v23 = vpop.eup %499  ;;  %v217_v24 = vmul.f32 %v734_v17, %v715_v63  ;;  %501 = vrsqrt.f32 %v730_v15  ;;  %vm223_vm6 = vweird.f32 %v734_v17  ;;  %vm813_vm12 = vmor %vm262_vm2, %vm263_vm4 }
  0x86   :  { %v137_v25 = vmul.f32 %v740_v23, %v717_v3  ;;  %503 = vrsqrt.f32 %v732_v16  ;;  %v258_v26 = vmul.f32 %v728_v14, %v257_v21  ;;  %vm272_vm7 = vweird.f32 %v730_v15  ;;  %vm833_vm14 = vmor %vm222_vm5, %vm223_vm6 }
  0x87   :  { %505 = vrsqrt.f32 %v738_v22  ;;  %v218_v32 = vmul.f32 %v734_v17, %v217_v24  ;;  %vm143_vm8 = vweird.f32 %v740_v23  ;;  %vm152_vm10 = vweird.f32 %v738_v22 }
  0x88   :  { %v66_v30 = vpop.xlane.xlu1 %65  ;;  %v138_v39 = vmul.f32 %v740_v23, %v137_v25  ;;  %v259_v41 = vmul.f32 0.5, %v258_v26  ;;  %vm232_vm11 = vweird.f32 %v732_v16  ;;  %vm848_vm1 = vmor %vm142_vm3, %vm143_vm8 }
  0x89   :  { %v63_v31 = vpop.xlane.xlu0 %62  ;;  %v109_v33 = vmul.f32 %v705_v54, %v66_v30  ;;  %v219_v48 = vmul.f32 0.5, %v218_v32 }
  0x8a   :  { %v108_v34 = vmul.f32 %v705_v54, %v63_v31  ;;  %v81_v35 = vpop.xlane.xlu2 %80  ;;  %v139_v51 = vmul.f32 0.5, %v138_v39  ;;  %v260_v55 = vsub.f32 1.5, %v259_v41 }
  0x8b   :  { %v754_v40 = vpop.eup %501  ;;  %v756_v42 = vadd.f32 1e-05, %v109_v33  ;;  %v114_v50 = vmul.f32 %v705_v54, %v81_v35  ;;  %v220_v61 = vsub.f32 1.5, %v219_v48 }
  0x8c   :  { %v758_v43 = vpop.eup %503  ;;  %v267_v44 = vmul.f32 %v754_v40, %v730_v15  ;;  %v763_v46 = vadd.f32 1e-05, %v108_v34  ;;  %v140_v9 = vsub.f32 1.5, %v139_v51  ;;  %v791_v24 = vmul.f32 %v728_v14, %v260_v55 }
  0x8d   :  { %v765_v47 = vpop.eup %505  ;;  %v227_v49 = vmul.f32 %v758_v43, %v732_v16  ;;  %507 = vrsqrt.f32 %v756_v42  ;;  %v783_v4 = vadd.f32 1e-05, %v114_v50  ;;  %vm273_vm9 = vweird.f32 %v754_v40 }
  0x8e   :  { %v268_v52 = vmul.f32 %v754_v40, %v267_v44  ;;  %v147_v53 = vmul.f32 %v765_v47, %v738_v22  ;;  %509 = vrsqrt.f32 %v763_v46  ;;  %v801_v32 = vmul.f32 %v734_v17, %v220_v61  ;;  %vm872_vm3 = vmor %vm272_vm7, %vm273_vm9 }
  0x8f   :  { %v228_v56 = vmul.f32 %v758_v43, %v227_v49  ;;  %511 = vrsqrt.f32 %v783_v4  ;;  %v141_v41 = vmul.f32 %v740_v23, %v140_v9  ;;  %vm233_vm13 = vweird.f32 %v758_v43 }
  0x90   :  { %v269_v57 = vmul.f32 0.5, %v268_v52  ;;  %v148_v58 = vmul.f32 %v765_v47, %v147_v53  ;;  %v93_v59 = vpop.xlane.xlu1 %92  ;;  %v265_v49 = vsel %vm813_vm12, %v728_v14, %v791_v24  ;;  %vm153_vm15 = vweird.f32 %v765_v47  ;;  %vm913_vm7 = vmor %vm232_vm11, %vm233_vm13 }
  0x91   :  { %v84_v60 = vpop.xlane.xlu0 %83  ;;  %v118_v5 = vmul.f32 %v705_v54, %v93_v59  ;;  %v229_v25 = vmul.f32 0.5, %v228_v56  ;;  %v145_v3 = vsel %vm848_vm1, %v740_v23, %v141_v41  ;;  %vm192_vm2 = vweird.f32 %v756_v42  ;;  %vm886_vm5 = vmor %vm152_vm10, %vm153_vm15 }
  0x92   :  { %v96_v8 = vpop.xlane.xlu2 %95  ;;  %v149_v10 = vmul.f32 0.5, %v148_v58  ;;  %v115_v12 = vmul.f32 %v705_v54, %v84_v60  ;;  %v270_v30 = vsub.f32 1.5, %v269_v57  ;;  %vm182_vm6 = vweird.f32 %v763_v46 }
  0x93   :  { %v119_v13 = vmul.f32 %v705_v54, %v96_v8  ;;  %v788_v21 = vpop.eup %507  ;;  %v794_v26 = vadd.f32 1e-05, %v118_v5  ;;  %v230_v50 = vsub.f32 1.5, %v229_v25  ;;  %v225_v5 = vsel %vm833_vm14, %v734_v17, %v801_v32 }
  0x94   :  { %v187_v31 = vmul.f32 %v788_v21, %v756_v42  ;;  %v150_v33 = vsub.f32 1.5, %v149_v10  ;;  %v805_v34 = vadd.f32 1e-05, %v115_v12  ;;  %v807_v35 = vpop.eup %509  ;;  %v838_v52 = vmul.f32 %v754_v40, %v270_v30 }
  0x95   :  { %513 = vrsqrt.f32 %v794_v26  ;;  %v820_v48 = vadd.f32 1e-05, %v119_v13  ;;  %v177_v62 = vmul.f32 %v807_v35, %v763_v46  ;;  %v842_v57 = vpop.eup %511  ;;  %v877_v13 = vmul.f32 %v758_v43, %v230_v50 }
  0x96   :  { %v188_v44 = vmul.f32 %v788_v21, %v187_v31  ;;  %515 = vrsqrt.f32 %v805_v34  ;;  %v151_v58 = vmul.f32 %v765_v47, %v150_v33  ;;  %v237_v8 = vmul.f32 %v842_v57, %v783_v4 }
  0x97   :  { %517 = vrsqrt.f32 %v820_v48  ;;  %v178_v59 = vmul.f32 %v807_v35, %v177_v62  ;;  %vm193_vm4 = vweird.f32 %v788_v21  ;;  %v275_v22 = vsel %vm872_vm3, %v754_v40, %v838_v52 }
  0x98   :  { %v189_v53 = vmul.f32 0.5, %v188_v44  ;;  %v60_v55 = vpop.xlane.xlu1 %59  ;;  %v238_v31 = vmul.f32 %v842_v57, %v237_v8  ;;  %v155_v50 = vsel %vm886_vm5, %v765_v47, %v151_v58  ;;  %v235_v58 = vsel %vm913_vm7, %v758_v43, %v877_v13  ;;  %vm952_vm13 = vmor %vm192_vm2, %vm193_vm4 }
  0x99   :  { %v57_v56 = vpop.xlane.xlu0 %56  ;;  %v107_v60 = vmul.f32 %v705_v54, %v60_v55  ;;  %v179_v23 = vmul.f32 0.5, %v178_v59  ;;  %vm183_vm8 = vweird.f32 %v807_v35  ;;  %vm242_vm9 = vweird.f32 %v783_v4 }
  0x9a   :  { %v106_v61 = vmul.f32 %v705_v54, %v57_v56  ;;  %v69_v9 = vpop.xlane.xlu2 %68  ;;  %v190_v15 = vsub.f32 1.5, %v189_v53  ;;  %v239_v63 = vmul.f32 0.5, %v238_v31  ;;  %vm243_vm10 = vweird.f32 %v842_v57  ;;  %vm974_vm7 = vmor %vm182_vm6, %vm183_vm8 }
  0x9b   :  { %v866_v10 = vpop.eup %513  ;;  %v880_v25 = vadd.f32 1e-05, %v107_v60  ;;  %v110_v62 = vmul.f32 %v705_v54, %v69_v9  ;;  %v180_v56 = vsub.f32 1.5, %v179_v23  ;;  %v296_v60 = vmul.f32 %v145_v3, %v590_v2  ;;  %vm1020_vm12 = vmor %vm242_vm9, %vm243_vm10 }
  0x9c   :  { %v277_v33 = vmul.f32 %v866_v10, %v794_v26  ;;  %v894_v41 = vadd.f32 1e-05, %v106_v61  ;;  %v896_v44 = vpop.eup %515  ;;  %v931_v61 = vld [vmem:[%s1128_s1] ss:$0 sm:$0xff]  ;;  %v934_v8 = vmul.f32 %v788_v21, %v190_v15  ;;  %v297_v3 = vmul.f32 %v155_v50, %v614_v11  ;;  %s554_s1 = smov [#allocation2]  }
  0x9d   :  { %519 = vrsqrt.f32 %v880_v25  ;;  %v907_v53 = vpop.eup %517  ;;  %v247_v47 = vmul.f32 %v896_v44, %v805_v34  ;;  %v941_v2 = vadd.f32 1e-05, %v110_v62  ;;  %v181_v23 = vmul.f32 %v807_v35, %v180_v56  ;;  %s450_s21 = sshll.u32 %s554_s1, 4  ;;  %s451_s21 = int_to_ptr.vmem [resolvable:$true] %s450_s21 }
  0x9e   :  { %v278_v59 = vmul.f32 %v866_v10, %v277_v33  ;;  %v287_v16 = vmul.f32 %v907_v53, %v820_v48  ;;  %521 = vrsqrt.f32 %v894_v41  ;;  %v240_v30 = vsub.f32 1.5, %v239_v63 }
  0x9f   :  { %v248_v43 = vmul.f32 %v896_v44, %v247_v47  ;;  %vm172_vm11 = vweird.f32 %v880_v25  ;;  %vm283_vm1 = vweird.f32 %v866_v10  ;;  %vm252_vm5 = vweird.f32 %v805_v34 }
  0xa0   :  { %v279_v9 = vmul.f32 0.5, %v278_v59  ;;  %v288_v13 = vmul.f32 %v907_v53, %v287_v16  ;;  %523 = vrsqrt.f32 %v941_v2  ;;  %v316_v50 = vmul.f32 %v931_v61, %v296_v60 }
  0xa1   :  { %v249_v31 = vmul.f32 0.5, %v248_v43  ;;  %v317_v62 = vmul.f32 %v931_v61, %v297_v3  ;;  %v195_v42 = vsel %vm952_vm13, %v788_v21, %v934_v8  ;;  %vm253_vm2 = vweird.f32 %v896_v44 }
  0xa2   :  { %v280_v15 = vsub.f32 1.5, %v279_v9  ;;  %v289_v11 = vmul.f32 0.5, %v288_v13  ;;  %vm292_vm4 = vweird.f32 %v820_v48  ;;  %vm293_vm15 = vweird.f32 %v907_v53  ;;  %v72_v13 = vpop.xlane.xlu0 %71  ;;  %vm1030_vm3 = vmor %vm252_vm5, %vm253_vm2 }
  0xa3   :  { %v946_v33 = vpop.eup %519  ;;  %v250_v56 = vsub.f32 1.5, %v249_v31  ;;  %v332_v21 = vpack.c.bf16 %v317_v62, %v316_v50  ;;  %v304_v16 = vmul.f32 %v225_v5, %v585_v1  ;;  %v185_v46 = vsel %vm974_vm7, %v807_v35, %v181_v23 }
  0xa4   :  { %v167_v63 = vmul.f32 %v946_v33, %v880_v25  ;;  %v290_v47 = vsub.f32 1.5, %v289_v11  ;;  %v522_v60 = vpop.eup %521  ;;  %v241_v8 = vmul.f32 %v842_v57, %v240_v30  ;;  %v305_v43 = vmul.f32 %v235_v58, %v606_v7 }
  0xa5   :  { %v281_v3 = vmul.f32 %v866_v10, %v280_v15  ;;  %v251_v51 = vmul.f32 %v896_v44, %v250_v56  ;;  %vm173_vm6 = vweird.f32 %v946_v33  ;;  %v157_v1 = vmul.f32 %v522_v60, %v894_v41  ;;  %472 = vmatmul.msk.bf16.vlgmr.msra.gmra.mxu0 %vm48_vm0, %v332_v21 }
  0xa6   :  { %v168_v9 = vmul.f32 %v946_v33, %v167_v63  ;;  %v324_v32 = vmul.f32 %v931_v61, %v304_v16  ;;  %v325_v35 = vmul.f32 %v931_v61, %v305_v43  ;;  %v308_v7 = vmul.f32 %v265_v49, %v580_v0  ;;  %v1004_v5 = vpop.eup %523  ;;  %vm1046_vm8 = vmor %vm172_vm11, %vm173_vm6 }
  0xa7   :  { %v291_v58 = vmul.f32 %v907_v53, %v290_v47  ;;  %v158_v23 = vmul.f32 %v522_v60, %v157_v1  ;;  %v309_v30 = vmul.f32 %v275_v22, %v601_v6  ;;  %v111_v15 = vmul.f32 %v705_v54, %v72_v13  ;;  %vm1073_vm11 = vmor %vm292_vm4, %vm293_vm15 }
  0xa8   :  { %v169_v17 = vmul.f32 0.5, %v168_v9  ;;  %vm163_vm14 = vweird.f32 %v522_v60  ;;  %v197_v14 = vmul.f32 %v1004_v5, %v941_v2  ;;  %v336_v0 = vpack.c.bf16 %v325_v35, %v324_v32 }
  0xa9   :  { %v159_v39 = vmul.f32 0.5, %v158_v23  ;;  %v328_v40 = vmul.f32 %v931_v61, %v308_v7  ;;  %v329_v6 = vmul.f32 %v931_v61, %v309_v30  ;;  %v127_v54 = vadd.f32 1e-05, %v111_v15 }
  0xaa   :  { %v170_v31 = vsub.f32 1.5, %v169_v17  ;;  %v198_v52 = vmul.f32 %v1004_v5, %v197_v14  ;;  %476 = vmatmul.msk.bf16.vlgmr.msra.gmra.mxu2 %vm48_vm0, %v336_v0  ;;  %v300_v12 = vmul.f32 %v185_v46, %v633_v19  ;;  %v301_v22 = vmul.f32 %v195_v42, %v628_v18 }
  0xab   :  { %v255_v55 = vsel %vm1030_vm3, %v896_v44, %v251_v51  ;;  %v160_v11 = vsub.f32 1.5, %v159_v39  ;;  %v338_v50 = vpack.c.bf16 %v329_v6, %v328_v40  ;;  %525 = vrsqrt.f32 %v127_v54 }
  0xac   :  { %v171_v4 = vmul.f32 %v946_v33, %v170_v31  ;;  %vm1153_vm9 = vweird.f32 %v794_v26  ;;  %v199_v25 = vmul.f32 0.5, %v198_v52  ;;  %v320_v44 = vmul.f32 %v931_v61, %v300_v12 }
  0xad   :  { %vm1054_vm10 = vmor %vm1153_vm9, %vm283_vm1  ;;  %v321_v62 = vmul.f32 %v931_v61, %v301_v22  ;;  %v245_v42 = vsel %vm1020_vm12, %v842_v57, %v241_v8  ;;  %vm162_vm13 = vweird.f32 %v894_v41  ;;  %478 = vmatmul.msk.bf16.vlgmr.msra.gmra.mxu3 %vm48_vm0, %v338_v50  ;;  %v295_v57 = vsel %vm1073_vm11, %v907_v53, %v291_v58 }
  0xae   :  { %v175_v19 = vsel %vm1046_vm8, %v946_v33, %v171_v4  ;;  %v285_v26 = vsel %vm1054_vm10, %v866_v10, %v281_v3  ;;  %v161_v33 = vmul.f32 %v522_v60, %v160_v11  ;;  %vm164_vm1 = vmor %vm162_vm13, %vm163_vm14  ;;  %v307_v63 = vmul.f32 %v255_v55, %v657_v28 }
  0xaf   :  { %v334_v10 = vpack.c.bf16 %v321_v62, %v320_v44  ;;  %v299_v48 = vmul.f32 %v175_v19, %v676_v36  ;;  %v200_v47 = vsub.f32 1.5, %v199_v25  ;;  %v306_v21 = vmul.f32 %v245_v42, %v638_v20 }
  0xb0   :  { %v165_v59 = vsel %vm164_vm1, %v522_v60, %v161_v33  ;;  %v310_v46 = vmul.f32 %v285_v26, %v652_v27  ;;  %v311_v53 = vmul.f32 %v295_v57, %v662_v29  ;;  %v327_v28 = vmul.f32 %v931_v61, %v307_v63 }
  0xb1   :  { %474 = vmatmul.msk.bf16.vlgmr.msra.gmra.mxu1 %vm48_vm0, %v334_v10  ;;  %v298_v41 = vmul.f32 %v165_v59, %v681_v37  ;;  %v526_v16 = vpop.eup %525  ;;  %v319_v8 = vmul.f32 %v931_v61, %v299_v48  ;;  %vm202_vm15 = vweird.f32 %v941_v2  ;;  %v201_v60 = vmul.f32 %v1004_v5, %v200_v47 }
  0xb2   :  { %v207_v9 = vmul.f32 %v526_v16, %v127_v54  ;;  %vm203_vm5 = vweird.f32 %v1004_v5  ;;  %v326_v37 = vmul.f32 %v931_v61, %v306_v21  ;;  %v330_v27 = vmul.f32 %v931_v61, %v310_v46 }
  0xb3   :  { %v318_v36 = vmul.f32 %v931_v61, %v298_v41  ;;  %v331_v29 = vmul.f32 %v931_v61, %v311_v53  ;;  %vm204_vm2 = vmor %vm202_vm15, %vm203_vm5  ;;  %vm213_vm4 = vweird.f32 %v526_v16  ;;  %vm212_vm7 = vweird.f32 %v127_v54 }
  0xb4   :  { %v208_v20 = vmul.f32 %v526_v16, %v207_v9  ;;  %v337_v3 = vpack.c.bf16 %v327_v28, %v326_v37  ;;  %v205_v2 = vsel %vm204_vm2, %v1004_v5, %v201_v60  ;;  %vm214_vm6 = vmor %vm212_vm7, %vm213_vm4  ;;  %vm429_vm14 = vcmask 523264  }
  0xb5   :  { %v333_v43 = vpack.c.bf16 %v319_v8, %v318_v36  ;;  %v339_v1 = vpack.c.bf16 %v331_v29, %v330_v27  ;;  %v302_v32 = vmul.f32 %v205_v2, %v686_v38 }
  0xb6   :  { %v209_v13 = vmul.f32 0.5, %v208_v20 }
  0xb7   :  { %473 = vmatmul.msk.bf16.gmra.mxu0 %vm48_vm0, %v333_v43  ;;  %v322_v58 = vmul.f32 %v931_v61, %v302_v32 }
  0xb8   :  { %v210_v51 = vsub.f32 1.5, %v209_v13 }
  0xba   :  { %v211_v17 = vmul.f32 %v526_v16, %v210_v51  ;;  %477 = vmatmul.msk.bf16.gmra.mxu2 %vm48_vm0, %v337_v3 }
  0xbc   :  { %v215_v35 = vsel %vm214_vm6, %v526_v16, %v211_v17 }
  0xbd   :  { %479 = vmatmul.msk.bf16.gmra.mxu3 %vm48_vm0, %v339_v1  ;;  %v303_v7 = vmul.f32 %v215_v35, %v700_v45 }
  0xbf   :  { %v323_v23 = vmul.f32 %v931_v61, %v303_v7 }
  0xc1   :  { %v335_v5 = vpack.c.bf16 %v323_v23, %v322_v58 }
  0xc3   :  { %475 = vmatmul.msk.bf16.gmra.mxu1 %vm48_vm0, %v335_v5 }
 0x122   :  { %v389_v30 = vpop.f32.mrf.mxu0 }
 0x123   :  { %430 = vst.msk [vmem:[#allocation2] sm:$0xff] %vm429_vm14, %v389_v30 }
 0x12a   :  { %v391_v15 = vpop.f32.mrf.mxu0 }
 0x12b   :  { %431 = vst.msk [vmem:[#allocation2 + $0x8] sm:$0xff] %vm429_vm14, %v391_v15 }
 0x12d   :  { %v409_v38 = vpop.f32.mrf.mxu2 }
 0x12e   :  { %v399_v31 = vpop.f32.mrf.mxu1  ;;  %438 = vst.msk [vmem:[#allocation2 + $0x40] sm:$0xff] %vm429_vm14, %v409_v38 }
 0x12f   :  { %434 = vst.msk [vmem:[#allocation2 + $0x20] sm:$0xff] %vm429_vm14, %v399_v31 }
 0x130   :  { %v419_v45 = vpop.f32.mrf.mxu3 }
 0x131   :  { %442 = vst.msk [vmem:[#allocation2 + $0x60] sm:$0xff] %vm429_vm14, %v419_v45 }
 0x134   :  { %v394_v61 = vpop.f32.mrf.mxu0 }
 0x135   :  { %v411_v14 = vpop.f32.mrf.mxu2  ;;  %432 = vst.msk [vmem:[#allocation2 + $0x10] sm:$0xff] %vm429_vm14, %v394_v61 }
 0x136   :  { %v401_v0 = vpop.f32.mrf.mxu1  ;;  %439 = vst.msk [vmem:[#allocation2 + $0x48] sm:$0xff] %vm429_vm14, %v411_v14 }
 0x137   :  { %435 = vst.msk [vmem:[#allocation2 + $0x28] sm:$0xff] %vm429_vm14, %v401_v0 }
 0x138   :  { %v421_v24 = vpop.f32.mrf.mxu3 }
 0x139   :  { %443 = vst.msk [vmem:[#allocation2 + $0x68] sm:$0xff] %vm429_vm14, %v421_v24 }
 0x13c   :  { %v396_v39 = vpop.f32.mrf.mxu0 }
 0x13d   :  { %v414_v40 = vpop.f32.mrf.mxu2  ;;  %433 = vst.msk [vmem:[#allocation2 + $0x18] sm:$0xff] %vm429_vm14, %v396_v39 }
 0x13e   :  { %440 = vst.msk [vmem:[#allocation2 + $0x50] sm:$0xff] %vm429_vm14, %v414_v40 }
 0x140   :  { %v424_v6 = vpop.f32.mrf.mxu3  ;;  %v404_v54 = vpop.f32.mrf.mxu1 }
 0x141   :  { %444 = vst.msk [vmem:[#allocation2 + $0x70] sm:$0xff] %vm429_vm14, %v424_v6 }
 0x142   :  { %436 = vst.msk [vmem:[#allocation2 + $0x30] sm:$0xff] %vm429_vm14, %v404_v54 }
 0x145   :  { %v416_v49 = vpop.f32.mrf.mxu2 }
 0x146   :  { %441 = vst.msk [vmem:[#allocation2 + $0x58] sm:$0xff] %vm429_vm14, %v416_v49 }
 0x148   :  { %v426_v4 = vpop.f32.mrf.mxu3  ;;  %v406_v52 = vpop.f32.mrf.mxu1 }
 0x149   :  { %445 = vst.msk [vmem:[#allocation2 + $0x78] sm:$0xff] %vm429_vm14, %v426_v4 }
 0x14a   :  { %437 = vst.msk [vmem:[#allocation2 + $0x38] sm:$0xff] %vm429_vm14, %v406_v52 }
 0x14b   :  { %458 = dma.vmem_to_hbm [thread:$0]  %s451_s21, 2048, %s453_s24, [#allocation3], %s555_s25, %s555_s25, %s556_s26  }
 0x14c   :  { %551 = dma.done.wait [#allocation3], 2048  }
 0x14d   :  { %552 = vsyncadd [#allocation3], 4294965248 }
 0x14e   :  { %463 = vsyncpa [#allocation3], 1 }

// kernel: _lambda_.3
= control target key start
LH: loop header
LB: loop body
LE: loop exit
PB: predicated region body
PF: predicated region fallthrough
CT: control target
= control target key end

     0   :  { %vm59_vm0 = vcmask 261120   ;;  %v6109_v48 = vmov 32.0   ;;  %s6111_s15 = smov 96   ;;  %s6112_s16 = smov 88   ;;  %s8926_s0 = inlined_call_operand.vmem [shape: f32[128,32], index: 0, kind: input, shape index: {}, may-alias: {0,7}]   ;;  %s8927_s1 = inlined_call_operand.vmem [shape: f32[1,32], index: 1, kind: input, shape index: {}]   ;;  %s8928_s2 = inlined_call_operand.vmem [shape: bf16[32,96], index: 2, kind: input, shape index: {}]   ;;  %s8929_s3 = inlined_call_operand.vmem [shape: bf16[32,32], index: 3, kind: input, shape index: {}]   ;;  %s8930_s4 = inlined_call_operand.vmem [shape: f32[1,32], index: 4, kind: input, shape index: {}]   ;;  %s8931_s5 = inlined_call_operand.vmem [shape: bf16[32,128], index: 5, kind: input, shape index: {}]   ;;  %s8932_s6 = inlined_call_operand.vmem [shape: bf16[64,32], index: 6, kind: input, shape index: {}]   ;;  %s8933_s7 = inlined_call_operand.vmem [shape: f32[128,32], index: 7, kind: output, shape index: {}, may-alias: {0,7}]  }
   0x1   :  { %v6167_v0 = vld [vmem:[%s8926_s0 + $0x20] sm:$0xff]  ;;  %v6172_v1 = vld [vmem:[%s8926_s0 + $0x10] sm:$0xff]  ;;  %v6188_v6 = vld [vmem:[%s8926_s0 + $0x28] sm:$0xff]  ;;  %5707 = vrcp.f32 %v6109_v48  ;;  %s6113_s17 = smov 120   ;;  %s6114_s18 = smov 56  }
   0x2   :  { %v6177_v2 = vld [vmem:[%s8926_s0] sm:$0xff]  ;;  %v47_v3 = vmul.f32 %v6167_v0, %v6167_v0  ;;  %v45_v4 = vmul.f32 %v6172_v1, %v6172_v1  ;;  %v6193_v7 = vld [vmem:[%s8926_s0 + $0x18] sm:$0xff]  ;;  %v6201_v11 = vld [vmem:[%s8926_s0 + $0x8] sm:$0xff]  ;;  %v48_v12 = vmul.f32 %v6188_v6, %v6188_v6  ;;  %s6115_s19 = smov 80   ;;  %s6116_s20 = smov 112  }
   0x3   :  { %v43_v5 = vmul.f32 %v6177_v2, %v6177_v2  ;;  %v46_v13 = vmul.f32 %v6193_v7, %v6193_v7  ;;  %v44_v14 = vmul.f32 %v6201_v11, %v6201_v11  ;;  %v6215_v18 = vld [vmem:[%s8926_s0 + $0x40] sm:$0xff]  ;;  %v6220_v19 = vld [vmem:[%s8926_s0 + $0x38] sm:$0xff]  ;;  %v6225_v20 = vld [vmem:[%s8926_s0 + $0x30] sm:$0xff]  ;;  %s6117_s21 = smov 48   ;;  %s6118_s22 = smov 72  }
   0x4   :  { %v72_v8 = vsel %vm59_vm0, %v47_v3, 0.0  ;;  %v66_v9 = vsel %vm59_vm0, %v45_v4, 0.0  ;;  %v75_v15 = vsel %vm59_vm0, %v48_v12, 0.0  ;;  %v51_v21 = vmul.f32 %v6215_v18, %v6215_v18  ;;  %v6239_v27 = vld [vmem:[%s8926_s0 + $0x58] sm:$0xff]  ;;  %v6244_v28 = vld [vmem:[%s8926_s0 + $0x50] sm:$0xff]  ;;  %v6249_v29 = vld [vmem:[%s8926_s0 + $0x48] sm:$0xff] }
   0x5   :  { %v60_v10 = vsel %vm59_vm0, %v43_v5, 0.0  ;;  %73 = vadd.xlane.f32.xlu2 %v72_v8  ;;  %67 = vadd.xlane.f32.xlu1 %v66_v9  ;;  %v69_v16 = vsel %vm59_vm0, %v46_v13, 0.0  ;;  %v63_v17 = vsel %vm59_vm0, %v44_v14, 0.0  ;;  %v50_v22 = vmul.f32 %v6220_v19, %v6220_v19  ;;  %v6263_v36 = vld [vmem:[%s8926_s0 + $0x68] sm:$0xff]  ;;  %v6268_v37 = vld [vmem:[%s8926_s0 + $0x70] sm:$0xff]  ;;  %v6273_v38 = vld [vmem:[%s8926_s0 + $0x60] sm:$0xff] }
   0x6   :  { %61 = vadd.xlane.f32.xlu0 %v60_v10  ;;  %v49_v23 = vmul.f32 %v6225_v20, %v6225_v20  ;;  %v84_v24 = vsel %vm59_vm0, %v51_v21, 0.0  ;;  %v54_v30 = vmul.f32 %v6239_v27, %v6239_v27  ;;  %v53_v31 = vmul.f32 %v6244_v28, %v6244_v28  ;;  %v6287_v45 = vld [vmem:[%s8926_s0 + $0x78] sm:$0xff]  ;;  %v5553_v58 = vld [vmem:[%s8928_s2 + $0x8] sm:$0xff]  ;;  %v5552_v61 = vld [vmem:[%s8928_s2] sm:$0xff]  ;;  %s6119_s23 = smov 104   ;;  %s6120_s24 = smov 40  }
   0x7   :  { %v81_v25 = vsel %vm59_vm0, %v50_v22, 0.0  ;;  %v52_v32 = vmul.f32 %v6249_v29, %v6249_v29  ;;  %v56_v39 = vmul.f32 %v6263_v36, %v6263_v36  ;;  %v57_v40 = vmul.f32 %v6268_v37, %v6268_v37  ;;  %v5708_v49 = vpop.eup %5707  ;;  %397 = vmatpush.bf16.msra.mxu0 %v5553_v58  ;;  %5562 = vmatpush.bf16.msra.mxu3 %v5553_v58  ;;  %s6121_s25 = smov 8   ;;  %s6122_s26 = smov 16  }
   0x8   :  { %v78_v26 = vsel %vm59_vm0, %v49_v23, 0.0  ;;  %v93_v33 = vsel %vm59_vm0, %v54_v30, 0.0  ;;  %v90_v34 = vsel %vm59_vm0, %v53_v31, 0.0  ;;  %v55_v41 = vmul.f32 %v6273_v38, %v6273_v38  ;;  %s6123_s27 = smov 24  }
   0x9   :  { %v87_v35 = vsel %vm59_vm0, %v52_v32, 0.0  ;;  %v99_v42 = vsel %vm59_vm0, %v56_v39, 0.0  ;;  %v102_v43 = vsel %vm59_vm0, %v57_v40, 0.0  ;;  %v58_v46 = vmul.f32 %v6287_v45, %v6287_v45 }
   0xa   :  { %v96_v44 = vsel %vm59_vm0, %v55_v41, 0.0  ;;  %v109_v50 = vmul.f32 32.0, %v5708_v49  ;;  %vm113_vm1 = vweird.f32 %v5708_v49 }
   0xb   :  { %v105_v47 = vsel %vm59_vm0, %v58_v46, 0.0  ;;  %398 = vmatpush.bf16.msra.mxu0 %v5552_v61  ;;  %5563 = vmatpush.bf16.msra.mxu3 %v5552_v61 }
   0xc   :  { %v110_v51 = vsub.f32 1.0, %v109_v50 }
   0xd   :  { %76 = vadd.xlane.f32.xlu2 %v75_v15  ;;  %70 = vadd.xlane.f32.xlu1 %v69_v16 }
   0xe   :  { %64 = vadd.xlane.f32.xlu0 %v63_v17  ;;  %v111_v52 = vmul.f32 %v5708_v49, %v110_v51 }
  0x10   :  { %v112_v53 = vadd.f32 %v5708_v49, %v111_v52 }
  0x12   :  { %v6292_v54 = vsel %vm113_vm1, %v5708_v49, %v112_v53 }
  0x13   :  { %8942 = vst [vmem:[#allocation2_spill] sm:$0xff] %v6292_v54 }
  0x15   :  { %85 = vadd.xlane.f32.xlu2 %v84_v24  ;;  %82 = vadd.xlane.f32.xlu1 %v81_v25 }
  0x16   :  { %79 = vadd.xlane.f32.xlu0 %v78_v26 }
  0x1d   :  { %94 = vadd.xlane.f32.xlu2 %v93_v33  ;;  %91 = vadd.xlane.f32.xlu1 %v90_v34 }
  0x1e   :  { %88 = vadd.xlane.f32.xlu0 %v87_v35 }
  0x25   :  { %100 = vadd.xlane.f32.xlu1 %v99_v42  ;;  %103 = vadd.xlane.f32.xlu2 %v102_v43 }
  0x26   :  { %97 = vadd.xlane.f32.xlu0 %v96_v44 }
  0x2e   :  { %106 = vadd.xlane.f32.xlu0 %v105_v47 }
  0x78   :  { %v74_v55 = vpop.xlane.xlu2 %73  ;;  %v68_v56 = vpop.xlane.xlu1 %67 }
  0x79   :  { %v62_v57 = vpop.xlane.xlu0 %61  ;;  %v117_v8 = vmul.f32 %v6292_v54, %v68_v56  ;;  %v119_v39 = vmul.f32 %v6292_v54, %v74_v55 }
  0x7a   :  { %v115_v59 = vmul.f32 %v6292_v54, %v62_v57 }
  0x7b   :  { %v6306_v14 = vadd.f32 1e-05, %v117_v8  ;;  %v6330_v47 = vadd.f32 1e-05, %v119_v39 }
  0x7c   :  { %v131_v60 = vadd.f32 1e-05, %v115_v59 }
  0x7d   :  { %vm173_vm12 = vweird.f32 %v6306_v14  ;;  %vm193_vm14 = vweird.f32 %v6330_v47 }
  0x7e   :  { %5709 = vrsqrt.f32 %v131_v60  ;;  %vm153_vm4 = vweird.f32 %v131_v60 }
  0x80   :  { %v77_v62 = vpop.xlane.xlu2 %76  ;;  %v71_v63 = vpop.xlane.xlu1 %70 }
  0x81   :  { %v118_v3 = vmul.f32 %v6292_v54, %v71_v63  ;;  %v65_v4 = vpop.xlane.xlu0 %64  ;;  %v120_v26 = vmul.f32 %v6292_v54, %v77_v62  ;;  %v6349_v63 = vld [vmem:[%s8927_s1] ss:$0 sm:$0xff]  ;;  %s6110_s1 = smov 64  }
  0x82   :  { %v116_v5 = vmul.f32 %v6292_v54, %v65_v4 }
  0x83   :  { %v6304_v12 = vadd.f32 1e-05, %v118_v3  ;;  %v6326_v42 = vadd.f32 1e-05, %v120_v26 }
  0x84   :  { %v132_v9 = vadd.f32 1e-05, %v116_v5  ;;  %v5710_v10 = vpop.eup %5709 }
  0x85   :  { %v148_v13 = vmul.f32 %v5710_v10, %v131_v60  ;;  %vm154_vm2 = vweird.f32 %v5710_v10  ;;  %vm183_vm10 = vweird.f32 %v6304_v12  ;;  %vm203_vm1 = vweird.f32 %v6326_v42 }
  0x86   :  { %5711 = vrsqrt.f32 %v132_v9  ;;  %vm6332_vm5 = vmor %vm153_vm4, %vm154_vm2  ;;  %vm163_vm6 = vweird.f32 %v132_v9 }
  0x87   :  { %v149_v15 = vmul.f32 %v5710_v10, %v148_v13  ;;  %5713 = vrsqrt.f32 %v6304_v12 }
  0x88   :  { %v6308_v16 = vpop.xlane.xlu2 %85  ;;  %v83_v17 = vpop.xlane.xlu1 %82  ;;  %5715 = vrsqrt.f32 %v6306_v14 }
  0x89   :  { %v80_v21 = vpop.xlane.xlu0 %79  ;;  %v150_v22 = vmul.f32 0.5, %v149_v15  ;;  %5717 = vrsqrt.f32 %v6326_v42 }
  0x8a   :  { %5719 = vrsqrt.f32 %v6330_v47 }
  0x8b   :  { %v151_v30 = vsub.f32 1.5, %v150_v22  ;;  %v122_v22 = vmul.f32 %v6292_v54, %v83_v17 }
  0x8c   :  { %v5712_v23 = vpop.eup %5711 }
  0x8d   :  { %v158_v24 = vmul.f32 %v5712_v23, %v132_v9  ;;  %v6312_v25 = vpop.eup %5713  ;;  %v152_v44 = vmul.f32 %v5710_v10, %v151_v30  ;;  %vm164_vm3 = vweird.f32 %v5712_v23 }
  0x8e   :  { %v6319_v34 = vpop.eup %5715  ;;  %v178_v40 = vmul.f32 %v6312_v25, %v6304_v12  ;;  %vm165_vm7 = vmor %vm163_vm6, %vm164_vm3  ;;  %vm184_vm8 = vweird.f32 %v6312_v25 }
  0x8f   :  { %v159_v31 = vmul.f32 %v5712_v23, %v158_v24  ;;  %v168_v43 = vmul.f32 %v6319_v34, %v6306_v14  ;;  %v156_v53 = vsel %vm6332_vm5, %v5710_v10, %v152_v44  ;;  %v6357_v10 = vpop.eup %5717  ;;  %vm174_vm9 = vweird.f32 %v6319_v34  ;;  %vm6385_vm11 = vmor %vm183_vm10, %vm184_vm8 }
  0x90   :  { %v6315_v32 = vpop.xlane.xlu2 %94  ;;  %v6317_v33 = vpop.xlane.xlu1 %91  ;;  %v179_v49 = vmul.f32 %v6312_v25, %v178_v40  ;;  %v307_v61 = vmul.f32 %v156_v53, %v6177_v2  ;;  %v198_v24 = vmul.f32 %v6357_v10, %v6326_v42  ;;  %vm6399_vm13 = vmor %vm173_vm12, %vm174_vm9  ;;  %vm204_vm5 = vweird.f32 %v6357_v10 }
  0x91   :  { %v6321_v35 = vpop.xlane.xlu0 %88  ;;  %v160_v41 = vmul.f32 0.5, %v159_v31  ;;  %v169_v51 = vmul.f32 %v6319_v34, %v168_v43  ;;  %vm6448_vm9 = vmor %vm203_vm1, %vm204_vm5 }
  0x92   :  { %v180_v57 = vmul.f32 0.5, %v179_v49  ;;  %v327_v2 = vmul.f32 %v6349_v63, %v307_v61 }
  0x93   :  { %v161_v46 = vsub.f32 1.5, %v160_v41  ;;  %v170_v3 = vmul.f32 0.5, %v169_v51  ;;  %v6380_v41 = vadd.f32 1e-05, %v122_v22 }
  0x94   :  { %v181_v13 = vsub.f32 1.5, %v180_v57 }
  0x95   :  { %v162_v50 = vmul.f32 %v5712_v23, %v161_v46  ;;  %v171_v15 = vsub.f32 1.5, %v170_v3  ;;  %v199_v46 = vmul.f32 %v6357_v10, %v198_v24 }
  0x96   :  { %v182_v39 = vmul.f32 %v6312_v25, %v181_v13 }
  0x97   :  { %v166_v55 = vsel %vm165_vm7, %v5712_v23, %v162_v50  ;;  %v121_v23 = vmul.f32 %v6292_v54, %v80_v21  ;;  %v172_v21 = vmul.f32 %v6319_v34, %v171_v15  ;;  %v200_v57 = vmul.f32 0.5, %v199_v46 }
  0x98   :  { %v101_v52 = vpop.xlane.xlu1 %100  ;;  %v104_v60 = vpop.xlane.xlu2 %103  ;;  %v308_v62 = vmul.f32 %v166_v55, %v6201_v11  ;;  %v186_v12 = vsel %vm6385_vm11, %v6312_v25, %v182_v39 }
  0x99   :  { %v98_v56 = vpop.xlane.xlu0 %97  ;;  %v128_v58 = vmul.f32 %v6292_v54, %v101_v52  ;;  %v129_v8 = vmul.f32 %v6292_v54, %v104_v60  ;;  %v6361_v11 = vpop.eup %5719  ;;  %v6389_v49 = vadd.f32 1e-05, %v121_v23  ;;  %v176_v25 = vsel %vm6399_vm13, %v6319_v34, %v172_v21 }
  0x9a   :  { %v127_v59 = vmul.f32 %v6292_v54, %v98_v56  ;;  %v328_v9 = vmul.f32 %v6349_v63, %v308_v62  ;;  %v188_v17 = vmul.f32 %v6361_v11, %v6330_v47  ;;  %vm194_vm15 = vweird.f32 %v6361_v11 }
  0x9b   :  { %v6351_v4 = vadd.f32 1e-05, %v128_v58  ;;  %v6368_v26 = vadd.f32 1e-05, %v129_v8  ;;  %v310_v58 = vmul.f32 %v186_v12, %v6193_v7  ;;  %v309_v3 = vmul.f32 %v176_v25, %v6172_v1  ;;  %vm6462_vm10 = vmor %vm193_vm14, %vm194_vm15 }
  0x9c   :  { %v6353_v5 = vadd.f32 1e-05, %v127_v59  ;;  %v343_v30 = vpack.c.bf16 %v328_v9, %v327_v2  ;;  %v189_v52 = vmul.f32 %v6361_v11, %v188_v17  ;;  %v201_v7 = vsub.f32 1.5, %v200_v57 }
  0x9d   :  { %5721 = vrsqrt.f32 %v6351_v4  ;;  %vm283_vm3 = vweird.f32 %v6351_v4  ;;  %v330_v13 = vmul.f32 %v6349_v63, %v310_v58  ;;  %vm293_vm11 = vweird.f32 %v6368_v26 }
  0x9e   :  { %5723 = vrsqrt.f32 %v6353_v5  ;;  %5360 = vmatmul.msk.bf16.vlgmr.msra.gmra.mxu0 %vm59_vm0, %v343_v30  ;;  %v190_v62 = vmul.f32 0.5, %v189_v52  ;;  %vm273_vm7 = vweird.f32 %v6353_v5  ;;  %v202_v21 = vmul.f32 %v6357_v10, %v201_v7 }
  0x9f   :  { %5725 = vrsqrt.f32 %v6368_v26 }
  0xa0   :  { %v191_v30 = vsub.f32 1.5, %v190_v62 }
  0xa1   :  { %v107_v31 = vpop.xlane.xlu0 %106 }
  0xa2   :  { %v130_v40 = vmul.f32 %v6292_v54, %v107_v31  ;;  %v329_v31 = vmul.f32 %v6349_v63, %v309_v3 }
  0xa3   :  { %v5722_v44 = vpop.eup %5721 }
  0xa4   :  { %v6382_v43 = vadd.f32 1e-05, %v130_v40  ;;  %v278_v50 = vmul.f32 %v5722_v44, %v6351_v4  ;;  %v5724_v51 = vpop.eup %5723  ;;  %vm284_vm2 = vweird.f32 %v5722_v44  ;;  %v124_v4 = vmul.f32 %v6292_v54, %v6321_v35 }
  0xa5   :  { %v268_v55 = vmul.f32 %v5724_v51, %v6353_v5  ;;  %v6409_v56 = vpop.eup %5725  ;;  %vm274_vm4 = vweird.f32 %v5724_v51  ;;  %vm285_vm6 = vmor %vm283_vm3, %vm284_vm2  ;;  %v344_v48 = vpack.c.bf16 %v330_v13, %v329_v31 }
  0xa6   :  { %5727 = vrsqrt.f32 %v6382_v43  ;;  %v279_v14 = vmul.f32 %v5722_v44, %v278_v50  ;;  %v288_v61 = vmul.f32 %v6409_v56, %v6368_v26  ;;  %vm275_vm8 = vmor %vm273_vm7, %vm274_vm4  ;;  %v6466_v25 = vadd.f32 1e-05, %v124_v4 }
  0xa7   :  { %5729 = vrsqrt.f32 %v6380_v41  ;;  %v269_v60 = vmul.f32 %v5724_v51, %v268_v55  ;;  %v192_v55 = vmul.f32 %v6361_v11, %v191_v30  ;;  %vm294_vm12 = vweird.f32 %v6409_v56 }
  0xa8   :  { %5731 = vrsqrt.f32 %v6389_v49  ;;  %v280_v59 = vmul.f32 0.5, %v279_v14  ;;  %v289_v23 = vmul.f32 %v6409_v56, %v288_v61  ;;  %vm303_vm13 = vweird.f32 %v6382_v43  ;;  %vm6488_vm15 = vmor %vm293_vm11, %vm294_vm12 }
  0xa9   :  { %v270_v8 = vmul.f32 0.5, %v269_v60  ;;  %v196_v62 = vsel %vm6462_vm10, %v6361_v11, %v192_v55  ;;  %5733 = vrsqrt.f32 %v6466_v25  ;;  %v126_v30 = vmul.f32 %v6292_v54, %v6315_v32 }
  0xaa   :  { %v281_v34 = vsub.f32 1.5, %v280_v59  ;;  %v290_v12 = vmul.f32 0.5, %v289_v23  ;;  %v206_v59 = vsel %vm6448_vm9, %v6357_v10, %v202_v21  ;;  %vm223_vm4 = vweird.f32 %v6380_v41 }
  0xab   :  { %v271_v22 = vsub.f32 1.5, %v270_v8  ;;  %v312_v10 = vmul.f32 %v206_v59, %v6188_v6  ;;  %vm243_vm12 = vweird.f32 %v6466_v25 }
  0xac   :  { %v6419_v9 = vpop.eup %5727  ;;  %v282_v15 = vmul.f32 %v5722_v44, %v281_v34  ;;  %v291_v58 = vsub.f32 1.5, %v290_v12 }
  0xad   :  { %v6423_v2 = vpop.eup %5729  ;;  %v298_v1 = vmul.f32 %v6419_v9, %v6382_v43  ;;  %v272_v39 = vmul.f32 %v5724_v51, %v271_v22  ;;  %vm304_vm14 = vweird.f32 %v6419_v9  ;;  %v311_v43 = vmul.f32 %v196_v62, %v6167_v0 }
  0xae   :  { %v6428_v24 = vpop.eup %5731  ;;  %v286_v17 = vsel %vm285_vm6, %v5722_v44, %v282_v15  ;;  %v218_v46 = vmul.f32 %v6423_v2, %v6380_v41  ;;  %v123_v44 = vmul.f32 %v6292_v54, %v6308_v16  ;;  %5361 = vmatmul.msk.bf16.gmra.mxu0 %vm59_vm0, %v344_v48  ;;  %v292_v34 = vmul.f32 %v6409_v56, %v291_v58  ;;  %vm305_vm1 = vmor %vm303_vm13, %vm304_vm14 }
  0xaf   :  { %v299_v40 = vmul.f32 %v6419_v9, %v298_v1  ;;  %v320_v35 = vmul.f32 %v286_v17, %v6263_v36  ;;  %v208_v50 = vmul.f32 %v6428_v24, %v6389_v49  ;;  %v276_v53 = vsel %vm275_vm8, %v5724_v51, %v272_v39  ;;  %v5734_v22 = vpop.eup %5733 }
  0xb0   :  { %v319_v36 = vmul.f32 %v276_v53, %v6273_v38  ;;  %v219_v57 = vmul.f32 %v6423_v2, %v218_v46  ;;  %v6474_v60 = vadd.f32 1e-05, %v123_v44  ;;  %v332_v7 = vmul.f32 %v6349_v63, %v312_v10 }
  0xb1   :  { %v300_v52 = vmul.f32 0.5, %v299_v40  ;;  %v340_v14 = vmul.f32 %v6349_v63, %v320_v35  ;;  %v209_v38 = vmul.f32 %v6428_v24, %v208_v50  ;;  %v296_v6 = vsel %vm6488_vm15, %v6409_v56, %v292_v34 }
  0xb2   :  { %v339_v16 = vmul.f32 %v6349_v63, %v319_v36  ;;  %v220_v26 = vmul.f32 0.5, %v219_v57  ;;  %5735 = vrsqrt.f32 %v6474_v60  ;;  %v331_v23 = vmul.f32 %v6349_v63, %v311_v43 }
  0xb3   :  { %v301_v51 = vsub.f32 1.5, %v300_v52  ;;  %v210_v3 = vmul.f32 0.5, %v209_v38  ;;  %vm224_vm2 = vweird.f32 %v6423_v2  ;;  %v125_v0 = vmul.f32 %v6292_v54, %v6317_v33 }
  0xb4   :  { %v349_v47 = vpack.c.bf16 %v340_v14, %v339_v16  ;;  %v221_v13 = vsub.f32 1.5, %v220_v26  ;;  %v321_v31 = vmul.f32 %v296_v6, %v6268_v37  ;;  %vm214_vm3 = vweird.f32 %v6428_v24  ;;  %vm225_vm5 = vmor %vm223_vm4, %vm224_vm2 }
  0xb5   :  { %v302_v61 = vmul.f32 %v6419_v9, %v301_v51  ;;  %v211_v15 = vsub.f32 1.5, %v210_v3  ;;  %vm213_vm6 = vweird.f32 %v6389_v49  ;;  %v142_v37 = vadd.f32 1e-05, %v126_v30 }
  0xb6   :  { %5366 = vmatmul.msk.bf16.vlgmr.msra.gmra.mxu3 %vm59_vm0, %v349_v47  ;;  %v222_v39 = vmul.f32 %v6423_v2, %v221_v13  ;;  %vm215_vm7 = vmor %vm213_vm6, %vm214_vm3  ;;  %v141_v33 = vadd.f32 1e-05, %v125_v0  ;;  %v341_v17 = vmul.f32 %v6349_v63, %v321_v31  ;;  %vm233_vm8 = vweird.f32 %v6474_v60 }
  0xb7   :  { %v306_v11 = vsel %vm305_vm1, %v6419_v9, %v302_v61  ;;  %v345_v9 = vpack.c.bf16 %v332_v7, %v331_v23  ;;  %v212_v56 = vmul.f32 %v6428_v24, %v211_v15  ;;  %5737 = vrsqrt.f32 %v142_v37 }
  0xb8   :  { %v322_v1 = vmul.f32 %v306_v11, %v6287_v45  ;;  %v5736_v4 = vpop.eup %5735  ;;  %v238_v45 = vmul.f32 %v5734_v22, %v6466_v25  ;;  %v226_v48 = vsel %vm225_vm5, %v6423_v2, %v222_v39  ;;  %5739 = vrsqrt.f32 %v141_v33 }
  0xb9   :  { %v228_v40 = vmul.f32 %v5736_v4, %v6474_v60  ;;  %v216_v46 = vsel %vm215_vm7, %v6428_v24, %v212_v56  ;;  %v314_v49 = vmul.f32 %v226_v48, %v6220_v19  ;;  %vm234_vm9 = vweird.f32 %v5736_v4 }
  0xba   :  { %v342_v32 = vmul.f32 %v6349_v63, %v322_v1  ;;  %v239_v21 = vmul.f32 %v5734_v22, %v238_v45  ;;  %v313_v50 = vmul.f32 %v216_v46, %v6225_v20  ;;  %vm244_vm10 = vweird.f32 %v5734_v22  ;;  %vm235_vm11 = vmor %vm233_vm8, %vm234_vm9 }
  0xbb   :  { %v229_v35 = vmul.f32 %v5736_v4, %v228_v40  ;;  %v334_v5 = vmul.f32 %v6349_v63, %v314_v49  ;;  %vm245_vm13 = vmor %vm243_vm12, %vm244_vm10  ;;  %vm263_vm14 = vweird.f32 %v142_v37  ;;  %vm253_vm3 = vweird.f32 %v141_v33 }
  0xbc   :  { %v350_v41 = vpack.c.bf16 %v342_v32, %v341_v17  ;;  %v240_v12 = vmul.f32 0.5, %v239_v21  ;;  %v333_v53 = vmul.f32 %v6349_v63, %v313_v50  ;;  %vm461_vm5 = vcmask 64512  }
  0xbd   :  { %v230_v52 = vmul.f32 0.5, %v229_v35  ;;  %v5738_v44 = vpop.eup %5737  ;;  %vm1038_vm6 = vcmask 1043456   ;;  %vm4266_vm7 = vcmask 130048   ;;  %vm4283_vm8 = vcmask 195584  }
  0xbe   :  { %5362 = vmatmul.msk.bf16.gmra.mxu0 %vm59_vm0, %v345_v9  ;;  %v241_v24 = vsub.f32 1.5, %v240_v12  ;;  %v5740_v36 = vpop.eup %5739  ;;  %v346_v14 = vpack.c.bf16 %v334_v5, %v333_v53  ;;  %v258_v55 = vmul.f32 %v5738_v44, %v142_v37  ;;  %vm264_vm15 = vweird.f32 %v5738_v44 }
  0xbf   :  { %v231_v2 = vsub.f32 1.5, %v230_v52  ;;  %v248_v51 = vmul.f32 %v5740_v36, %v141_v33  ;;  %vm254_vm1 = vweird.f32 %v5740_v36  ;;  %vm265_vm2 = vmor %vm263_vm14, %vm264_vm15 }
  0xc0   :  { %v242_v42 = vmul.f32 %v5734_v22, %v241_v24  ;;  %v259_v20 = vmul.f32 %v5738_v44, %v258_v55  ;;  %vm255_vm4 = vmor %vm253_vm3, %vm254_vm1 }
  0xc1   :  { %v232_v19 = vmul.f32 %v5736_v4, %v231_v2  ;;  %v249_v16 = vmul.f32 %v5740_v36, %v248_v51 }
  0xc2   :  { %v246_v57 = vsel %vm245_vm13, %v5734_v22, %v242_v42  ;;  %v260_v59 = vmul.f32 0.5, %v259_v20 }
  0xc3   :  { %v236_v38 = vsel %vm235_vm11, %v5736_v4, %v232_v19  ;;  %v316_v58 = vmul.f32 %v246_v57, %v6249_v29  ;;  %v250_v60 = vmul.f32 0.5, %v249_v16 }
  0xc4   :  { %v315_v47 = vmul.f32 %v236_v38, %v6215_v18  ;;  %v261_v62 = vsub.f32 1.5, %v260_v59 }
  0xc5   :  { %v336_v61 = vmul.f32 %v6349_v63, %v316_v58  ;;  %v251_v10 = vsub.f32 1.5, %v250_v60 }
  0xc6   :  { %5367 = vmatmul.msk.bf16.gmra.mxu3 %vm59_vm0, %v350_v41  ;;  %v335_v26 = vmul.f32 %v6349_v63, %v315_v47  ;;  %v262_v3 = vmul.f32 %v5738_v44, %v261_v62 }
  0xc7   :  { %v252_v34 = vmul.f32 %v5740_v36, %v251_v10 }
  0xc8   :  { %v347_v25 = vpack.c.bf16 %v336_v61, %v335_v26  ;;  %v266_v8 = vsel %vm265_vm2, %v5738_v44, %v262_v3 }
  0xc9   :  { %v256_v29 = vsel %vm255_vm4, %v5740_v36, %v252_v34  ;;  %v318_v43 = vmul.f32 %v266_v8, %v6239_v27 }
  0xca   :  { %v317_v18 = vmul.f32 %v256_v29, %v6244_v28 }
  0xcb   :  { %v338_v7 = vmul.f32 %v6349_v63, %v318_v43 }
  0xcc   :  { %v337_v11 = vmul.f32 %v6349_v63, %v317_v18 }
  0xce   :  { %5363 = vmatmul.msk.bf16.gmra.mxu0 %vm59_vm0, %v346_v14  ;;  %v348_v13 = vpack.c.bf16 %v338_v7, %v337_v11 }
  0xde   :  { %5364 = vmatmul.msk.bf16.gmra.mxu0 %vm59_vm0, %v347_v25 }
  0xee   :  { %5365 = vmatmul.msk.bf16.gmra.mxu0 %vm59_vm0, %v348_v13 }
 0x11b   :  { %v400_v15 = vpop.f32.mrf.mxu0 }
 0x11c   :  { %v6537_v6 = vpack.c.bf16 %v400_v15, %v400_v15 }
 0x11e   :  { %v457_v22 = vunpack.c.l.b16 %v6537_v6 }
 0x120   :  { %v6540_v23 = vpack.c.b16 %v457_v22, %v457_v22 }
 0x122   :  { %1033 = vrot.lane.b32.xlu2 %v6540_v23, %s6110_s1  ;;  %459 = vrot.lane.b32.xlu1 %v6540_v23, %s6111_s15 }
 0x123   :  { %v402_v27 = vpop.f32.mrf.mxu0 }
 0x124   :  { %v6556_v56 = vpack.c.bf16 %v402_v27, %v402_v27 }
 0x126   :  { %v482_v40 = vunpack.c.l.b16 %v6556_v56 }
 0x128   :  { %v6563_v33 = vpack.c.b16 %v482_v40, %v482_v40 }
 0x12b   :  { %v405_v28 = vpop.f32.mrf.mxu0 }
 0x12c   :  { %v6546_v63 = vpack.c.bf16 %v405_v28, %v405_v28 }
 0x12e   :  { %v506_v1 = vunpack.c.l.b16 %v6546_v63 }
 0x130   :  { %v6549_v30 = vpack.c.b16 %v506_v1, %v506_v1 }
 0x132   :  { %508 = vrot.lane.b32.xlu0 %v6549_v30, %s6111_s15 }
 0x133   :  { %v407_v4 = vpop.f32.mrf.mxu0 }
 0x134   :  { %v6573_v50 = vpack.c.bf16 %v407_v4, %v407_v4 }
 0x136   :  { %v530_v5 = vunpack.c.l.b16 %v6573_v50 }
 0x138   :  { %v6590_v14 = vpack.c.b16 %v530_v5, %v530_v5 }
 0x139   :  { %v430_v0 = vpop.f32.mrf.mxu3 }
 0x13a   :  { %v6553_v9 = vpack.c.bf16 %v430_v0, %v430_v0 }
 0x13b   :  { %v410_v39 = vpop.f32.mrf.mxu0 }
 0x13c   :  { %v746_v31 = vunpack.c.l.b16 %v6553_v9  ;;  %v6575_v49 = vpack.c.bf16 %v410_v39, %v410_v39 }
 0x13e   :  { %v6558_v45 = vpack.c.b16 %v746_v31, %v746_v31  ;;  %v554_v44 = vunpack.c.l.b16 %v6575_v49 }
 0x140   :  { %748 = vrot.lane.b32.xlu2 %v6558_v45, %s6111_s15  ;;  %v6592_v55 = vpack.c.b16 %v554_v44, %v554_v44 }
 0x141   :  { %v432_v32 = vpop.f32.mrf.mxu3 }
 0x142   :  { %v6565_v17 = vpack.c.bf16 %v432_v32, %v432_v32 }
 0x143   :  { %v412_v37 = vpop.f32.mrf.mxu0 }
 0x144   :  { %v770_v46 = vunpack.c.l.b16 %v6565_v17  ;;  %v6605_v16 = vpack.c.bf16 %v412_v37, %v412_v37 }
 0x146   :  { %v6577_v12 = vpack.c.b16 %v770_v46, %v770_v46  ;;  %v578_v58 = vunpack.c.l.b16 %v6605_v16 }
 0x148   :  { %484 = vrot.lane.b32.xlu2 %v6563_v33, %s6111_s15  ;;  %v6619_v47 = vpack.c.b16 %v578_v58, %v578_v58 }
 0x149   :  { %v435_v21 = vpop.f32.mrf.mxu3 }
 0x14a   :  { %v6570_v48 = vpack.c.bf16 %v435_v21, %v435_v21 }
 0x14b   :  { %v415_v35 = vpop.f32.mrf.mxu0 }
 0x14c   :  { %v794_v41 = vunpack.c.l.b16 %v6570_v48  ;;  %v6594_v51 = vpack.c.bf16 %v415_v35, %v415_v35 }
 0x14e   :  { %v6579_v52 = vpack.c.b16 %v794_v41, %v794_v41  ;;  %v602_v19 = vunpack.c.l.b16 %v6594_v51 }
 0x150   :  { %772 = vrot.lane.b32.xlu2 %v6577_v12, %s6111_s15  ;;  %796 = vrot.lane.b32.xlu1 %v6579_v52, %s6111_s15  ;;  %v6607_v57 = vpack.c.b16 %v602_v19, %v602_v19 }
 0x151   :  { %v437_v53 = vpop.f32.mrf.mxu3 }
 0x152   :  { %v6587_v24 = vpack.c.bf16 %v437_v53, %v437_v53 }
 0x153   :  { %v417_v2 = vpop.f32.mrf.mxu0 }
 0x154   :  { %v818_v36 = vunpack.c.l.b16 %v6587_v24  ;;  %v6609_v38 = vpack.c.bf16 %v417_v2, %v417_v2 }
 0x156   :  { %v6596_v42 = vpack.c.b16 %v818_v36, %v818_v36  ;;  %v626_v59 = vunpack.c.l.b16 %v6609_v38 }
 0x158   :  { %532 = vrot.lane.b32.xlu2 %v6590_v14, %s6111_s15  ;;  %556 = vrot.lane.b32.xlu1 %v6592_v55, %s6111_s15  ;;  %v6621_v61 = vpack.c.b16 %v626_v59, %v626_v59 }
 0x159   :  { %820 = vrot.lane.b32.xlu0 %v6596_v42, %s6111_s15 }
 0x15b   :  { %v420_v20 = vpop.f32.mrf.mxu0 }
 0x15c   :  { %v6623_v62 = vpack.c.bf16 %v420_v20, %v420_v20 }
 0x15e   :  { %v650_v10 = vunpack.c.l.b16 %v6623_v62 }
 0x160   :  { %604 = vrot.lane.b32.xlu2 %v6607_v57, %s6111_s15  ;;  %1055 = vrot.lane.b32.xlu1 %v6563_v33, %s6110_s1  ;;  %v6632_v25 = vpack.c.b16 %v650_v10, %v650_v10 }
 0x161   :  { %1097 = vrot.lane.b32.xlu0 %v6590_v14, %s6110_s1 }
 0x163   :  { %v422_v60 = vpop.f32.mrf.mxu0 }
 0x164   :  { %v6634_v3 = vpack.c.bf16 %v422_v60, %v422_v60 }
 0x166   :  { %v674_v29 = vunpack.c.l.b16 %v6634_v3 }
 0x168   :  { %1139 = vrot.lane.b32.xlu2 %v6619_v47, %s6110_s1  ;;  %628 = vrot.lane.b32.xlu1 %v6621_v61, %s6111_s15  ;;  %v6646_v18 = vpack.c.b16 %v674_v29, %v674_v29 }
 0x169   :  { %1076 = vrot.lane.b32.xlu0 %v6549_v30, %s6110_s1 }
 0x16b   :  { %v425_v26 = vpop.f32.mrf.mxu0 }
 0x16c   :  { %v6636_v34 = vpack.c.bf16 %v425_v26, %v425_v26 }
 0x16e   :  { %v698_v8 = vunpack.c.l.b16 %v6636_v34 }
 0x170   :  { %1202 = vrot.lane.b32.xlu2 %v6632_v25, %s6110_s1  ;;  %1160 = vrot.lane.b32.xlu1 %v6607_v57, %s6110_s1  ;;  %v6648_v43 = vpack.c.b16 %v698_v8, %v698_v8 }
 0x171   :  { %1118 = vrot.lane.b32.xlu0 %v6592_v55, %s6110_s1 }
 0x173   :  { %v427_v22 = vpop.f32.mrf.mxu0 }
 0x174   :  { %v6683_v27 = vpack.c.bf16 %v427_v22, %v427_v22 }
 0x176   :  { %v722_v28 = vunpack.c.l.b16 %v6683_v27 }
 0x178   :  { %676 = vrot.lane.b32.xlu2 %v6646_v18, %s6111_s15  ;;  %700 = vrot.lane.b32.xlu1 %v6648_v43, %s6111_s15  ;;  %v6695_v0 = vpack.c.b16 %v722_v28, %v722_v28 }
 0x179   :  { %580 = vrot.lane.b32.xlu0 %v6619_v47, %s6111_s15 }
 0x17c   :  { %v6674_v11 = vpop.permute.xlu2 %1033 }
 0x180   :  { %1418 = vrot.lane.b32.xlu2 %v6549_v30, %s6112_s16  ;;  %1223 = vrot.lane.b32.xlu1 %v6646_v18, %s6110_s1 }
 0x181   :  { %1181 = vrot.lane.b32.xlu0 %v6621_v61, %s6110_s1 }
 0x188   :  { %1439 = vrot.lane.b32.xlu2 %v6590_v14, %s6113_s17  ;;  %1286 = vrot.lane.b32.xlu1 %v6558_v45, %s6110_s1 }
 0x189   :  { %652 = vrot.lane.b32.xlu0 %v6632_v25, %s6111_s15 }
 0x190   :  { %1510 = vrot.lane.b32.xlu2 %v6607_v57, %s6112_s16  ;;  %1395 = vrot.lane.b32.xlu1 %v6563_v33, %s6112_s16 }
 0x191   :  { %1328 = vrot.lane.b32.xlu0 %v6579_v52, %s6110_s1 }
 0x194   :  { %v460_v7 = vpop.permute.xlu1 %459 }
 0x195   :  { %v466_v13 = vsel %vm461_vm5, %v460_v7, 0 }
 0x196   :  { %475 = vmatpush.bf16.xpose.msra.mxu1 %v466_v13  ;;  %v1040_v13 = vsel %vm1038_vm6, %v6674_v11, 0 }
 0x198   :  { %1487 = vrot.lane.b32.xlu2 %v6619_v47, %s6112_s16  ;;  %1370 = vrot.lane.b32.xlu1 %v6540_v23, %s6113_s17 }
 0x199   :  { %1349 = vrot.lane.b32.xlu0 %v6596_v42, %s6110_s1 }
 0x19a   :  { %v749_v15 = vpop.permute.xlu2 %748 }
 0x19d   :  { %5368 = vmatmul.msk.bf16.vlgmr.msra.gmra.mxu1 %vm461_vm5, %v6537_v6 }
 0x1a0   :  { %1462 = vrot.lane.b32.xlu2 %v6592_v55, %s6113_s17  ;;  %1533 = vrot.lane.b32.xlu1 %v6621_v61, %s6112_s16 }
 0x1a1   :  { %1307 = vrot.lane.b32.xlu0 %v6577_v12, %s6110_s1 }
 0x1a2   :  { %v485_v1 = vpop.permute.xlu2 %484 }
 0x1a3   :  { %v490_v4 = vsel %vm461_vm5, %v485_v1, 0 }
 0x1a4   :  { %499 = vmatpush.bf16.xpose.msra.mxu2 %v490_v4  ;;  %v509_v31 = vpop.permute.xlu0 %508 }
 0x1a5   :  { %v514_v6 = vsel %vm461_vm5, %v509_v31, 0 }
 0x1a6   :  { %523 = vmatpush.bf16.xpose.msrb.mxu3 %v514_v6 }
 0x1a8   :  { %1625 = vrot.lane.b32.xlu2 %v6695_v0, %s6112_s16  ;;  %1508 = vrot.lane.b32.xlu1 %v6607_v57, %s6113_s17 }
 0x1a9   :  { %1441 = vrot.lane.b32.xlu0 %v6590_v14, %s6112_s16 }
 0x1aa   :  { %v773_v39 = vpop.permute.xlu2 %772 }
 0x1ab   :  { %5369 = vmatmul.msk.bf16.vlgmr.msra.gmra.mxu2 %vm461_vm5, %v6556_v56  ;;  %v778_v8 = vsel %vm461_vm5, %v773_v39, 0 }
 0x1ad   :  { %5370 = vmatmul.msk.bf16.vlgmr.msrb.gmra.mxu3 %vm461_vm5, %v6546_v63 }
 0x1b0   :  { %1265 = vrot.lane.b32.xlu1 %v6695_v0, %s6110_s1 }
 0x1b1   :  { %1372 = vrot.lane.b32.xlu0 %v6540_v23, %s6112_s16 }
 0x1b2   :  { %v533_v32 = vpop.permute.xlu2 %532 }
 0x1b3   :  { %v538_v40 = vsel %vm461_vm5, %v533_v32, 0 }
 0x1b4   :  { %547 = vmatpush.bf16.xpose.msrb.mxu1 %v538_v40 }
 0x1b9   :  { %1416 = vrot.lane.b32.xlu0 %v6549_v30, %s6113_s17 }
 0x1ba   :  { %v605_v37 = vpop.permute.xlu2 %604 }
 0x1bb   :  { %v610_v21 = vsel %vm461_vm5, %v605_v37, 0  ;;  %5371 = vmatmul.msk.bf16.vlgmr.msrb.gmra.mxu1 %vm461_vm5, %v6573_v50 }
 0x1bc   :  { %619 = vmatpush.bf16.xpose.msra.mxu1 %v610_v21 }
 0x1c1   :  { %1393 = vrot.lane.b32.xlu0 %v6563_v33, %s6113_s17 }
 0x1c2   :  { %v1140_v63 = vpop.permute.xlu2 %1139  ;;  %v6720_v56 = vpop.permute.xlu1 %796 }
 0x1c3   :  { %v1145_v22 = vsel %vm1038_vm6, %v1140_v63, 0 }
 0x1c9   :  { %1464 = vrot.lane.b32.xlu0 %v6592_v55, %s6112_s16 }
 0x1ca   :  { %v1203_v46 = vpop.permute.xlu2 %1202  ;;  %v557_v41 = vpop.permute.xlu1 %556 }
 0x1cb   :  { %v821_v35 = vpop.permute.xlu0 %820  ;;  %5374 = vmatmul.msk.bf16.vlgmr.msra.gmra.mxu1 %vm461_vm5, %v6594_v51  ;;  %v562_v53 = vsel %vm461_vm5, %v557_v41, 0  ;;  %v1208_v50 = vsel %vm1038_vm6, %v1203_v46, 0  ;;  %v754_v51 = vsel %vm461_vm5, %v749_v15, 0 }
 0x1cc   :  { %571 = vmatpush.bf16.xpose.msrb.mxu2 %v562_v53  ;;  %1217 = vmatpush.bf16.msrb.mxu0 %v1208_v50  ;;  %v826_v20 = vsel %vm461_vm5, %v821_v35, 0 }
 0x1d1   :  { %1531 = vrot.lane.b32.xlu0 %v6621_v61, %s6113_s17 }
 0x1d2   :  { %v677_v5 = vpop.permute.xlu2 %676  ;;  %v6730_v44 = vpop.permute.xlu1 %1055 }
 0x1d3   :  { %v682_v36 = vsel %vm461_vm5, %v677_v5, 0  ;;  %v1098_v2 = vpop.permute.xlu0 %1097  ;;  %5372 = vmatmul.msk.bf16.vlgmr.msrb.gmra.mxu2 %vm461_vm5, %v6575_v49 }
 0x1d4   :  { %691 = vmatpush.bf16.xpose.msrb.mxu1 %v682_v36 }
 0x1d9   :  { %1244 = vrot.lane.b32.xlu0 %v6648_v43, %s6110_s1 }
 0x1da   :  { %v629_v19 = vpop.permute.xlu1 %628 }
 0x1db   :  { %v634_v58 = vsel %vm461_vm5, %v629_v19, 0  ;;  %v1077_v59 = vpop.permute.xlu0 %1076  ;;  %5377 = vmatmul.msk.bf16.vlgmr.msrb.gmra.mxu1 %vm461_vm5, %v6634_v3 }
 0x1dc   :  { %763 = vmatpush.bf16.xpose.msra.mxu1 %v754_v51  ;;  %643 = vmatpush.bf16.xpose.msra.mxu2 %v634_v58  ;;  %v1082_v26 = vsel %vm1038_vm6, %v1077_v59, 0 }
 0x1e1   :  { %724 = vrot.lane.b32.xlu0 %v6695_v0, %s6111_s15 }
 0x1e2   :  { %v6744_v49 = vpop.permute.xlu1 %1160 }
 0x1e3   :  { %v6746_v60 = vpop.permute.xlu0 %1118  ;;  %5375 = vmatmul.msk.bf16.vlgmr.msra.gmra.mxu2 %vm461_vm5, %v6609_v38 }
 0x1e4   :  { %835 = vmatpush.bf16.xpose.msrb.mxu1 %v826_v20 }
 0x1e9   :  { %1602 = vrot.lane.b32.xlu0 %v6648_v43, %s6112_s16 }
 0x1ea   :  { %v701_v10 = vpop.permute.xlu1 %700 }
 0x1eb   :  { %v706_v3 = vsel %vm461_vm5, %v701_v10, 0  ;;  %v581_v29 = vpop.permute.xlu0 %580  ;;  %5380 = vmatmul.msk.bf16.vlgmr.msra.gmra.mxu1 %vm461_vm5, %v6553_v9 }
 0x1ec   :  { %v586_v7 = vsel %vm461_vm5, %v581_v29, 0  ;;  %1091 = vmatpush.bf16.msra.mxu1 %v1082_v26  ;;  %715 = vmatpush.bf16.xpose.msrb.mxu2 %v706_v3  ;;  %v802_v26 = vsel %vm461_vm5, %v6720_v56, 0 }
 0x1ed   :  { %595 = vmatpush.bf16.xpose.msra.mxu3 %v586_v7 }
 0x1f2   :  { %v6758_v38 = vpop.permute.xlu1 %1223 }
 0x1f3   :  { %v6762_v15 = vpop.permute.xlu0 %1181  ;;  %5378 = vmatmul.msk.bf16.vlgmr.msrb.gmra.mxu2 %vm461_vm5, %v6636_v34  ;;  %v1103_v34 = vsel %vm1038_vm6, %v1098_v2, 0 }
 0x1f4   :  { %787 = vmatpush.bf16.xpose.msra.mxu2 %v778_v8  ;;  %5373 = vmatmul.msk.bf16.vlgmr.msra.gmra.mxu3 %vm461_vm5, %v6605_v16  ;;  %v1061_v8 = vsel %vm1038_vm6, %v6730_v44, 0 }
 0x1fa   :  { %v1287_v9 = vpop.permute.xlu1 %1286 }
 0x1fb   :  { %v1292_v28 = vsel %vm1038_vm6, %v1287_v9, 0  ;;  %v653_v1 = vpop.permute.xlu0 %652  ;;  %5383 = vmatmul.msk.bf16.vlgmr.msrb.gmra.mxu1 %vm461_vm5, %v6587_v24 }
 0x1fc   :  { %1049 = vmatpush.bf16.msrb.mxu2 %v1040_v13  ;;  %v658_v11 = vsel %vm461_vm5, %v653_v1, 0  ;;  %1154 = vmatpush.bf16.msrb.mxu1 %v1145_v22  ;;  %v1124_v1 = vsel %vm1038_vm6, %v6746_v60, 0 }
 0x1fd   :  { %1301 = vmatpush.bf16.msra.mxu0 %v1292_v28  ;;  %667 = vmatpush.bf16.xpose.msrb.mxu3 %v658_v11 }
 0x203   :  { %v6774_v4 = vpop.permute.xlu0 %1328  ;;  %5381 = vmatmul.msk.bf16.vlgmr.msra.gmra.mxu2 %vm461_vm5, %v6565_v17 }
 0x204   :  { %5376 = vmatmul.msk.bf16.vlgmr.msrb.gmra.mxu3 %vm461_vm5, %v6623_v62  ;;  %1112 = vmatpush.bf16.msra.mxu2 %v1103_v34 }
 0x20b   :  { %v6780_v16 = vpop.permute.xlu0 %1349 }
 0x213   :  { %v6782_v31 = vpop.permute.xlu0 %1307 }
 0x21a   :  { %v6786_v6 = vpop.f32.mrf.mxu1 }
 0x21b   :  { %v6784_v24 = vpop.permute.xlu0 %1441  ;;  %v841_v39 = vsel %vm461_vm5, %v6786_v6, -inf }
 0x21c   :  { %842 = vmax.xlane.f32.xlu1 %v841_v39 }
 0x222   :  { %v479_v40 = vpop.f32.mrf.mxu1 }
 0x223   :  { %v6790_v32 = vpop.permute.xlu0 %1372 }
 0x22b   :  { %v6792_v17 = vpop.permute.xlu0 %1416 }
 0x22e   :  { %v6794_v37 = vpop.f32.mrf.mxu2 }
 0x22f   :  { %v844_v62 = vsel %vm461_vm5, %v6794_v37, -inf }
 0x230   :  { %845 = vmax.xlane.f32.xlu0 %v844_v62  ;;  %v6798_v21 = vpop.f32.mrf.mxu3 }
 0x231   :  { %v847_v41 = vsel %vm461_vm5, %v6798_v21, -inf }
 0x233   :  { %v6800_v63 = vpop.permute.xlu0 %1393 }
 0x234   :  { %8955 = vst [vmem:[#allocation3_spill] sm:$0xff] %v6800_v63 }
 0x235   :  { %1485 = vrot.lane.b32.xlu1 %v6619_v47, %s6113_s17 }
 0x236   :  { %v503_v46 = vpop.f32.mrf.mxu2 }
 0x238   :  { %v6806_v35 = vpop.f32.mrf.mxu1  ;;  %848 = vmax.xlane.f32.xlu0 %v847_v41  ;;  %v527_v50 = vpop.f32.mrf.mxu3 }
 0x239   :  { %v850_v53 = vsel %vm461_vm5, %v6806_v35, -inf }
 0x23a   :  { %851 = vmax.xlane.f32.xlu2 %v850_v53 }
 0x23b   :  { %v6810_v5 = vpop.permute.xlu0 %1464 }
 0x240   :  { %v551_v36 = vpop.f32.mrf.mxu1 }
 0x243   :  { %v6812_v2 = vpop.permute.xlu0 %1531 }
 0x244   :  { %8956 = vst [vmem:[#allocation4_spill] sm:$0xff] %v6812_v2 }
 0x248   :  { %v6814_v51 = vpop.f32.mrf.mxu1 }
 0x249   :  { %v859_v19 = vsel %vm461_vm5, %v6814_v51, -inf }
 0x24a   :  { %860 = vmax.xlane.f32.xlu2 %v859_v19 }
 0x24b   :  { %v6818_v20 = vpop.permute.xlu0 %1244 }
 0x250   :  { %v623_v58 = vpop.f32.mrf.mxu1 }
 0x253   :  { %v725_v59 = vpop.permute.xlu0 %724 }
 0x254   :  { %v730_v10 = vsel %vm461_vm5, %v725_v59, 0 }
 0x255   :  { %739 = vmatpush.bf16.xpose.msra.mxu3 %v730_v10 }
 0x256   :  { %v6823_v3 = vpop.f32.mrf.mxu2 }
 0x257   :  { %v853_v13 = vsel %vm461_vm5, %v6823_v3, -inf }
 0x258   :  { %v6825_v29 = vpop.f32.mrf.mxu1 }
 0x259   :  { %v868_v41 = vsel %vm461_vm5, %v6825_v29, -inf }
 0x25c   :  { %5379 = vmatmul.msk.bf16.vlgmr.msra.gmra.mxu3 %vm461_vm5, %v6683_v27 }
 0x25d   :  { %811 = vmatpush.bf16.xpose.msrb.mxu3 %v802_v26 }
 0x25e   :  { %v575_v7 = vpop.f32.mrf.mxu2 }
 0x25f   :  { %854 = vmax.xlane.f32.xlu1 %v853_v13  ;;  %v6866_v7 = vpop.permute.xlu0 %1602 }
 0x260   :  { %v695_v9 = vpop.f32.mrf.mxu1 }
 0x265   :  { %1070 = vmatpush.bf16.msra.mxu3 %v1061_v8  ;;  %v6864_v8 = vpop.permute.xlu1 %1395 }
 0x266   :  { %v645_v56 = vpop.f32.mrf.mxu2 }
 0x267   :  { %v862_v22 = vsel %vm461_vm5, %v645_v56, -inf }
 0x268   :  { %v6834_v28 = vpop.f32.mrf.mxu1  ;;  %863 = vmax.xlane.f32.xlu1 %v862_v22 }
 0x269   :  { %v877_v26 = vsel %vm461_vm5, %v6834_v28, -inf }
 0x26c   :  { %5382 = vmatmul.msk.bf16.vlgmr.msrb.gmra.mxu3 %vm461_vm5, %v6570_v48 }
 0x26d   :  { %1133 = vmatpush.bf16.msrb.mxu3 %v1124_v1  ;;  %v6868_v13 = vpop.permute.xlu1 %1370 }
 0x26e   :  { %v647_v27 = vpop.f32.mrf.mxu2 }
 0x270   :  { %v767_v44 = vpop.f32.mrf.mxu1 }
 0x271   :  { %v6873_v44 = vpop.permute.xlu2 %1418 }
 0x275   :  { %v6871_v27 = vpop.permute.xlu1 %1533 }
 0x276   :  { %v6840_v11 = vpop.f32.mrf.mxu2  ;;  %8957 = vst [vmem:[#allocation5_spill] sm:$0xff] %v6871_v27 }
 0x277   :  { %v6842_v34 = vpop.f32.mrf.mxu3  ;;  %v871_v39 = vsel %vm461_vm5, %v6840_v11, -inf }
 0x278   :  { %872 = vmax.xlane.f32.xlu2 %v871_v39  ;;  %v6846_v40 = vpop.f32.mrf.mxu1  ;;  %v856_v62 = vsel %vm461_vm5, %v6842_v34, -inf }
 0x279   :  { %857 = vmax.xlane.f32.xlu0 %v856_v62  ;;  %v886_v10 = vsel %vm461_vm5, %v6846_v40, -inf }
 0x27e   :  { %v719_v60 = vpop.f32.mrf.mxu2 }
 0x27f   :  { %v599_v46 = vpop.f32.mrf.mxu3  ;;  %v6879_v60 = vpop.permute.xlu1 %1508 }
 0x280   :  { %v839_v48 = vpop.f32.mrf.mxu1  ;;  %v6881_v46 = vpop.permute.xlu2 %1439 }
 0x281   :  { %869 = vmax.xlane.f32.xlu0 %v868_v41  ;;  %8958 = vst [vmem:[#allocation6_spill] sm:$0xff] %v6881_v46 }
 0x286   :  { %v6852_v53 = vpop.f32.mrf.mxu2 }
 0x287   :  { %v6854_v50 = vpop.f32.mrf.mxu3  ;;  %v880_v36 = vsel %vm461_vm5, %v6852_v53, -inf  ;;  %v6883_v48 = vpop.permute.xlu1 %1265 }
 0x288   :  { %v865_v19 = vsel %vm461_vm5, %v6854_v50, -inf  ;;  %v6885_v41 = vpop.permute.xlu2 %1510 }
 0x289   :  { %881 = vmax.xlane.f32.xlu0 %v880_v36  ;;  %866 = vmax.xlane.f32.xlu1 %v865_v19 }
 0x28e   :  { %v791_v58 = vpop.f32.mrf.mxu2 }
 0x28f   :  { %v671_v59 = vpop.f32.mrf.mxu3 }
 0x290   :  { %v6887_v36 = vpop.permute.xlu2 %1487 }
 0x291   :  { %887 = vmax.xlane.f32.xlu0 %v886_v10  ;;  %878 = vmax.xlane.f32.xlu1 %v877_v26  ;;  %8959 = vst [vmem:[#allocation7_spill] sm:$0xff] %v6887_v36 }
 0x298   :  { %v6891_v58 = vpop.permute.xlu2 %1462 }
 0x2a3   :  { %v846_v9 = vpop.xlane.xlu0 %845 }
 0x2a4   :  { %v890_v22 = vsub.f32 %v6794_v37, %v846_v9  ;;  %v843_v37 = vpop.xlane.xlu1 %842  ;;  %v6894_v9 = vpop.permute.xlu2 %1625 }
 0x2a5   :  { %8961 = vst [vmem:[#allocation9_spill] sm:$0xff] %v6894_v9 }
 0x2a6   :  { %v907_v1 = vmul.f32 1.442695, %v890_v22 }
 0x2a8   :  { %5741 = vpow2.f32 %v907_v1 }
 0x2ac   :  { %v6889_v19 = vpop.permute.xlu1 %1485 }
 0x2ad   :  { %8960 = vst [vmem:[#allocation8_spill] sm:$0xff] %v6889_v19 }
 0x2ae   :  { %v6875_v39 = vpop.eup %5741 }
 0x2af   :  { %v940_v62 = vsel %vm461_vm5, %v6875_v39, 0.0 }
 0x2b0   :  { %941 = vadd.xlane.f32.xlu2 %v940_v62 }
 0x2d2   :  { %v855_v59 = vpop.xlane.xlu1 %854 }
 0x2d3   :  { %v893_v10 = vsub.f32 %v6823_v3, %v855_v59  ;;  %v849_v3 = vpop.xlane.xlu0 %848  ;;  %v852_v59 = vpop.xlane.xlu2 %851 }
 0x2d5   :  { %v913_v26 = vmul.f32 1.442695, %v893_v10 }
 0x2d7   :  { %5743 = vpow2.f32 %v913_v26 }
 0x2db   :  { %v864_v22 = vpop.xlane.xlu1 %863  ;;  %v861_v9 = vpop.xlane.xlu2 %860 }
 0x2dc   :  { %v896_v1 = vsub.f32 %v645_v56, %v864_v22  ;;  %v889_v56 = vsub.f32 %v6786_v6, %v843_v37 }
 0x2dd   :  { %v6896_v62 = vpop.eup %5743 }
 0x2de   :  { %v919_v54 = vmul.f32 1.442695, %v896_v1  ;;  %v949_v46 = vsel %vm461_vm5, %v6896_v62, 0.0  ;;  %v905_v1 = vmul.f32 1.442695, %v889_v56 }
 0x2df   :  { %v6898_v2 = vpop.f32.mrf.mxu3  ;;  %950 = vadd.xlane.f32.xlu2 %v949_v46  ;;  %v895_v46 = vsub.f32 %v6814_v51, %v861_v9 }
 0x2e0   :  { %v874_v19 = vsel %vm461_vm5, %v6898_v2, -inf  ;;  %5745 = vpow2.f32 %v919_v54  ;;  %v891_v54 = vsub.f32 %v6798_v21, %v849_v3  ;;  %v892_v21 = vsub.f32 %v6806_v35, %v852_v59 }
 0x2e1   :  { %875 = vmax.xlane.f32.xlu1 %v874_v19  ;;  %5747 = vpow2.f32 %v905_v1 }
 0x2e2   :  { %v909_v37 = vmul.f32 1.442695, %v891_v54 }
 0x2e6   :  { %v6904_v10 = vpop.eup %5745 }
 0x2e7   :  { %v743_v26 = vpop.f32.mrf.mxu3  ;;  %v958_v22 = vsel %vm461_vm5, %v6904_v10, 0.0  ;;  %v6916_v56 = vpop.eup %5747 }
 0x2e8   :  { %v917_v26 = vmul.f32 1.442695, %v895_v46  ;;  %v937_v51 = vsel %vm461_vm5, %v6916_v56, 0.0 }
 0x2e9   :  { %959 = vadd.xlane.f32.xlu1 %v958_v22 }
 0x2ec   :  { %v858_v63 = vpop.xlane.xlu0 %857 }
 0x2ed   :  { %v894_v27 = vsub.f32 %v6842_v34, %v858_v63 }
 0x2ef   :  { %v915_v19 = vmul.f32 1.442695, %v894_v27  ;;  %v6912_v36 = vpop.f32.mrf.mxu3  ;;  %v911_v27 = vmul.f32 1.442695, %v892_v21 }
 0x2f0   :  { %v883_v6 = vsel %vm461_vm5, %v6912_v36, -inf }
 0x2f1   :  { %5749 = vpow2.f32 %v915_v19  ;;  %884 = vmax.xlane.f32.xlu0 %v883_v6 }
 0x2f2   :  { %5751 = vpow2.f32 %v909_v37 }
 0x2f3   :  { %5753 = vpow2.f32 %v917_v26  ;;  %v873_v26 = vpop.xlane.xlu2 %872 }
 0x2f4   :  { %5755 = vpow2.f32 %v911_v27 }
 0x2f7   :  { %v6918_v22 = vpop.eup %5749  ;;  %v815_v63 = vpop.f32.mrf.mxu3 }
 0x2f8   :  { %v952_v34 = vsel %vm461_vm5, %v6918_v22, 0.0  ;;  %v6925_v9 = vpop.eup %5751 }
 0x2f9   :  { %938 = vadd.xlane.f32.xlu0 %v937_v51  ;;  %953 = vadd.xlane.f32.xlu2 %v952_v34  ;;  %v6927_v1 = vpop.eup %5753  ;;  %v943_v59 = vsel %vm461_vm5, %v6925_v9, 0.0  ;;  %v870_v34 = vpop.xlane.xlu0 %869 }
 0x2fa   :  { %v955_v46 = vsel %vm461_vm5, %v6927_v1, 0.0  ;;  %v6934_v19 = vpop.eup %5755 }
 0x2fc   :  { %v867_v3 = vpop.xlane.xlu1 %866 }
 0x2fd   :  { %v897_v54 = vsub.f32 %v6854_v50, %v867_v3  ;;  %v946_v50 = vsel %vm461_vm5, %v6934_v19, 0.0  ;;  %v1187_v3 = vsel %vm1038_vm6, %v6762_v15, 0 }
 0x2ff   :  { %v921_v35 = vmul.f32 1.442695, %v897_v54  ;;  %v898_v54 = vsub.f32 %v6825_v29, %v870_v34 }
 0x301   :  { %5757 = vpow2.f32 %v921_v35  ;;  %944 = vadd.xlane.f32.xlu0 %v943_v59  ;;  %956 = vadd.xlane.f32.xlu2 %v955_v46  ;;  %v923_v35 = vmul.f32 1.442695, %v898_v54 }
 0x304   :  { %v879_v59 = vpop.xlane.xlu1 %878 }
 0x305   :  { %v901_v46 = vsub.f32 %v6834_v28, %v879_v59 }
 0x307   :  { %v6936_v6 = vpop.eup %5757 }
 0x308   :  { %v961_v37 = vsel %vm461_vm5, %v6936_v6, 0.0 }
 0x309   :  { %962 = vadd.xlane.f32.xlu1 %v961_v37  ;;  %947 = vadd.xlane.f32.xlu0 %v946_v50  ;;  %v929_v50 = vmul.f32 1.442695, %v901_v46 }
 0x319   :  { %1600 = vrot.lane.b32.xlu2 %v6648_v43, %s6113_s17 }
 0x31d   :  { %1579 = vrot.lane.b32.xlu0 %v6646_v18, %s6112_s16 }
 0x322   :  { %1556 = vrot.lane.b32.xlu1 %v6632_v25, %s6112_s16 }
 0x323   :  { %v942_v21 = vpop.xlane.xlu2 %941 }
 0x324   :  { %5759 = vrcp.f32 %v942_v21 }
 0x325   :  { %1554 = vrot.lane.b32.xlu0 %v6632_v25, %s6113_s17  ;;  %5761 = vpow2.f32 %v923_v35 }
 0x32a   :  { %v5760_v63 = vpop.eup %5759 }
 0x32b   :  { %v1002_v51 = vmul.f32 %v5760_v63, %v6875_v39  ;;  %v899_v39 = vsub.f32 %v6840_v11, %v873_v26  ;;  %v6963_v15 = vpop.eup %5761  ;;  %v6979_v63 = vpop.xlane.xlu0 %881 }
 0x32c   :  { %v964_v29 = vsel %vm461_vm5, %v6963_v15, 0.0 }
 0x32d   :  { %v1018_v27 = vpack.c.bf16 %v1002_v51, %v1002_v51  ;;  %1717 = vrot.lane.b32.xlu0 %v6596_v42, %s6112_s16  ;;  %v925_v37 = vmul.f32 1.442695, %v899_v39  ;;  %v1271_v39 = vsel %vm1038_vm6, %v6883_v48, 0 }
 0x32f   :  { %5385 = vmatmul.msk.bf16.vlgmr.msra.gmra.mxu3 %vm461_vm5, %v1018_v27  ;;  %5763 = vpow2.f32 %v925_v37 }
 0x330   :  { %1196 = vmatpush.bf16.msra.mxu3 %v1187_v3  ;;  %5765 = vpow2.f32 %v929_v50 }
 0x333   :  { %v6985_v3 = vpop.xlane.xlu0 %887 }
 0x335   :  { %1692 = vrot.lane.b32.xlu0 %v6579_v52, %s6113_s17  ;;  %v6969_v11 = vpop.eup %5763 }
 0x336   :  { %v6971_v28 = vpop.eup %5765  ;;  %v967_v26 = vsel %vm461_vm5, %v6969_v11, 0.0 }
 0x337   :  { %v973_v21 = vsel %vm461_vm5, %v6971_v28, 0.0 }
 0x33d   :  { %1669 = vrot.lane.b32.xlu0 %v6577_v12, %s6113_s17 }
 0x342   :  { %965 = vadd.xlane.f32.xlu2 %v964_v29  ;;  %v1355_v29 = vsel %vm1038_vm6, %v6780_v16, 0  ;;  %v1166_v16 = vsel %vm1038_vm6, %v6744_v49, 0  ;;  %v1229_v49 = vsel %vm1038_vm6, %v6758_v38, 0 }
 0x345   :  { %1972 = vrot.lane.b32.xlu0 %v6549_v30, %s6114_s18 }
 0x34a   :  { %968 = vadd.xlane.f32.xlu2 %v967_v26 }
 0x34c   :  { %974 = vadd.xlane.f32.xlu1 %v973_v21 }
 0x34d   :  { %1951 = vrot.lane.b32.xlu0 %v6563_v33, %s6114_s18 }
 0x352   :  { %v951_v51 = vpop.xlane.xlu2 %950 }
 0x353   :  { %5767 = vrcp.f32 %v951_v51 }
 0x354   :  { %v6981_v34 = vpop.xlane.xlu1 %875 }
 0x355   :  { %2014 = vrot.lane.b32.xlu0 %v6592_v55, %s6114_s18 }
 0x359   :  { %v5768_v27 = vpop.eup %5767 }
 0x35a   :  { %v1005_v54 = vmul.f32 %v5768_v27, %v6896_v62 }
 0x35c   :  { %v1021_v35 = vpack.c.bf16 %v1005_v54, %v1005_v54  ;;  %v960_v59 = vpop.xlane.xlu1 %959 }
 0x35d   :  { %2098 = vrot.lane.b32.xlu0 %v6632_v25, %s6114_s18  ;;  %5769 = vrcp.f32 %v960_v59 }
 0x35e   :  { %5388 = vmatmul.msk.bf16.vlgmr.msrb.gmra.mxu3 %vm461_vm5, %v1021_v35 }
 0x35f   :  { %1280 = vmatpush.bf16.msrb.mxu3 %v1271_v39 }
 0x362   :  { %1577 = vrot.lane.b32.xlu2 %v6646_v18, %s6113_s17 }
 0x363   :  { %v5770_v62 = vpop.eup %5769 }
 0x364   :  { %v6995_v46 = vpop.xlane.xlu0 %884  ;;  %v1008_v37 = vmul.f32 %v5770_v62, %v6904_v10 }
 0x365   :  { %1623 = vrot.lane.b32.xlu1 %v6695_v0, %s6113_s17  ;;  %2224 = vrot.lane.b32.xlu0 %v6579_v52, %s6114_s18 }
 0x366   :  { %v1024_v50 = vpack.c.bf16 %v1008_v37, %v1008_v37 }
 0x36a   :  { %1648 = vrot.lane.b32.xlu2 %v6558_v45, %s6112_s16 }
 0x36c   :  { %v939_v48 = vpop.xlane.xlu0 %938  ;;  %v954_v54 = vpop.xlane.xlu2 %953 }
 0x36d   :  { %1694 = vrot.lane.b32.xlu1 %v6579_v52, %s6112_s16  ;;  %2203 = vrot.lane.b32.xlu0 %v6577_v12, %s6114_s18  ;;  %5771 = vrcp.f32 %v939_v48 }
 0x36e   :  { %5391 = vmatmul.msk.bf16.vlgmr.msra.gmra.mxu3 %vm461_vm5, %v1024_v50 }
 0x36f   :  { %1364 = vmatpush.bf16.msra.mxu3 %v1355_v29 }
 0x372   :  { %1715 = vrot.lane.b32.xlu2 %v6596_v42, %s6113_s17 }
 0x373   :  { %v5772_v10 = vpop.eup %5771 }
 0x374   :  { %v945_v26 = vpop.xlane.xlu0 %944  ;;  %v1001_v21 = vmul.f32 %v5772_v10, %v6916_v56  ;;  %v957_v29 = vpop.xlane.xlu2 %956 }
 0x375   :  { %1671 = vrot.lane.b32.xlu1 %v6577_v12, %s6112_s16  ;;  %2314 = vrot.lane.b32.xlu0 %v6549_v30, %s6115_s19  ;;  %5773 = vrcp.f32 %v945_v26  ;;  %v1378_v26 = vsel %vm461_vm5, %v6790_v32, 0 }
 0x376   :  { %v1017_v51 = vpack.c.bf16 %v1001_v21, %v1001_v21  ;;  %v1250_v21 = vsel %vm1038_vm6, %v6818_v20, 0  ;;  %v1313_v20 = vsel %vm1038_vm6, %v6782_v31, 0  ;;  %v1334_v31 = vsel %vm1038_vm6, %v6774_v4, 0 }
 0x378   :  { %5384 = vmatmul.msk.bf16.vlgmr.msrb.gmra.mxu2 %vm461_vm5, %v1017_v51 }
 0x379   :  { %1175 = vmatpush.bf16.msrb.mxu2 %v1166_v16 }
 0x37a   :  { %1993 = vrot.lane.b32.xlu2 %v6590_v14, %s6114_s18 }
 0x37b   :  { %v5774_v27 = vpop.eup %5773 }
 0x37c   :  { %v963_v56 = vpop.xlane.xlu1 %962  ;;  %v1003_v35 = vmul.f32 %v5774_v27, %v6925_v9  ;;  %v948_v59 = vpop.xlane.xlu0 %947 }
 0x37d   :  { %5775 = vrcp.f32 %v963_v56  ;;  %1646 = vrot.lane.b32.xlu1 %v6558_v45, %s6113_s17 }
 0x37e   :  { %5777 = vrcp.f32 %v948_v59  ;;  %v1019_v39 = vpack.c.bf16 %v1003_v35, %v1003_v35  ;;  %v7081_v35 = vpop.permute.xlu2 %1600 }
 0x37f   :  { %5779 = vrcp.f32 %v954_v54 }
 0x380   :  { %5386 = vmatmul.msk.bf16.vlgmr.msra.gmra.mxu1 %vm461_vm5, %v1019_v39  ;;  %5781 = vrcp.f32 %v957_v29 }
 0x381   :  { %1238 = vmatpush.bf16.msra.mxu1 %v1229_v49 }
 0x382   :  { %2056 = vrot.lane.b32.xlu2 %v6607_v57, %s6114_s18 }
 0x383   :  { %v5776_v62 = vpop.eup %5775 }
 0x384   :  { %v5778_v37 = vpop.eup %5777  ;;  %v1009_v9 = vmul.f32 %v5776_v62, %v6936_v6  ;;  %v900_v6 = vsub.f32 %v6898_v2, %v6981_v34  ;;  %v903_v2 = vsub.f32 %v6912_v36, %v6995_v46 }
 0x385   :  { %v1004_v48 = vmul.f32 %v5778_v37, %v6934_v19  ;;  %1930 = vrot.lane.b32.xlu1 %v6540_v23, %s6114_s18  ;;  %v5780_v38 = vpop.eup %5779  ;;  %v902_v37 = vsub.f32 %v6852_v53, %v6979_v63  ;;  %v904_v53 = vsub.f32 %v6846_v40, %v6985_v3 }
 0x386   :  { %v1025_v50 = vpack.c.bf16 %v1009_v9, %v1009_v9  ;;  %v1006_v19 = vmul.f32 %v5780_v38, %v6918_v22  ;;  %v5782_v51 = vpop.eup %5781  ;;  %v927_v16 = vmul.f32 1.442695, %v900_v6  ;;  %v933_v27 = vmul.f32 1.442695, %v903_v2 }
 0x387   :  { %v1020_v10 = vpack.c.bf16 %v1004_v48, %v1004_v48  ;;  %v1007_v22 = vmul.f32 %v5782_v51, %v6927_v1  ;;  %v931_v29 = vmul.f32 1.442695, %v902_v37 }
 0x388   :  { %5392 = vmatmul.msk.bf16.vlgmr.msrb.gmra.mxu0 %vm461_vm5, %v1025_v50  ;;  %v1022_v32 = vpack.c.bf16 %v1006_v19, %v1006_v19  ;;  %5783 = vpow2.f32 %v927_v16  ;;  %v1401_v19 = vsel %vm461_vm5, %v6864_v8, 0  ;;  %v1424_v8 = vsel %vm461_vm5, %v6873_v44, 0 }
 0x389   :  { %5387 = vmatmul.msk.bf16.vlgmr.msra.gmra.mxu2 %vm461_vm5, %v1020_v10  ;;  %1387 = vmatpush.bf16.xpose.msrb.mxu0 %v1378_v26  ;;  %v1023_v34 = vpack.c.bf16 %v1007_v22, %v1007_v22  ;;  %5785 = vpow2.f32 %v933_v27 }
 0x38a   :  { %1259 = vmatpush.bf16.msra.mxu2 %v1250_v21  ;;  %2035 = vrot.lane.b32.xlu2 %v6619_v47, %s6114_s18 }
 0x38d   :  { %2077 = vrot.lane.b32.xlu1 %v6621_v61, %s6114_s18 }
 0x38e   :  { %v7063_v56 = vpop.eup %5783 }
 0x38f   :  { %v7065_v1 = vpop.permute.xlu0 %1579  ;;  %v970_v36 = vsel %vm461_vm5, %v7063_v56, 0.0  ;;  %v7073_v4 = vpop.eup %5785 }
 0x390   :  { %5389 = vmatmul.msk.bf16.vlgmr.msrb.gmra.mxu1 %vm461_vm5, %v1022_v32  ;;  %v979_v54 = vsel %vm461_vm5, %v7073_v4, 0.0  ;;  %v935_v32 = vmul.f32 1.442695, %v904_v53 }
 0x391   :  { %1322 = vmatpush.bf16.msrb.mxu1 %v1313_v20 }
 0x392   :  { %2161 = vrot.lane.b32.xlu2 %v6695_v0, %s6114_s18 }
 0x394   :  { %v1557_v62 = vpop.permute.xlu1 %1556 }
 0x395   :  { %2140 = vrot.lane.b32.xlu1 %v6648_v43, %s6114_s18  ;;  %v1562_v27 = vsel %vm461_vm5, %v1557_v62, 0 }
 0x397   :  { %v7077_v46 = vpop.permute.xlu0 %1554 }
 0x399   :  { %5390 = vmatmul.msk.bf16.vlgmr.msrb.gmra.mxu2 %vm461_vm5, %v1023_v34 }
 0x39a   :  { %1343 = vmatpush.bf16.msrb.mxu2 %v1334_v31  ;;  %2182 = vrot.lane.b32.xlu2 %v6558_v45, %s6114_s18 }
 0x39d   :  { %2119 = vrot.lane.b32.xlu1 %v6646_v18, %s6114_s18 }
 0x39f   :  { %971 = vadd.xlane.f32.xlu0 %v970_v36  ;;  %v7085_v59 = vpop.permute.xlu0 %1717 }
 0x3a2   :  { %2337 = vrot.lane.b32.xlu2 %v6590_v14, %s6115_s19 }
 0x3a5   :  { %2245 = vrot.lane.b32.xlu1 %v6596_v42, %s6114_s18 }
 0x3a7   :  { %980 = vadd.xlane.f32.xlu0 %v979_v54  ;;  %v7091_v9 = vpop.permute.xlu0 %1692 }
 0x3ad   :  { %2268 = vrot.lane.b32.xlu1 %v6540_v23, %s6115_s19 }
 0x3af   :  { %v7101_v6 = vpop.permute.xlu0 %1669 }
 0x3b2   :  { %v7087_v39 = vpop.f32.mrf.mxu3 }
 0x3b3   :  { %8962 = vst [vmem:[#allocation10_spill] sm:$0xff] %v7087_v39 }
 0x3b5   :  { %v966_v49 = vpop.xlane.xlu2 %965 }
 0x3b6   :  { %5787 = vrcp.f32 %v966_v49 }
 0x3b7   :  { %v7115_v2 = vpop.permute.xlu0 %1972 }
 0x3ba   :  { %v1074_v48 = vpop.f32.mrf.mxu3 }
 0x3bb   :  { %2291 = vrot.lane.b32.xlu0 %v6563_v33, %s6115_s19 }
 0x3bc   :  { %v5788_v50 = vpop.eup %5787 }
 0x3bd   :  { %v1010_v10 = vmul.f32 %v5788_v50, %v6963_v15  ;;  %v969_v38 = vpop.xlane.xlu2 %968 }
 0x3be   :  { %5789 = vrcp.f32 %v969_v38 }
 0x3bf   :  { %v1026_v26 = vpack.c.bf16 %v1010_v10, %v1010_v10  ;;  %v975_v21 = vpop.xlane.xlu1 %974  ;;  %v7123_v31 = vpop.permute.xlu0 %1951 }
 0x3c0   :  { %5791 = vrcp.f32 %v975_v21 }
 0x3c1   :  { %5793 = vpow2.f32 %v931_v29  ;;  %5393 = vmatmul.msk.bf16.vlgmr.msra.gmra.mxu1 %vm461_vm5, %v1026_v26 }
 0x3c2   :  { %1410 = vmatpush.bf16.xpose.msra.mxu1 %v1401_v19  ;;  %5795 = vpow2.f32 %v935_v32 }
 0x3c4   :  { %v5790_v63 = vpop.eup %5789 }
 0x3c5   :  { %v1011_v15 = vmul.f32 %v5790_v63, %v6969_v11  ;;  %v1470_v11 = vsel %vm461_vm5, %v6810_v5, 0  ;;  %v7128_v5 = vpop.permute.xlu2 %1577 }
 0x3c6   :  { %v5792_v51 = vpop.eup %5791 }
 0x3c7   :  { %v7104_v20 = vpop.eup %5793  ;;  %v1027_v16 = vpack.c.bf16 %v1011_v15, %v1011_v15  ;;  %v1013_v22 = vmul.f32 %v5792_v51, %v6971_v28  ;;  %v2015_v54 = vpop.permute.xlu0 %2014 }
 0x3c8   :  { %v976_v3 = vsel %vm461_vm5, %v7104_v20, 0.0  ;;  %v7117_v28 = vpop.eup %5795 }
 0x3c9   :  { %v1029_v40 = vpack.c.bf16 %v1013_v22, %v1013_v22  ;;  %5394 = vmatmul.msk.bf16.vlgmr.msra.gmra.mxu2 %vm461_vm5, %v1027_v16  ;;  %v982_v44 = vsel %vm461_vm5, %v7117_v28, 0.0 }
 0x3ca   :  { %1433 = vmatpush.bf16.xpose.msra.mxu2 %v1424_v8 }
 0x3cb   :  { %5396 = vmatmul.msk.bf16.vlgmr.msra.gmra.mxu0 %vm461_vm5, %v1029_v40  ;;  %977 = vadd.xlane.f32.xlu2 %v976_v3  ;;  %v2020_v40 = vsel %vm1038_vm6, %v2015_v54, 0 }
 0x3cc   :  { %1479 = vmatpush.bf16.xpose.msra.mxu0 %v1470_v11 }
 0x3cd   :  { %v1649_v48 = vpop.permute.xlu2 %1648 }
 0x3ce   :  { %v1654_v50 = vsel %vm461_vm5, %v1649_v48, 0 }
 0x3d3   :  { %983 = vadd.xlane.f32.xlu2 %v982_v44 }
 0x3d5   :  { %v7147_v21 = vpop.permute.xlu2 %1715 }
 0x3d7   :  { %v7121_v34 = vpop.permute.xlu1 %1623 }
 0x3db   :  { %5400 = vmatmul.msk.bf16.vlgmr.msrb.gmra.mxu0 %vm461_vm5, %v6868_v13  ;;  %v7141_v13 = vpop.permute.xlu0 %2098 }
 0x3dc   :  { %1571 = vmatpush.bf16.xpose.msrb.mxu0 %v1562_v27 }
 0x3dd   :  { %v7158_v15 = vpop.permute.xlu2 %1993 }
 0x3df   :  { %v7130_v36 = vpop.permute.xlu1 %1694 }
 0x3e1   :  { %v7132_v49 = vpop.f32.mrf.mxu3 }
 0x3e2   :  { %8963 = vst [vmem:[#allocation11_spill] sm:$0xff] %v7132_v49 }
 0x3e3   :  { %v7145_v38 = vpop.permute.xlu0 %2224 }
 0x3e5   :  { %v7168_v11 = vpop.permute.xlu2 %2056 }
 0x3e7   :  { %v7134_v37 = vpop.permute.xlu1 %1671 }
 0x3e9   :  { %v1137_v29 = vpop.f32.mrf.mxu3 }
 0x3eb   :  { %5404 = vmatmul.msk.bf16.vlgmr.msra.gmra.mxu0 %vm461_vm5, %v6891_v58  ;;  %2312 = vrot.lane.b32.xlu2 %v6549_v30, %s6116_s20  ;;  %v7156_v32 = vpop.permute.xlu0 %2203 }
 0x3ec   :  { %1663 = vmatpush.bf16.xpose.msra.mxu0 %v1654_v50 }
 0x3ed   :  { %v7172_v29 = vpop.permute.xlu2 %2035 }
 0x3ef   :  { %v1647_v62 = vpop.permute.xlu1 %1646 }
 0x3f1   :  { %v7143_v10 = vpop.f32.mrf.mxu3 }
 0x3f2   :  { %8964 = vst [vmem:[#allocation12_spill] sm:$0xff] %v7143_v10 }
 0x3f3   :  { %v7162_v8 = vpop.permute.xlu0 %2314 }
 0x3f7   :  { %v1931_v26 = vpop.permute.xlu1 %1930 }
 0x3f8   :  { %v1936_v19 = vsel %vm1038_vm6, %v1931_v26, 0 }
 0x3f9   :  { %v1200_v53 = vpop.f32.mrf.mxu3 }
 0x3fb   :  { %5408 = vmatmul.msk.bf16.vlgmr.msrb.gmra.mxu0 %vm461_vm5, %v7077_v46  ;;  %v7152_v58 = vpop.f32.mrf.mxu2 }
 0x3fc   :  { %8965 = vst [vmem:[#allocation13_spill] sm:$0xff] %v7152_v58  ;;  %1945 = vmatpush.bf16.msrb.mxu0 %v1936_v19 }
 0x3fd   :  { %v7154_v63 = vpop.f32.mrf.mxu1 }
 0x3fe   :  { %8966 = vst [vmem:[#allocation14_spill] sm:$0xff] %v7154_v63 }
 0x403   :  { %v1053_v51 = vpop.f32.mrf.mxu2 }
 0x404   :  { %v1447_v51 = vsel %vm461_vm5, %v6784_v24, 0  ;;  %v1608_v24 = vsel %vm461_vm5, %v6866_v7, 0 }
 0x405   :  { %v7160_v16 = vpop.f32.mrf.mxu0  ;;  %v1095_v22 = vpop.f32.mrf.mxu1 }
 0x406   :  { %8967 = vst [vmem:[#allocation15_spill] sm:$0xff] %v7160_v16 }
 0x40b   :  { %5412 = vmatmul.msk.bf16.vlgmr.msra.gmra.mxu0 %vm461_vm5, %v1647_v62 }
 0x40c   :  { %v7166_v46 = vpop.f32.mrf.mxu2  ;;  %2029 = vmatpush.bf16.msra.mxu0 %v2020_v40  ;;  %v7180_v40 = vpop.permute.xlu2 %2161 }
 0x40d   :  { %8968 = vst [vmem:[#allocation16_spill] sm:$0xff] %v7166_v46  ;;  %v1221_v3 = vpop.f32.mrf.mxu0  ;;  %v7170_v44 = vpop.f32.mrf.mxu1 }
 0x40e   :  { %8969 = vst [vmem:[#allocation17_spill] sm:$0xff] %v7170_v44 }
 0x412   :  { %v972_v27 = vpop.xlane.xlu0 %971 }
 0x413   :  { %5797 = vrcp.f32 %v972_v27 }
 0x414   :  { %v1116_v48 = vpop.f32.mrf.mxu2 }
 0x415   :  { %v1158_v50 = vpop.f32.mrf.mxu1 }
 0x416   :  { %v7186_v50 = vpop.permute.xlu2 %2182 }
 0x419   :  { %v5798_v26 = vpop.eup %5797 }
 0x41a   :  { %v1012_v19 = vmul.f32 %v5798_v26, %v7063_v56  ;;  %v981_v54 = vpop.xlane.xlu0 %980  ;;  %v1516_v56 = vsel %vm461_vm5, %v6885_v41, 0  ;;  %v1700_v41 = vsel %vm461_vm5, %v7130_v36, 0 }
 0x41b   :  { %5799 = vrcp.f32 %v981_v54 }
 0x41c   :  { %v1028_v62 = vpack.c.bf16 %v1012_v19, %v1012_v19  ;;  %v7175_v53 = vpop.f32.mrf.mxu2 }
 0x41d   :  { %8970 = vst [vmem:[#allocation18_spill] sm:$0xff] %v7175_v53 }
 0x41e   :  { %5395 = vmatmul.msk.bf16.vlgmr.msrb.gmra.mxu3 %vm461_vm5, %v1028_v62  ;;  %v7190_v26 = vpop.permute.xlu2 %2337 }
 0x41f   :  { %1456 = vmatpush.bf16.xpose.msrb.mxu3 %v1447_v51 }
 0x421   :  { %v5800_v22 = vpop.eup %5799 }
 0x422   :  { %v1015_v3 = vmul.f32 %v5800_v22, %v7073_v4 }
 0x424   :  { %v1031_v27 = vpack.c.bf16 %v1015_v3, %v1015_v3  ;;  %v1179_v48 = vpop.f32.mrf.mxu2  ;;  %v8973_v3 = vld [vmem:[#allocation7_spill] sm:$0xff] }
 0x426   :  { %5398 = vmatmul.msk.bf16.vlgmr.msrb.gmra.mxu2 %vm461_vm5, %v1031_v27  ;;  %v1493_v27 = vsel %vm461_vm5, %v8973_v3, 0  ;;  %v8977_v3 = vld [vmem:[#allocation9_spill] sm:$0xff] }
 0x427   :  { %1525 = vmatpush.bf16.xpose.msrb.mxu2 %v1516_v56 }
 0x436   :  { %5402 = vmatmul.msk.bf16.vlgmr.msra.gmra.mxu2 %vm461_vm5, %v6792_v17 }
 0x437   :  { %1617 = vmatpush.bf16.xpose.msra.mxu2 %v1608_v24 }
 0x43e   :  { %v978_v4 = vpop.xlane.xlu2 %977  ;;  %v7194_v19 = vpop.f32.mrf.mxu1 }
 0x43f   :  { %8971 = vst [vmem:[#allocation19_spill] sm:$0xff] %v7194_v19  ;;  %5801 = vrcp.f32 %v978_v4  ;;  %v8975_v4 = vld [vmem:[#allocation5_spill] sm:$0xff] }
 0x445   :  { %v5802_v54 = vpop.eup %5801 }
 0x446   :  { %v1014_v62 = vmul.f32 %v5802_v54, %v7104_v20  ;;  %v984_v51 = vpop.xlane.xlu2 %983  ;;  %v1242_v22 = vpop.f32.mrf.mxu1  ;;  %5406 = vmatmul.msk.bf16.vlgmr.msrb.gmra.mxu2 %vm461_vm5, %v6879_v60  ;;  %v1539_v60 = vsel %vm461_vm5, %v8975_v4, 0  ;;  %v8980_v4 = vld [vmem:[#allocation4_spill] sm:$0xff] }
 0x447   :  { %5803 = vrcp.f32 %v984_v51  ;;  %1709 = vmatpush.bf16.xpose.msrb.mxu2 %v1700_v41  ;;  %v1978_v41 = vsel %vm1038_vm6, %v7115_v2, 0  ;;  %v1585_v51 = vsel %vm461_vm5, %v7065_v1, 0  ;;  %v8976_v22 = vld [vmem:[#allocation3_spill] sm:$0xff]  ;;  %v1631_v2 = vsel %vm461_vm5, %v8977_v3, 0 }
 0x448   :  { %v1030_v7 = vpack.c.bf16 %v1014_v62, %v1014_v62  ;;  %v7201_v17 = vpop.f32.mrf.mxu0 }
 0x449   :  { %8972 = vst [vmem:[#allocation20_spill] sm:$0xff] %v7201_v17 }
 0x44a   :  { %5397 = vmatmul.msk.bf16.vlgmr.msrb.gmra.mxu1 %vm461_vm5, %v1030_v7 }
 0x44b   :  { %1502 = vmatpush.bf16.xpose.msrb.mxu1 %v1493_v27  ;;  %v8978_v27 = vld [vmem:[#allocation6_spill] sm:$0xff] }
 0x44c   :  { %v7206_v48 = vpop.f32.mrf.mxu2 }
 0x44d   :  { %8974 = vst [vmem:[#allocation7_spill] sm:$0xff] %v7206_v48  ;;  %v5804_v36 = vpop.eup %5803 }
 0x44e   :  { %v1016_v20 = vmul.f32 %v5804_v36, %v7117_v28  ;;  %v1677_v36 = vsel %vm461_vm5, %v7134_v37, 0 }
 0x450   :  { %v1032_v56 = vpack.c.bf16 %v1016_v20, %v1016_v20  ;;  %v1305_v24 = vpop.f32.mrf.mxu0  ;;  %v8979_v20 = vld [vmem:[#allocation8_spill] sm:$0xff] }
 0x451   :  { %v1723_v24 = vsel %vm461_vm5, %v7085_v59, 0 }
 0x452   :  { %5399 = vmatmul.msk.bf16.vlgmr.msra.gmra.mxu3 %vm461_vm5, %v1032_v56 }
 0x453   :  { %1548 = vmatpush.bf16.xpose.msra.mxu3 %v1539_v60  ;;  %v1999_v60 = vsel %vm1038_vm6, %v7158_v15, 0 }
 0x454   :  { %v1263_v54 = vpop.f32.mrf.mxu2 }
 0x455   :  { %v2041_v54 = vsel %vm1038_vm6, %v7172_v29, 0 }
 0x456   :  { %5410 = vmatmul.msk.bf16.vlgmr.msra.gmra.mxu2 %vm461_vm5, %v7081_v35  ;;  %v2062_v35 = vsel %vm1038_vm6, %v7168_v11, 0 }
 0x457   :  { %1987 = vmatpush.bf16.msra.mxu2 %v1978_v41 }
 0x458   :  { %v7216_v62 = vpop.f32.mrf.mxu0 }
 0x459   :  { %v1738_v28 = vsel %vm461_vm5, %v7216_v62, -inf }
 0x45a   :  { %1739 = vmax.xlane.f32.xlu0 %v1738_v28  ;;  %5401 = vmatmul.msk.bf16.vlgmr.msra.gmra.mxu1 %vm461_vm5, %v8976_v22 }
 0x45b   :  { %1594 = vmatpush.bf16.xpose.msra.mxu1 %v1585_v51 }
 0x460   :  { %v1391_v7 = vpop.f32.mrf.mxu0 }
 0x462   :  { %5403 = vmatmul.msk.bf16.vlgmr.msrb.gmra.mxu3 %vm461_vm5, %v8978_v27 }
 0x463   :  { %1640 = vmatpush.bf16.xpose.msrb.mxu3 %v1631_v2 }
 0x466   :  { %5414 = vmatmul.msk.bf16.vlgmr.msrb.gmra.mxu2 %vm461_vm5, %v7091_v9  ;;  %v1957_v9 = vsel %vm1038_vm6, %v7123_v31, 0  ;;  %v2078_v31 = vpop.permute.xlu1 %2077 }
 0x467   :  { %2071 = vmatpush.bf16.msrb.mxu2 %v2062_v35  ;;  %v2083_v41 = vsel %vm1038_vm6, %v2078_v31, 0 }
 0x468   :  { %v7232_v1 = vpop.f32.mrf.mxu0 }
 0x46a   :  { %5405 = vmatmul.msk.bf16.vlgmr.msrb.gmra.mxu1 %vm461_vm5, %v8979_v20 }
 0x46b   :  { %1686 = vmatpush.bf16.xpose.msrb.mxu1 %v1677_v36 }
 0x470   :  { %v1483_v56 = vpop.f32.mrf.mxu0 }
 0x472   :  { %5407 = vmatmul.msk.bf16.vlgmr.msra.gmra.mxu3 %vm461_vm5, %v8980_v4 }
 0x473   :  { %1732 = vmatpush.bf16.xpose.msra.mxu3 %v1723_v24  ;;  %v1750_v24 = vsel %vm461_vm5, %v7232_v1, -inf }
 0x478   :  { %v7242_v11 = vpop.f32.mrf.mxu0 }
 0x47a   :  { %5409 = vmatmul.msk.bf16.vlgmr.msra.gmra.mxu1 %vm461_vm5, %v7128_v5 }
 0x47b   :  { %1966 = vmatpush.bf16.msra.mxu1 %v1957_v9 }
 0x480   :  { %v1575_v37 = vpop.f32.mrf.mxu0 }
 0x482   :  { %5411 = vmatmul.msk.bf16.vlgmr.msrb.gmra.mxu3 %vm461_vm5, %v7121_v34 }
 0x483   :  { %2008 = vmatpush.bf16.msrb.mxu3 %v1999_v60 }
 0x488   :  { %v7252_v59 = vpop.f32.mrf.mxu0 }
 0x48a   :  { %5413 = vmatmul.msk.bf16.vlgmr.msrb.gmra.mxu1 %vm461_vm5, %v7101_v6 }
 0x48b   :  { %2050 = vmatpush.bf16.msrb.mxu1 %v2041_v54 }
 0x490   :  { %v1667_v5 = vpop.f32.mrf.mxu0 }
 0x492   :  { %5415 = vmatmul.msk.bf16.vlgmr.msra.gmra.mxu3 %vm461_vm5, %v7147_v21 }
 0x493   :  { %2092 = vmatpush.bf16.msra.mxu3 %v2083_v41 }
 0x4a1   :  { %v7261_v15 = vpop.f32.mrf.mxu3 }
 0x4a2   :  { %8981 = vst [vmem:[#allocation5_spill] sm:$0xff] %v7261_v15 }
 0x4a9   :  { %v1284_v34 = vpop.f32.mrf.mxu3  ;;  %v7263_v28 = vpop.f32.mrf.mxu2 }
 0x4aa   :  { %8982 = vst [vmem:[#allocation3_spill] sm:$0xff] %v7263_v28 }
 0x4b1   :  { %v1347_v51 = vpop.f32.mrf.mxu2 }
 0x4b9   :  { %v7265_v22 = vpop.f32.mrf.mxu2 }
 0x4ba   :  { %v1744_v54 = vsel %vm461_vm5, %v7265_v22, -inf }
 0x4c1   :  { %v1437_v29 = vpop.f32.mrf.mxu2 }
 0x4c7   :  { %v7267_v7 = vpop.f32.mrf.mxu1 }
 0x4c8   :  { %8983 = vst [vmem:[#allocation9_spill] sm:$0xff] %v7267_v7 }
 0x4c9   :  { %v7269_v6 = vpop.f32.mrf.mxu2 }
 0x4cf   :  { %v1326_v3 = vpop.f32.mrf.mxu1 }
 0x4d0   :  { %v1762_v3 = vsel %vm461_vm5, %v7242_v11, -inf }
 0x4d1   :  { %v1529_v2 = vpop.f32.mrf.mxu2 }
 0x4d5   :  { %v7271_v27 = vpop.f32.mrf.mxu3 }
 0x4d6   :  { %8984 = vst [vmem:[#allocation6_spill] sm:$0xff] %v7271_v27 }
 0x4d7   :  { %v7273_v35 = vpop.f32.mrf.mxu1 }
 0x4d8   :  { %v1741_v21 = vsel %vm461_vm5, %v7273_v35, -inf }
 0x4d9   :  { %1742 = vmax.xlane.f32.xlu2 %v1741_v21  ;;  %v7277_v36 = vpop.f32.mrf.mxu2 }
 0x4dd   :  { %v1368_v20 = vpop.f32.mrf.mxu3 }
 0x4df   :  { %v1414_v56 = vpop.f32.mrf.mxu1 }
 0x4e1   :  { %1751 = vmax.xlane.f32.xlu2 %v1750_v24  ;;  %v1621_v4 = vpop.f32.mrf.mxu2  ;;  %v1756_v24 = vsel %vm461_vm5, %v7269_v6, -inf }
 0x4e5   :  { %v7281_v9 = vpop.f32.mrf.mxu3 }
 0x4e6   :  { %v1747_v37 = vsel %vm461_vm5, %v7281_v9, -inf }
 0x4e7   :  { %v7285_v60 = vpop.f32.mrf.mxu1  ;;  %1748 = vmax.xlane.f32.xlu1 %v1747_v37  ;;  %v7305_v37 = vpop.permute.xlu0 %2291 }
 0x4e8   :  { %v1753_v41 = vsel %vm461_vm5, %v7285_v60, -inf }
 0x4e9   :  { %1745 = vmax.xlane.f32.xlu2 %v1744_v54  ;;  %v7289_v31 = vpop.f32.mrf.mxu2 }
 0x4ed   :  { %v1460_v5 = vpop.f32.mrf.mxu3 }
 0x4ee   :  { %v1774_v5 = vsel %vm461_vm5, %v7252_v59, -inf }
 0x4ef   :  { %v1506_v34 = vpop.f32.mrf.mxu1  ;;  %1754 = vmax.xlane.f32.xlu1 %v1753_v41 }
 0x4f1   :  { %v1713_v51 = vpop.f32.mrf.mxu2 }
 0x4f2   :  { %v1740_v51 = vpop.xlane.xlu0 %1739 }
 0x4f5   :  { %v7293_v29 = vpop.f32.mrf.mxu3 }
 0x4f6   :  { %v1759_v2 = vsel %vm461_vm5, %v7293_v29, -inf }
 0x4f7   :  { %v7299_v21 = vpop.f32.mrf.mxu1  ;;  %1763 = vmax.xlane.f32.xlu1 %v1762_v3  ;;  %1760 = vmax.xlane.f32.xlu0 %v1759_v2  ;;  %v1786_v3 = vsub.f32 %v7216_v62, %v1740_v51  ;;  %v1780_v62 = vsel %vm461_vm5, %v7289_v31, -inf }
 0x4f8   :  { %v1765_v56 = vsel %vm461_vm5, %v7299_v21, -inf }
 0x4fd   :  { %v1552_v20 = vpop.f32.mrf.mxu3 }
 0x4ff   :  { %v1598_v4 = vpop.f32.mrf.mxu1  ;;  %1766 = vmax.xlane.f32.xlu0 %v1765_v56  ;;  %1757 = vmax.xlane.f32.xlu1 %v1756_v24  ;;  %v1768_v56 = vsel %vm461_vm5, %v7277_v36, -inf }
 0x500   :  { %v1802_v4 = vmul.f32 1.442695, %v1786_v3  ;;  %v7332_v3 = vpop.permute.xlu1 %2140 }
 0x502   :  { %5805 = vpow2.f32 %v1802_v4 }
 0x505   :  { %v7307_v54 = vpop.f32.mrf.mxu3 }
 0x506   :  { %v1771_v41 = vsel %vm461_vm5, %v7307_v54, -inf }
 0x507   :  { %v7313_v34 = vpop.f32.mrf.mxu1  ;;  %1775 = vmax.xlane.f32.xlu0 %v1774_v5  ;;  %1772 = vmax.xlane.f32.xlu2 %v1771_v41 }
 0x508   :  { %v1777_v20 = vsel %vm461_vm5, %v7313_v34, -inf  ;;  %v7326_v41 = vpop.eup %5805 }
 0x50d   :  { %v1644_v2 = vpop.f32.mrf.mxu3 }
 0x50e   :  { %v1834_v2 = vsel %vm461_vm5, %v7326_v41, 0.0 }
 0x50f   :  { %v1690_v24 = vpop.f32.mrf.mxu1  ;;  %1778 = vmax.xlane.f32.xlu2 %v1777_v20  ;;  %1769 = vmax.xlane.f32.xlu0 %v1768_v56  ;;  %v7336_v20 = vpop.permute.xlu1 %2119 }
 0x510   :  { %v7338_v56 = vpop.permute.xlu2 %2312 }
 0x515   :  { %v7320_v28 = vpop.f32.mrf.mxu3 }
 0x516   :  { %v1783_v5 = vsel %vm461_vm5, %v7320_v28, -inf }
 0x517   :  { %1784 = vmax.xlane.f32.xlu1 %v1783_v5  ;;  %1781 = vmax.xlane.f32.xlu2 %v1780_v62  ;;  %v7340_v24 = vpop.permute.xlu1 %2245 }
 0x51d   :  { %v1736_v51 = vpop.f32.mrf.mxu3 }
 0x51f   :  { %1835 = vadd.xlane.f32.xlu2 %v1834_v2  ;;  %v7343_v51 = vpop.permute.xlu1 %2268 }
 0x523   :  { %2266 = vrot.lane.b32.xlu0 %v6540_v23, %s6116_s20 }
 0x537   :  { %2289 = vrot.lane.b32.xlu2 %v6563_v33, %s6116_s20 }
 0x54c   :  { %v1743_v4 = vpop.xlane.xlu2 %1742 }
 0x54d   :  { %v1787_v5 = vsub.f32 %v7273_v35, %v1743_v4 }
 0x54f   :  { %v1804_v62 = vmul.f32 1.442695, %v1787_v5 }
 0x551   :  { %5807 = vpow2.f32 %v1804_v62 }
 0x554   :  { %v1752_v2 = vpop.xlane.xlu2 %1751 }
 0x555   :  { %v1790_v27 = vsub.f32 %v7232_v1, %v1752_v2 }
 0x557   :  { %v7346_v17 = vpop.eup %5807  ;;  %v1810_v7 = vmul.f32 1.442695, %v1790_v27 }
 0x558   :  { %v1837_v48 = vsel %vm461_vm5, %v7346_v17, 0.0 }
 0x559   :  { %5809 = vpow2.f32 %v1810_v7  ;;  %1838 = vadd.xlane.f32.xlu1 %v1837_v48 }
 0x55a   :  { %v1749_v15 = vpop.xlane.xlu1 %1748 }
 0x55b   :  { %v1789_v16 = vsub.f32 %v7281_v9, %v1749_v15 }
 0x55c   :  { %v1746_v19 = vpop.xlane.xlu2 %1745 }
 0x55d   :  { %v1808_v35 = vmul.f32 1.442695, %v1789_v16  ;;  %v1788_v4 = vsub.f32 %v7265_v22, %v1746_v19 }
 0x55f   :  { %v7352_v5 = vpop.eup %5809  ;;  %5811 = vpow2.f32 %v1808_v35  ;;  %v1806_v62 = vmul.f32 1.442695, %v1788_v4 }
 0x560   :  { %v1846_v1 = vsel %vm461_vm5, %v7352_v5, 0.0 }
 0x561   :  { %5813 = vpow2.f32 %v1806_v62  ;;  %1847 = vadd.xlane.f32.xlu1 %v1846_v1 }
 0x562   :  { %v1755_v27 = vpop.xlane.xlu1 %1754 }
 0x563   :  { %v1791_v7 = vsub.f32 %v7285_v60, %v1755_v27 }
 0x565   :  { %v7357_v48 = vpop.eup %5811  ;;  %v1812_v2 = vmul.f32 1.442695, %v1791_v7 }
 0x566   :  { %v1843_v16 = vsel %vm461_vm5, %v7357_v48, 0.0 }
 0x567   :  { %v7361_v15 = vpop.eup %5813  ;;  %5815 = vpow2.f32 %v1812_v2  ;;  %1844 = vadd.xlane.f32.xlu0 %v1843_v16 }
 0x568   :  { %v1840_v19 = vsel %vm461_vm5, %v7361_v15, 0.0 }
 0x569   :  { %1841 = vadd.xlane.f32.xlu1 %v1840_v19 }
 0x56a   :  { %v1764_v22 = vpop.xlane.xlu1 %1763  ;;  %v1761_v9 = vpop.xlane.xlu0 %1760 }
 0x56b   :  { %v1794_v35 = vsub.f32 %v7242_v11, %v1764_v22  ;;  %v1793_v62 = vsub.f32 %v7293_v29, %v1761_v9 }
 0x56d   :  { %v7366_v4 = vpop.eup %5815  ;;  %v1818_v60 = vmul.f32 1.442695, %v1794_v35  ;;  %v1816_v27 = vmul.f32 1.442695, %v1793_v62 }
 0x56e   :  { %v1849_v1 = vsel %vm461_vm5, %v7366_v4, 0.0 }
 0x56f   :  { %5817 = vpow2.f32 %v1818_v60  ;;  %1850 = vadd.xlane.f32.xlu0 %v1849_v1 }
 0x570   :  { %5819 = vpow2.f32 %v1816_v27 }
 0x572   :  { %v1758_v7 = vpop.xlane.xlu1 %1757  ;;  %v1767_v2 = vpop.xlane.xlu0 %1766 }
 0x573   :  { %v1792_v16 = vsub.f32 %v7269_v6, %v1758_v7  ;;  %v1795_v11 = vsub.f32 %v7299_v21, %v1767_v2 }
 0x575   :  { %v7372_v19 = vpop.eup %5817  ;;  %v1814_v53 = vmul.f32 1.442695, %v1792_v16  ;;  %v1820_v29 = vmul.f32 1.442695, %v1795_v11 }
 0x576   :  { %v1858_v22 = vsel %vm461_vm5, %v7372_v19, 0.0  ;;  %v7377_v60 = vpop.eup %5819 }
 0x577   :  { %5821 = vpow2.f32 %v1814_v53  ;;  %1859 = vadd.xlane.f32.xlu2 %v1858_v22  ;;  %v1855_v1 = vsel %vm461_vm5, %v7377_v60, 0.0 }
 0x578   :  { %5823 = vpow2.f32 %v1820_v29 }
 0x57a   :  { %v1773_v9 = vpop.xlane.xlu2 %1772  ;;  %v1776_v35 = vpop.xlane.xlu0 %1775 }
 0x57d   :  { %v7379_v62 = vpop.eup %5821 }
 0x57e   :  { %v1852_v6 = vsel %vm461_vm5, %v7379_v62, 0.0  ;;  %v7389_v27 = vpop.eup %5823 }
 0x57f   :  { %1853 = vadd.xlane.f32.xlu0 %v1852_v6  ;;  %1856 = vadd.xlane.f32.xlu2 %v1855_v1  ;;  %v1861_v16 = vsel %vm461_vm5, %v7389_v27, 0.0  ;;  %v1798_v1 = vsub.f32 %v7252_v59, %v1776_v35 }
 0x582   :  { %v7385_v21 = vpop.xlane.xlu2 %1778  ;;  %2335 = vrot.lane.b32.xlu1 %v6590_v14, %s6116_s20  ;;  %v1770_v53 = vpop.xlane.xlu0 %1769 }
 0x583   :  { %v1796_v7 = vsub.f32 %v7277_v36, %v1770_v53 }
 0x585   :  { %v1822_v2 = vmul.f32 1.442695, %v1796_v7 }
 0x587   :  { %1862 = vadd.xlane.f32.xlu0 %v1861_v16  ;;  %5825 = vpow2.f32 %v1822_v2  ;;  %v2104_v2 = vsel %vm1038_vm6, %v7141_v13, 0  ;;  %v1826_v16 = vmul.f32 1.442695, %v1798_v1 }
 0x58a   :  { %v7394_v11 = vpop.xlane.xlu2 %1781  ;;  %v7434_v35 = vpop.xlane.xlu1 %1784 }
 0x58d   :  { %v7396_v22 = vpop.eup %5825 }
 0x58e   :  { %v1864_v29 = vsel %vm461_vm5, %v7396_v22, 0.0 }
 0x58f   :  { %1865 = vadd.xlane.f32.xlu0 %v1864_v29  ;;  %v1797_v29 = vsub.f32 %v7307_v54, %v1773_v9 }
 0x591   :  { %v1824_v59 = vmul.f32 1.442695, %v1797_v29 }
 0x592   :  { %v1836_v6 = vpop.xlane.xlu2 %1835 }
 0x593   :  { %5827 = vrcp.f32 %v1836_v6 }
 0x594   :  { %5829 = vpow2.f32 %v1826_v16  ;;  %v2125_v16 = vsel %vm1038_vm6, %v7336_v20, 0  ;;  %v2188_v20 = vsel %vm1038_vm6, %v7186_v50, 0  ;;  %v2167_v50 = vsel %vm1038_vm6, %v7180_v40, 0 }
 0x595   :  { %5831 = vpow2.f32 %v1824_v59  ;;  %v2209_v40 = vsel %vm1038_vm6, %v7156_v32, 0  ;;  %v2274_v32 = vsel %vm461_vm5, %v7343_v51, 0 }
 0x597   :  { %2360 = vrot.lane.b32.xlu2 %v6592_v55, %s6115_s19 }
 0x599   :  { %v5828_v36 = vpop.eup %5827 }
 0x59a   :  { %v1898_v53 = vmul.f32 %v5828_v36, %v7326_v41  ;;  %v7414_v41 = vpop.eup %5829  ;;  %v7446_v36 = vpop.permute.xlu0 %2266 }
 0x59b   :  { %v1870_v13 = vsel %vm461_vm5, %v7414_v41, 0.0  ;;  %v7422_v54 = vpop.eup %5831 }
 0x59c   :  { %v1914_v7 = vpack.c.bf16 %v1898_v53, %v1898_v53  ;;  %v1867_v9 = vsel %vm461_vm5, %v7422_v54, 0.0 }
 0x59e   :  { %5416 = vmatmul.msk.bf16.vlgmr.msrb.gmra.mxu0 %vm461_vm5, %v1914_v7 }
 0x59f   :  { %2113 = vmatpush.bf16.msrb.mxu0 %v2104_v2  ;;  %2427 = vrot.lane.b32.xlu2 %v6621_v61, %s6116_s20 }
 0x5a3   :  { %2429 = vrot.lane.b32.xlu0 %v6621_v61, %s6115_s19 }
 0x5a7   :  { %2498 = vrot.lane.b32.xlu2 %v6648_v43, %s6115_s19 }
 0x5ab   :  { %2404 = vrot.lane.b32.xlu0 %v6607_v57, %s6116_s20 }
 0x5ac   :  { %1871 = vadd.xlane.f32.xlu1 %v1870_v13 }
 0x5af   :  { %2475 = vrot.lane.b32.xlu2 %v6646_v18, %s6115_s19 }
 0x5b3   :  { %2381 = vrot.lane.b32.xlu0 %v6619_v47, %s6116_s20 }
 0x5b4   :  { %1868 = vadd.xlane.f32.xlu1 %v1867_v9 }
 0x5b7   :  { %2450 = vrot.lane.b32.xlu2 %v6632_v25, %s6116_s20 }
 0x5bb   :  { %2452 = vrot.lane.b32.xlu0 %v6632_v25, %s6115_s19 }
 0x5bf   :  { %2613 = vrot.lane.b32.xlu2 %v6596_v42, %s6115_s19 }
 0x5c3   :  { %2519 = vrot.lane.b32.xlu0 %v6695_v0, %s6116_s20 }
 0x5c7   :  { %2588 = vrot.lane.b32.xlu2 %v6579_v52, %s6116_s20 }
 0x5cb   :  { %2590 = vrot.lane.b32.xlu0 %v6579_v52, %s6115_s19 }
 0x5cc   :  { %v1839_v6 = vpop.xlane.xlu1 %1838 }
 0x5cd   :  { %5833 = vrcp.f32 %v1839_v6  ;;  %2406 = vrot.lane.b32.xlu1 %v6607_v57, %s6115_s19 }
 0x5cf   :  { %2565 = vrot.lane.b32.xlu2 %v6577_v12, %s6116_s20 }
 0x5d3   :  { %v5834_v1 = vpop.eup %5833  ;;  %2567 = vrot.lane.b32.xlu0 %v6577_v12, %s6115_s19 }
 0x5d4   :  { %v1899_v53 = vmul.f32 %v5834_v1, %v7346_v17  ;;  %v1848_v7 = vpop.xlane.xlu1 %1847  ;;  %v7466_v1 = vpop.permute.xlu2 %2289 }
 0x5d5   :  { %5835 = vrcp.f32 %v1848_v7  ;;  %2383 = vrot.lane.b32.xlu1 %v6619_v47, %s6115_s19 }
 0x5d6   :  { %v1915_v2 = vpack.c.bf16 %v1899_v53, %v1899_v53 }
 0x5d7   :  { %2826 = vrot.lane.b32.xlu2 %v6540_v23, %s6117_s21 }
 0x5d8   :  { %5417 = vmatmul.msk.bf16.vlgmr.msra.gmra.mxu1 %vm461_vm5, %v1915_v2 }
 0x5d9   :  { %2134 = vmatpush.bf16.msra.mxu1 %v2125_v16 }
 0x5da   :  { %v1845_v17 = vpop.xlane.xlu0 %1844 }
 0x5db   :  { %v5836_v29 = vpop.eup %5835  ;;  %5837 = vrcp.f32 %v1845_v17  ;;  %2542 = vrot.lane.b32.xlu0 %v6558_v45, %s6116_s20 }
 0x5dc   :  { %v1902_v59 = vmul.f32 %v5836_v29, %v7352_v5  ;;  %v1842_v13 = vpop.xlane.xlu1 %1841  ;;  %v2146_v29 = vsel %vm1038_vm6, %v7332_v3, 0 }
 0x5dd   :  { %5839 = vrcp.f32 %v1842_v13  ;;  %2358 = vrot.lane.b32.xlu1 %v6592_v55, %s6116_s20 }
 0x5de   :  { %v1918_v9 = vpack.c.bf16 %v1902_v59, %v1902_v59 }
 0x5e0   :  { %5420 = vmatmul.msk.bf16.vlgmr.msra.gmra.mxu0 %vm461_vm5, %v1918_v9  ;;  %v1799_v9 = vsub.f32 %v7313_v34, %v7385_v21  ;;  %v1800_v34 = vsub.f32 %v7289_v31, %v7394_v11  ;;  %v2251_v31 = vsel %vm1038_vm6, %v7340_v24, 0 }
 0x5e1   :  { %v5838_v6 = vpop.eup %5837  ;;  %2197 = vmatpush.bf16.msra.mxu0 %v2188_v20 }
 0x5e2   :  { %v1901_v5 = vmul.f32 %v5838_v6, %v7357_v48  ;;  %v1851_v53 = vpop.xlane.xlu0 %1850  ;;  %v1828_v20 = vmul.f32 1.442695, %v1799_v9 }
 0x5e3   :  { %v5840_v7 = vpop.eup %5839  ;;  %5841 = vrcp.f32 %v1851_v53  ;;  %v1801_v53 = vsub.f32 %v7320_v28, %v7434_v35 }
 0x5e4   :  { %v1917_v2 = vpack.c.bf16 %v1901_v5, %v1901_v5  ;;  %v1900_v16 = vmul.f32 %v5840_v7, %v7361_v15 }
 0x5e5   :  { %2521 = vrot.lane.b32.xlu1 %v6695_v0, %s6115_s19 }
 0x5e6   :  { %v1916_v17 = vpack.c.bf16 %v1900_v16, %v1900_v16  ;;  %5419 = vmatmul.msk.bf16.vlgmr.msrb.gmra.mxu3 %vm461_vm5, %v1917_v2  ;;  %v1830_v16 = vmul.f32 1.442695, %v1800_v34 }
 0x5e7   :  { %2176 = vmatpush.bf16.msrb.mxu3 %v2167_v50 }
 0x5e8   :  { %5418 = vmatmul.msk.bf16.vlgmr.msra.gmra.mxu2 %vm461_vm5, %v1916_v17 }
 0x5e9   :  { %v5842_v48 = vpop.eup %5841  ;;  %2155 = vmatpush.bf16.msra.mxu2 %v2146_v29 }
 0x5ea   :  { %v1903_v59 = vmul.f32 %v5842_v48, %v7366_v4  ;;  %v1860_v15 = vpop.xlane.xlu2 %1859 }
 0x5eb   :  { %5843 = vrcp.f32 %v1860_v15 }
 0x5ec   :  { %v1919_v13 = vpack.c.bf16 %v1903_v59, %v1903_v59 }
 0x5ed   :  { %2496 = vrot.lane.b32.xlu1 %v6648_v43, %s6116_s20 }
 0x5ee   :  { %5421 = vmatmul.msk.bf16.vlgmr.msrb.gmra.mxu1 %vm461_vm5, %v1919_v13 }
 0x5ef   :  { %2218 = vmatpush.bf16.msrb.mxu1 %v2209_v40  ;;  %v2297_v40 = vsel %vm461_vm5, %v7305_v37, 0 }
 0x5f1   :  { %v5844_v3 = vpop.eup %5843 }
 0x5f2   :  { %v1906_v6 = vmul.f32 %v5844_v3, %v7372_v19  ;;  %v1857_v4 = vpop.xlane.xlu2 %1856  ;;  %v1854_v5 = vpop.xlane.xlu0 %1853  ;;  %v1832_v19 = vmul.f32 1.442695, %v1801_v53 }
 0x5f3   :  { %5845 = vrcp.f32 %v1857_v4 }
 0x5f4   :  { %v1922_v7 = vpack.c.bf16 %v1906_v6, %v1906_v6  ;;  %5847 = vrcp.f32 %v1854_v5  ;;  %v2320_v6 = vsel %vm461_vm5, %v7162_v8, 0  ;;  %v7532_v37 = vpop.permute.xlu1 %2335 }
 0x5f5   :  { %2473 = vrot.lane.b32.xlu1 %v6646_v18, %s6116_s20  ;;  %5849 = vpow2.f32 %v1828_v20 }
 0x5f6   :  { %5424 = vmatmul.msk.bf16.vlgmr.msrb.gmra.mxu0 %vm461_vm5, %v1922_v7 }
 0x5f7   :  { %2283 = vmatpush.bf16.xpose.msrb.mxu0 %v2274_v32 }
 0x5f9   :  { %v5846_v21 = vpop.eup %5845 }
 0x5fa   :  { %v5848_v2 = vpop.eup %5847  ;;  %v1905_v28 = vmul.f32 %v5846_v21, %v7377_v60  ;;  %v1863_v35 = vpop.xlane.xlu0 %1862  ;;  %v2230_v60 = vsel %vm1038_vm6, %v7145_v38, 0 }
 0x5fb   :  { %v1904_v50 = vmul.f32 %v5848_v2, %v7379_v62  ;;  %5851 = vrcp.f32 %v1863_v35  ;;  %v7498_v17 = vpop.eup %5849  ;;  %v2361_v5 = vpop.permute.xlu2 %2360 }
 0x5fc   :  { %5853 = vpow2.f32 %v1832_v19  ;;  %v1921_v51 = vpack.c.bf16 %v1905_v28, %v1905_v28  ;;  %v1873_v62 = vsel %vm461_vm5, %v7498_v17, 0.0 }
 0x5fd   :  { %v1920_v29 = vpack.c.bf16 %v1904_v50, %v1904_v50  ;;  %2544 = vrot.lane.b32.xlu1 %v6558_v45, %s6115_s19  ;;  %5855 = vpow2.f32 %v1830_v16  ;;  %v2366_v16 = vsel %vm461_vm5, %v2361_v5, 0 }
 0x5fe   :  { %5423 = vmatmul.msk.bf16.vlgmr.msra.gmra.mxu3 %vm461_vm5, %v1921_v51 }
 0x5ff   :  { %5422 = vmatmul.msk.bf16.vlgmr.msrb.gmra.mxu2 %vm461_vm5, %v1920_v29  ;;  %2260 = vmatpush.bf16.msra.mxu3 %v2251_v31  ;;  %v2343_v29 = vsel %vm461_vm5, %v7190_v26, 0 }
 0x600   :  { %2239 = vmatpush.bf16.msrb.mxu2 %v2230_v60  ;;  %1874 = vadd.xlane.f32.xlu2 %v1873_v62 }
 0x601   :  { %v5852_v11 = vpop.eup %5851 }
 0x602   :  { %v7510_v48 = vpop.eup %5853  ;;  %v1907_v59 = vmul.f32 %v5852_v11, %v7389_v27  ;;  %v1866_v24 = vpop.xlane.xlu0 %1865 }
 0x603   :  { %v7513_v15 = vpop.eup %5855  ;;  %5857 = vrcp.f32 %v1866_v24  ;;  %v1879_v38 = vsel %vm461_vm5, %v7510_v48, 0.0  ;;  %v7550_v34 = vpop.permute.xlu2 %2427 }
 0x604   :  { %v1923_v13 = vpack.c.bf16 %v1907_v59, %v1907_v59  ;;  %v1876_v27 = vsel %vm461_vm5, %v7513_v15, 0.0 }
 0x605   :  { %2611 = vrot.lane.b32.xlu1 %v6596_v42, %s6116_s20  ;;  %1880 = vadd.xlane.f32.xlu0 %v1879_v38 }
 0x606   :  { %5425 = vmatmul.msk.bf16.vlgmr.msra.gmra.mxu1 %vm461_vm5, %v1923_v13 }
 0x607   :  { %2306 = vmatpush.bf16.xpose.msra.mxu1 %v2297_v40 }
 0x608   :  { %1877 = vadd.xlane.f32.xlu2 %v1876_v27 }
 0x609   :  { %v5858_v9 = vpop.eup %5857 }
 0x60a   :  { %v1908_v3 = vmul.f32 %v5858_v9, %v7396_v22 }
 0x60b   :  { %v7564_v50 = vpop.permute.xlu2 %2498 }
 0x60c   :  { %v1924_v20 = vpack.c.bf16 %v1908_v3, %v1908_v3 }
 0x60d   :  { %2847 = vrot.lane.b32.xlu1 %v6563_v33, %s6117_s21 }
 0x60f   :  { %5426 = vmatmul.msk.bf16.vlgmr.msra.gmra.mxu2 %vm461_vm5, %v1924_v20 }
 0x610   :  { %2329 = vmatpush.bf16.xpose.msra.mxu2 %v2320_v6 }
 0x615   :  { %2910 = vrot.lane.b32.xlu1 %v6592_v55, %s6117_s21  ;;  %v7534_v4 = vpop.permute.xlu0 %2429 }
 0x619   :  { %2868 = vrot.lane.b32.xlu0 %v6549_v30, %s6117_s21 }
 0x61b   :  { %v7538_v22 = vpop.f32.mrf.mxu0 }
 0x61d   :  { %2973 = vrot.lane.b32.xlu1 %v6621_v61, %s6117_s21  ;;  %v7546_v7 = vpop.permute.xlu0 %2404 }
 0x61f   :  { %v1872_v8 = vpop.xlane.xlu1 %1871 }
 0x620   :  { %5859 = vrcp.f32 %v1872_v8  ;;  %2889 = vrot.lane.b32.xlu2 %v6590_v14, %s6117_s21 }
 0x621   :  { %2952 = vrot.lane.b32.xlu0 %v6607_v57, %s6117_s21 }
 0x623   :  { %v1949_v53 = vpop.f32.mrf.mxu0 }
 0x625   :  { %3015 = vrot.lane.b32.xlu1 %v6646_v18, %s6117_s21  ;;  %v7561_v35 = vpop.permute.xlu0 %2381 }
 0x626   :  { %v5860_v32 = vpop.eup %5859 }
 0x627   :  { %v1910_v19 = vmul.f32 %v5860_v32, %v7414_v41  ;;  %v1869_v21 = vpop.xlane.xlu1 %1868 }
 0x628   :  { %5861 = vrcp.f32 %v1869_v21  ;;  %2931 = vrot.lane.b32.xlu2 %v6619_v47, %s6117_s21 }
 0x629   :  { %v1926_v2 = vpack.c.bf16 %v1910_v19, %v1910_v19  ;;  %2994 = vrot.lane.b32.xlu0 %v6632_v25, %s6117_s21 }
 0x62b   :  { %5428 = vmatmul.msk.bf16.vlgmr.msra.gmra.mxu0 %vm461_vm5, %v1926_v2 }
 0x62c   :  { %2375 = vmatpush.bf16.xpose.msra.mxu0 %v2366_v16 }
 0x62d   :  { %3078 = vrot.lane.b32.xlu1 %v6558_v45, %s6117_s21  ;;  %v2453_v31 = vpop.permute.xlu0 %2452 }
 0x62e   :  { %v5862_v28 = vpop.eup %5861  ;;  %v2458_v60 = vsel %vm461_vm5, %v2453_v31, 0 }
 0x62f   :  { %v1909_v41 = vmul.f32 %v5862_v28, %v7422_v54  ;;  %v7575_v54 = vpop.permute.xlu2 %2475 }
 0x630   :  { %3036 = vrot.lane.b32.xlu2 %v6648_v43, %s6117_s21 }
 0x631   :  { %v1925_v51 = vpack.c.bf16 %v1909_v41, %v1909_v41  ;;  %3057 = vrot.lane.b32.xlu0 %v6695_v0, %s6117_s21 }
 0x633   :  { %5427 = vmatmul.msk.bf16.vlgmr.msrb.gmra.mxu3 %vm461_vm5, %v1925_v51 }
 0x634   :  { %2352 = vmatpush.bf16.xpose.msrb.mxu3 %v2343_v29 }
 0x635   :  { %v7589_v13 = vpop.permute.xlu0 %2519 }
 0x637   :  { %v2451_v26 = vpop.permute.xlu2 %2450 }
 0x638   :  { %3099 = vrot.lane.b32.xlu2 %v6577_v12, %s6117_s21 }
 0x639   :  { %3120 = vrot.lane.b32.xlu0 %v6579_v52, %s6117_s21 }
 0x63b   :  { %5432 = vmatmul.msk.bf16.vlgmr.msrb.gmra.mxu0 %vm461_vm5, %v7446_v36 }
 0x63c   :  { %2467 = vmatpush.bf16.xpose.msrb.mxu0 %v2458_v60 }
 0x63d   :  { %v7599_v9 = vpop.permute.xlu0 %2590 }
 0x63f   :  { %v7582_v62 = vpop.permute.xlu1 %2406  ;;  %v7586_v59 = vpop.permute.xlu2 %2613 }
 0x640   :  { %3141 = vrot.lane.b32.xlu2 %v6596_v42, %s6117_s21 }
 0x645   :  { %v7608_v53 = vpop.permute.xlu0 %2567 }
 0x647   :  { %v2384_v11 = vpop.permute.xlu1 %2383  ;;  %v7597_v27 = vpop.permute.xlu2 %2588 }
 0x64d   :  { %v2543_v60 = vpop.permute.xlu0 %2542 }
 0x64f   :  { %v2359_v24 = vpop.permute.xlu1 %2358  ;;  %v7606_v5 = vpop.permute.xlu2 %2565 }
 0x650   :  { %5436 = vmatmul.msk.bf16.vlgmr.msra.gmra.mxu0 %vm461_vm5, %v2359_v24 }
 0x655   :  { %v7591_v38 = vpop.f32.mrf.mxu1 }
 0x657   :  { %v7595_v40 = vpop.permute.xlu1 %2521  ;;  %v2827_v16 = vpop.permute.xlu2 %2826 }
 0x658   :  { %v2832_v31 = vsel %vm1038_vm6, %v2827_v16, 0 }
 0x65d   :  { %v1970_v3 = vpop.f32.mrf.mxu1  ;;  %v7601_v20 = vpop.f32.mrf.mxu0 }
 0x65f   :  { %v7603_v6 = vpop.permute.xlu1 %2496 }
 0x660   :  { %5440 = vmatmul.msk.bf16.vlgmr.msrb.gmra.mxu0 %vm461_vm5, %v2451_v26 }
 0x665   :  { %v2033_v8 = vpop.f32.mrf.mxu0 }
 0x667   :  { %v7610_v32 = vpop.permute.xlu1 %2473 }
 0x669   :  { %v7612_v19 = vpop.f32.mrf.mxu3 }
 0x66b   :  { %v7614_v21 = vpop.f32.mrf.mxu2  ;;  %v7616_v2 = vpop.f32.mrf.mxu1 }
 0x66f   :  { %v2545_v51 = vpop.permute.xlu1 %2544 }
 0x670   :  { %v2550_v29 = vsel %vm461_vm5, %v2545_v51, 0 }
 0x671   :  { %v2012_v26 = vpop.f32.mrf.mxu3  ;;  %2559 = vmatpush.bf16.xpose.msra.mxu0 %v2550_v29 }
 0x673   :  { %v1991_v24 = vpop.f32.mrf.mxu2  ;;  %v7624_v3 = vpop.f32.mrf.mxu0 }
 0x674   :  { %8985 = vst [vmem:[#allocation8_spill] sm:$0xff] %v7624_v3  ;;  %v1875_v8 = vpop.xlane.xlu2 %1874  ;;  %v2054_v36 = vpop.f32.mrf.mxu1  ;;  %v2389_v24 = vsel %vm461_vm5, %v2384_v11, 0 }
 0x675   :  { %5863 = vrcp.f32 %v1875_v8 }
 0x677   :  { %v7626_v10 = vpop.permute.xlu1 %2611 }
 0x678   :  { %5444 = vmatmul.msk.bf16.vlgmr.msra.gmra.mxu0 %vm461_vm5, %v2543_v60  ;;  %v1881_v41 = vpop.xlane.xlu0 %1880 }
 0x679   :  { %2841 = vmatpush.bf16.msrb.mxu0 %v2832_v31  ;;  %5865 = vrcp.f32 %v1881_v41 }
 0x67b   :  { %v5864_v28 = vpop.eup %5863  ;;  %v2117_v51 = vpop.f32.mrf.mxu0 }
 0x67c   :  { %v1911_v16 = vmul.f32 %v5864_v28, %v7498_v17  ;;  %v1878_v49 = vpop.xlane.xlu2 %1877 }
 0x67d   :  { %5867 = vrcp.f32 %v1878_v49 }
 0x67e   :  { %v1927_v29 = vpack.c.bf16 %v1911_v16, %v1911_v16 }
 0x67f   :  { %v2848_v31 = vpop.permute.xlu1 %2847  ;;  %v5866_v26 = vpop.eup %5865 }
 0x680   :  { %5429 = vmatmul.msk.bf16.vlgmr.msrb.gmra.mxu1 %vm461_vm5, %v1927_v29  ;;  %v1913_v36 = vmul.f32 %v5866_v26, %v7510_v48  ;;  %v2435_v48 = vsel %vm461_vm5, %v7534_v4, 0  ;;  %v2412_v26 = vsel %vm461_vm5, %v7582_v62, 0  ;;  %v2481_v4 = vsel %vm461_vm5, %v7575_v54, 0 }
 0x681   :  { %2398 = vmatpush.bf16.xpose.msrb.mxu1 %v2389_v24  ;;  %v7633_v8 = vpop.f32.mrf.mxu3  ;;  %v2527_v62 = vsel %vm461_vm5, %v7595_v40, 0  ;;  %v2619_v40 = vsel %vm461_vm5, %v7586_v59, 0 }
 0x682   :  { %v7635_v60 = vpop.f32.mrf.mxu2  ;;  %v1929_v51 = vpack.c.bf16 %v1913_v36, %v1913_v36 }
 0x683   :  { %v5868_v41 = vpop.eup %5867  ;;  %v7639_v49 = vpop.f32.mrf.mxu1 }
 0x684   :  { %8986 = vst [vmem:[#allocation4_spill] sm:$0xff] %v7639_v49  ;;  %v1912_v28 = vmul.f32 %v5868_v41, %v7513_v15  ;;  %5431 = vmatmul.msk.bf16.vlgmr.msra.gmra.mxu3 %vm461_vm5, %v1929_v51  ;;  %v2890_v59 = vpop.permute.xlu2 %2889 }
 0x685   :  { %2444 = vmatpush.bf16.xpose.msra.mxu3 %v2435_v48 }
 0x686   :  { %v1928_v16 = vpack.c.bf16 %v1912_v28, %v1912_v28  ;;  %v2504_v28 = vsel %vm461_vm5, %v7564_v50, 0  ;;  %v2853_v50 = vsel %vm1038_vm6, %v2848_v31, 0 }
 0x687   :  { %v2911_v29 = vpop.permute.xlu1 %2910 }
 0x688   :  { %v2916_v24 = vsel %vm1038_vm6, %v2911_v29, 0  ;;  %5430 = vmatmul.msk.bf16.vlgmr.msrb.gmra.mxu2 %vm461_vm5, %v1928_v16 }
 0x689   :  { %2421 = vmatpush.bf16.xpose.msrb.mxu2 %v2412_v26  ;;  %v2096_v15 = vpop.f32.mrf.mxu3  ;;  %2925 = vmatpush.bf16.msra.mxu0 %v2916_v24 }
 0x68a   :  { %v2075_v36 = vpop.f32.mrf.mxu2 }
 0x68b   :  { %v2138_v41 = vpop.f32.mrf.mxu1 }
 0x68c   :  { %v2932_v16 = vpop.permute.xlu2 %2931 }
 0x68d   :  { %v2937_v29 = vsel %vm1038_vm6, %v2932_v16, 0 }
 0x68f   :  { %v2974_v24 = vpop.permute.xlu1 %2973 }
 0x690   :  { %5433 = vmatmul.msk.bf16.vlgmr.msra.gmra.mxu1 %vm461_vm5, %v7466_v1  ;;  %v2573_v1 = vsel %vm461_vm5, %v7608_v53, 0  ;;  %v2869_v53 = vpop.permute.xlu0 %2868  ;;  %v2979_v15 = vsel %vm1038_vm6, %v2974_v24, 0 }
 0x691   :  { %2490 = vmatpush.bf16.xpose.msra.mxu1 %v2481_v4  ;;  %v2874_v31 = vsel %vm1038_vm6, %v2869_v53, 0 }
 0x692   :  { %v7655_v51 = vpop.f32.mrf.mxu2 }
 0x693   :  { %8987 = vst [vmem:[#allocation21_spill] sm:$0xff] %v7655_v51 }
 0x694   :  { %5435 = vmatmul.msk.bf16.vlgmr.msrb.gmra.mxu3 %vm461_vm5, %v7532_v37  ;;  %v2596_v37 = vsel %vm461_vm5, %v7599_v9, 0 }
 0x695   :  { %2536 = vmatpush.bf16.xpose.msrb.mxu3 %v2527_v62 }
 0x698   :  { %5434 = vmatmul.msk.bf16.vlgmr.msra.gmra.mxu2 %vm461_vm5, %v7338_v56 }
 0x699   :  { %2513 = vmatpush.bf16.xpose.msra.mxu2 %v2504_v28 }
 0x69a   :  { %v2159_v54 = vpop.f32.mrf.mxu2 }
 0x6a0   :  { %5437 = vmatmul.msk.bf16.vlgmr.msrb.gmra.mxu1 %vm461_vm5, %v7561_v35 }
 0x6a1   :  { %2582 = vmatpush.bf16.xpose.msrb.mxu1 %v2573_v1 }
 0x6a4   :  { %5439 = vmatmul.msk.bf16.vlgmr.msra.gmra.mxu3 %vm461_vm5, %v7550_v34  ;;  %v2895_v34 = vsel %vm1038_vm6, %v2890_v59, 0 }
 0x6a5   :  { %2628 = vmatpush.bf16.xpose.msra.mxu3 %v2619_v40 }
 0x6a8   :  { %5438 = vmatmul.msk.bf16.vlgmr.msrb.gmra.mxu2 %vm461_vm5, %v7546_v7  ;;  %v7677_v56 = vpop.f32.mrf.mxu0 }
 0x6a9   :  { %8988 = vst [vmem:[#allocation22_spill] sm:$0xff] %v7677_v56  ;;  %2605 = vmatpush.bf16.xpose.msrb.mxu2 %v2596_v37 }
 0x6b0   :  { %5441 = vmatmul.msk.bf16.vlgmr.msra.gmra.mxu1 %vm461_vm5, %v7610_v32  ;;  %v2201_v35 = vpop.f32.mrf.mxu0 }
 0x6b1   :  { %2862 = vmatpush.bf16.msra.mxu1 %v2853_v50 }
 0x6b4   :  { %5443 = vmatmul.msk.bf16.vlgmr.msrb.gmra.mxu3 %vm461_vm5, %v7589_v13 }
 0x6b5   :  { %2904 = vmatpush.bf16.msrb.mxu3 %v2895_v34 }
 0x6b6   :  { %v7685_v9 = vpop.f32.mrf.mxu3 }
 0x6b7   :  { %8989 = vst [vmem:[#allocation23_spill] sm:$0xff] %v7685_v9 }
 0x6b8   :  { %5442 = vmatmul.msk.bf16.vlgmr.msra.gmra.mxu2 %vm461_vm5, %v7603_v6  ;;  %v7692_v32 = vpop.f32.mrf.mxu0  ;;  %v2953_v6 = vpop.permute.xlu0 %2952 }
 0x6b9   :  { %2883 = vmatpush.bf16.msra.mxu2 %v2874_v31  ;;  %v2634_v48 = vsel %vm461_vm5, %v7692_v32, -inf  ;;  %v2958_v36 = vsel %vm1038_vm6, %v2953_v6, 0 }
 0x6ba   :  { %2635 = vmax.xlane.f32.xlu1 %v2634_v48 }
 0x6be   :  { %v2180_v13 = vpop.f32.mrf.mxu3 }
 0x6c0   :  { %5445 = vmatmul.msk.bf16.vlgmr.msrb.gmra.mxu1 %vm461_vm5, %v7606_v5  ;;  %v2287_v26 = vpop.f32.mrf.mxu0 }
 0x6c1   :  { %2946 = vmatpush.bf16.msrb.mxu1 %v2937_v29 }
 0x6c4   :  { %5447 = vmatmul.msk.bf16.vlgmr.msra.gmra.mxu3 %vm461_vm5, %v7626_v10 }
 0x6c5   :  { %2988 = vmatpush.bf16.msra.mxu3 %v2979_v15 }
 0x6c8   :  { %5446 = vmatmul.msk.bf16.vlgmr.msrb.gmra.mxu2 %vm461_vm5, %v7597_v27 }
 0x6c9   :  { %2967 = vmatpush.bf16.msrb.mxu2 %v2958_v36 }
 0x6cd   :  { %v7705_v41 = vpop.f32.mrf.mxu0 }
 0x6ce   :  { %v2646_v31 = vsel %vm461_vm5, %v7705_v41, -inf }
 0x6d5   :  { %v2379_v4 = vpop.f32.mrf.mxu0 }
 0x6d6   :  { %v7737_v4 = vpop.permute.xlu1 %3015 }
 0x6dd   :  { %v7707_v5 = vpop.f32.mrf.mxu0 }
 0x6de   :  { %v2658_v36 = vsel %vm461_vm5, %v7707_v5, -inf }
 0x6e5   :  { %v2471_v62 = vpop.f32.mrf.mxu0 }
 0x6f5   :  { %v7709_v28 = vpop.f32.mrf.mxu0 }
 0x6fd   :  { %v7711_v54 = vpop.f32.mrf.mxu1  ;;  %v2563_v1 = vpop.f32.mrf.mxu0 }
 0x6fe   :  { %8990 = vst [vmem:[#allocation24_spill] sm:$0xff] %v7711_v54 }
 0x705   :  { %v2222_v40 = vpop.f32.mrf.mxu1 }
 0x707   :  { %v7713_v10 = vpop.f32.mrf.mxu3 }
 0x708   :  { %8991 = vst [vmem:[#allocation25_spill] sm:$0xff] %v7713_v10 }
 0x70b   :  { %v7715_v37 = vpop.f32.mrf.mxu2 }
 0x70c   :  { %8992 = vst [vmem:[#allocation26_spill] sm:$0xff] %v7715_v37 }
 0x70d   :  { %v7719_v50 = vpop.f32.mrf.mxu1 }
 0x70e   :  { %v2637_v35 = vsel %vm461_vm5, %v7719_v50, -inf }
 0x70f   :  { %2638 = vmax.xlane.f32.xlu0 %v2637_v35  ;;  %v2264_v59 = vpop.f32.mrf.mxu3 }
 0x713   :  { %v2243_v34 = vpop.f32.mrf.mxu2 }
 0x715   :  { %v2310_v53 = vpop.f32.mrf.mxu1 }
 0x717   :  { %2647 = vmax.xlane.f32.xlu0 %v2646_v31  ;;  %v7725_v48 = vpop.f32.mrf.mxu3  ;;  %v7751_v31 = vpop.permute.xlu1 %3078 }
 0x718   :  { %v2643_v16 = vsel %vm461_vm5, %v7725_v48, -inf }
 0x719   :  { %2644 = vmax.xlane.f32.xlu1 %v2643_v16 }
 0x71b   :  { %v7729_v13 = vpop.f32.mrf.mxu2 }
 0x71c   :  { %v2640_v59 = vsel %vm461_vm5, %v7729_v13, -inf }
 0x71d   :  { %v7731_v29 = vpop.f32.mrf.mxu1 }
 0x71e   :  { %v2649_v26 = vsel %vm461_vm5, %v7731_v29, -inf }
 0x71f   :  { %2650 = vmax.xlane.f32.xlu2 %v2649_v26  ;;  %v2356_v24 = vpop.f32.mrf.mxu3 }
 0x720   :  { %v2670_v24 = vsel %vm461_vm5, %v7709_v28, -inf }
 0x723   :  { %v2333_v15 = vpop.f32.mrf.mxu2 }
 0x725   :  { %v2402_v6 = vpop.f32.mrf.mxu1 }
 0x727   :  { %2659 = vmax.xlane.f32.xlu2 %v2658_v36  ;;  %v7739_v62 = vpop.f32.mrf.mxu3 }
 0x728   :  { %v2655_v1 = vsel %vm461_vm5, %v7739_v62, -inf }
 0x729   :  { %2656 = vmax.xlane.f32.xlu0 %v2655_v1 }
 0x72b   :  { %v7743_v40 = vpop.f32.mrf.mxu2 }
 0x72d   :  { %v7745_v35 = vpop.f32.mrf.mxu1  ;;  %v2636_v36 = vpop.xlane.xlu1 %2635 }
 0x72e   :  { %v2661_v34 = vsel %vm461_vm5, %v7745_v35, -inf }
 0x72f   :  { %2641 = vmax.xlane.f32.xlu2 %v2640_v59  ;;  %2662 = vmax.xlane.f32.xlu1 %v2661_v34  ;;  %v2448_v53 = vpop.f32.mrf.mxu3  ;;  %v2682_v59 = vsub.f32 %v7692_v32, %v2636_v36 }
 0x730   :  { %v2652_v53 = vsel %vm461_vm5, %v7743_v40, -inf }
 0x733   :  { %v2425_v16 = vpop.f32.mrf.mxu2 }
 0x735   :  { %v2494_v26 = vpop.f32.mrf.mxu1 }
 0x737   :  { %2671 = vmax.xlane.f32.xlu1 %v2670_v24  ;;  %v7755_v15 = vpop.f32.mrf.mxu3  ;;  %v2698_v24 = vmul.f32 1.442695, %v2682_v59 }
 0x738   :  { %v2667_v6 = vsel %vm461_vm5, %v7755_v15, -inf }
 0x739   :  { %2668 = vmax.xlane.f32.xlu2 %v2667_v6  ;;  %5869 = vpow2.f32 %v2698_v24  ;;  %v7786_v24 = vpop.permute.xlu2 %3036 }
 0x73b   :  { %v7759_v1 = vpop.f32.mrf.mxu2 }
 0x73c   :  { %v2664_v6 = vsel %vm461_vm5, %v7759_v1, -inf }
 0x73d   :  { %v7762_v34 = vpop.f32.mrf.mxu1 }
 0x73e   :  { %v2673_v16 = vsel %vm461_vm5, %v7762_v34, -inf }
 0x73f   :  { %2653 = vmax.xlane.f32.xlu1 %v2652_v53  ;;  %2674 = vmax.xlane.f32.xlu0 %v2673_v16  ;;  %v2540_v26 = vpop.f32.mrf.mxu3  ;;  %v7774_v11 = vpop.eup %5869 }
 0x740   :  { %v7782_v16 = vpop.permute.xlu0 %2994 }
 0x743   :  { %v2517_v27 = vpop.f32.mrf.mxu2 }
 0x745   :  { %v2586_v7 = vpop.f32.mrf.mxu1 }
 0x746   :  { %v2730_v7 = vsel %vm461_vm5, %v7774_v11, 0.0 }
 0x747   :  { %2665 = vmax.xlane.f32.xlu0 %v2664_v6  ;;  %v7770_v32 = vpop.f32.mrf.mxu3 }
 0x748   :  { %v2679_v36 = vsel %vm461_vm5, %v7770_v32, -inf  ;;  %v7784_v26 = vpop.permute.xlu0 %3057 }
 0x749   :  { %2680 = vmax.xlane.f32.xlu1 %v2679_v36  ;;  %v7790_v36 = vpop.permute.xlu2 %3099 }
 0x74b   :  { %v7776_v17 = vpop.f32.mrf.mxu2 }
 0x74c   :  { %v2676_v59 = vsel %vm461_vm5, %v7776_v17, -inf }
 0x74d   :  { %2677 = vmax.xlane.f32.xlu2 %v2676_v59 }
 0x74f   :  { %2731 = vadd.xlane.f32.xlu0 %v2730_v7  ;;  %v2632_v27 = vpop.f32.mrf.mxu3 }
 0x750   :  { %v7788_v6 = vpop.permute.xlu0 %3120 }
 0x751   :  { %v7793_v46 = vpop.permute.xlu2 %3141 }
 0x753   :  { %v2609_v53 = vpop.f32.mrf.mxu2 }
 0x782   :  { %v2639_v44 = vpop.xlane.xlu0 %2638 }
 0x783   :  { %v2683_v63 = vsub.f32 %v7719_v50, %v2639_v44 }
 0x785   :  { %v2700_v59 = vmul.f32 1.442695, %v2683_v63 }
 0x787   :  { %5871 = vpow2.f32 %v2700_v59 }
 0x78a   :  { %v2648_v7 = vpop.xlane.xlu0 %2647 }
 0x78b   :  { %v2686_v27 = vsub.f32 %v7705_v41, %v2648_v7 }
 0x78d   :  { %v7796_v53 = vpop.eup %5871  ;;  %v2706_v58 = vmul.f32 1.442695, %v2686_v27 }
 0x78e   :  { %v2733_v39 = vsel %vm461_vm5, %v7796_v53, 0.0 }
 0x78f   :  { %5873 = vpow2.f32 %v2706_v58  ;;  %2734 = vadd.xlane.f32.xlu2 %v2733_v39 }
 0x792   :  { %v2651_v37 = vpop.xlane.xlu2 %2650 }
 0x793   :  { %v2687_v10 = vsub.f32 %v7731_v29, %v2651_v37 }
 0x795   :  { %v7801_v54 = vpop.eup %5873  ;;  %v2708_v63 = vmul.f32 1.442695, %v2687_v10 }
 0x796   :  { %v2742_v44 = vsel %vm461_vm5, %v7801_v54, 0.0 }
 0x797   :  { %5875 = vpow2.f32 %v2708_v63  ;;  %2743 = vadd.xlane.f32.xlu0 %v2742_v44  ;;  %v2645_v63 = vpop.xlane.xlu1 %2644 }
 0x79a   :  { %v2660_v41 = vpop.xlane.xlu2 %2659 }
 0x79b   :  { %v2690_v50 = vsub.f32 %v7707_v5, %v2660_v41 }
 0x79c   :  { %v2657_v5 = vpop.xlane.xlu0 %2656 }
 0x79d   :  { %v7806_v59 = vpop.eup %5875  ;;  %v2714_v7 = vmul.f32 1.442695, %v2690_v50 }
 0x79e   :  { %v2745_v39 = vsel %vm461_vm5, %v7806_v59, 0.0 }
 0x79f   :  { %5877 = vpow2.f32 %v2714_v7  ;;  %2746 = vadd.xlane.f32.xlu1 %v2745_v39 }
 0x7a2   :  { %v2642_v58 = vpop.xlane.xlu2 %2641 }
 0x7a3   :  { %v2684_v37 = vsub.f32 %v7729_v13, %v2642_v58  ;;  %v2663_v13 = vpop.xlane.xlu1 %2662 }
 0x7a4   :  { %v2691_v58 = vsub.f32 %v7745_v35, %v2663_v13  ;;  %v3000_v35 = vsel %vm1038_vm6, %v7782_v16, 0 }
 0x7a5   :  { %v7811_v10 = vpop.eup %5877  ;;  %v2702_v29 = vmul.f32 1.442695, %v2684_v37 }
 0x7a6   :  { %v2754_v27 = vsel %vm461_vm5, %v7811_v10, 0.0  ;;  %v2716_v37 = vmul.f32 1.442695, %v2691_v58 }
 0x7a7   :  { %5879 = vpow2.f32 %v2702_v29  ;;  %3210 = vrot.lane.b32.xlu2 %v6549_v30, %s6118_s22  ;;  %2755 = vadd.xlane.f32.xlu0 %v2754_v27 }
 0x7ab   :  { %v2672_v7 = vpop.xlane.xlu1 %2671 }
 0x7ad   :  { %v7817_v44 = vpop.eup %5879 }
 0x7ae   :  { %v2736_v41 = vsel %vm461_vm5, %v7817_v44, 0.0 }
 0x7af   :  { %2737 = vadd.xlane.f32.xlu1 %v2736_v41 }
 0x7b2   :  { %v2675_v50 = vpop.xlane.xlu0 %2674 }
 0x7b3   :  { %v2654_v56 = vpop.xlane.xlu1 %2653 }
 0x7b4   :  { %v2688_v27 = vsub.f32 %v7743_v40, %v2654_v56  ;;  %v2685_v40 = vsub.f32 %v7725_v48, %v2645_v63 }
 0x7b6   :  { %v2710_v41 = vmul.f32 1.442695, %v2688_v27  ;;  %v2704_v58 = vmul.f32 1.442695, %v2685_v40 }
 0x7ba   :  { %v2666_v39 = vpop.xlane.xlu0 %2665 }
 0x7bb   :  { %3187 = vrot.lane.b32.xlu0 %v6563_v33, %s6118_s22  ;;  %v2692_v27 = vsub.f32 %v7759_v1, %v2666_v39 }
 0x7c2   :  { %v2732_v29 = vpop.xlane.xlu0 %2731 }
 0x7c3   :  { %5881 = vrcp.f32 %v2732_v29 }
 0x7c4   :  { %5883 = vpow2.f32 %v2716_v37  ;;  %v2689_v37 = vsub.f32 %v7739_v62, %v2657_v5  ;;  %v2669_v5 = vpop.xlane.xlu2 %2668 }
 0x7c5   :  { %5885 = vpow2.f32 %v2710_v41 }
 0x7c6   :  { %5887 = vpow2.f32 %v2704_v58  ;;  %v2712_v63 = vmul.f32 1.442695, %v2689_v37  ;;  %v3021_v37 = vsel %vm1038_vm6, %v7737_v4, 0  ;;  %v2693_v4 = vsub.f32 %v7755_v15, %v2669_v5 }
 0x7c8   :  { %3164 = vrot.lane.b32.xlu1 %v6540_v23, %s6118_s22 }
 0x7c9   :  { %v5882_v51 = vpop.eup %5881 }
 0x7ca   :  { %v2794_v9 = vmul.f32 %v5882_v51, %v7774_v11  ;;  %v7828_v3 = vpop.eup %5883  ;;  %v2694_v51 = vsub.f32 %v7709_v28, %v2672_v7  ;;  %v2718_v28 = vmul.f32 1.442695, %v2692_v27  ;;  %v3084_v27 = vsel %vm1038_vm6, %v7751_v31, 0 }
 0x7cb   :  { %v2757_v56 = vsel %vm461_vm5, %v7828_v3, 0.0  ;;  %v7836_v13 = vpop.eup %5885  ;;  %v3105_v31 = vsel %vm1038_vm6, %v7790_v36, 0 }
 0x7cc   :  { %v2810_v49 = vpack.c.bf16 %v2794_v9, %v2794_v9  ;;  %v2748_v11 = vsel %vm461_vm5, %v7836_v13, 0.0  ;;  %v2722_v9 = vmul.f32 1.442695, %v2694_v51  ;;  %v7842_v16 = vpop.eup %5887 }
 0x7cd   :  { %v2739_v48 = vsel %vm461_vm5, %v7842_v16, 0.0 }
 0x7ce   :  { %5448 = vmatmul.msk.bf16.vlgmr.msrb.gmra.mxu0 %vm461_vm5, %v2810_v49  ;;  %v2695_v49 = vsub.f32 %v7762_v34, %v2675_v50  ;;  %5889 = vpow2.f32 %v2722_v9 }
 0x7cf   :  { %3009 = vmatpush.bf16.msrb.mxu0 %v3000_v35 }
 0x7d0   :  { %2758 = vadd.xlane.f32.xlu2 %v2757_v56  ;;  %v2724_v29 = vmul.f32 1.442695, %v2695_v49  ;;  %v2678_v56 = vpop.xlane.xlu2 %2677 }
 0x7d1   :  { %v2696_v15 = vsub.f32 %v7776_v17, %v2678_v56 }
 0x7d2   :  { %5891 = vpow2.f32 %v2724_v29 }
 0x7d3   :  { %5893 = vpow2.f32 %v2712_v63 }
 0x7d4   :  { %v7848_v41 = vpop.eup %5889  ;;  %5895 = vpow2.f32 %v2718_v28 }
 0x7d5   :  { %v2766_v34 = vsel %vm461_vm5, %v7848_v41, 0.0 }
 0x7d8   :  { %2749 = vadd.xlane.f32.xlu2 %v2748_v11  ;;  %v7852_v50 = vpop.eup %5891  ;;  %v2681_v11 = vpop.xlane.xlu1 %2680 }
 0x7d9   :  { %v7856_v62 = vpop.eup %5893  ;;  %v2769_v1 = vsel %vm461_vm5, %v7852_v50, 0.0 }
 0x7da   :  { %v2751_v7 = vsel %vm461_vm5, %v7856_v62, 0.0  ;;  %v7862_v39 = vpop.eup %5895 }
 0x7db   :  { %v2760_v35 = vsel %vm461_vm5, %v7862_v39, 0.0 }
 0x7e5   :  { %2740 = vadd.xlane.f32.xlu0 %v2739_v48 }
 0x7ed   :  { %2767 = vadd.xlane.f32.xlu0 %v2766_v34 }
 0x7f0   :  { %3185 = vrot.lane.b32.xlu2 %v6563_v33, %s6119_s23 }
 0x7f2   :  { %2770 = vadd.xlane.f32.xlu1 %v2769_v1  ;;  %v2720_v1 = vmul.f32 1.442695, %v2693_v4 }
 0x7f5   :  { %2752 = vadd.xlane.f32.xlu0 %v2751_v7 }
 0x7f8   :  { %3256 = vrot.lane.b32.xlu2 %v6592_v55, %s6118_s22 }
 0x7fa   :  { %2761 = vadd.xlane.f32.xlu1 %v2760_v35 }
 0x800   :  { %3325 = vrot.lane.b32.xlu2 %v6621_v61, %s6118_s22 }
 0x802   :  { %v2735_v40 = vpop.xlane.xlu2 %2734 }
 0x803   :  { %5897 = vrcp.f32 %v2735_v40  ;;  %v2726_v40 = vmul.f32 1.442695, %v2696_v15 }
 0x809   :  { %v5898_v58 = vpop.eup %5897  ;;  %3162 = vrot.lane.b32.xlu0 %v6540_v23, %s6119_s23 }
 0x80a   :  { %v2795_v51 = vmul.f32 %v5898_v58, %v7796_v53  ;;  %v2744_v9 = vpop.xlane.xlu0 %2743 }
 0x80b   :  { %5899 = vrcp.f32 %v2744_v9 }
 0x80c   :  { %v2811_v49 = vpack.c.bf16 %v2795_v51, %v2795_v51 }
 0x80e   :  { %5449 = vmatmul.msk.bf16.vlgmr.msra.gmra.mxu1 %vm461_vm5, %v2811_v49  ;;  %v3042_v49 = vsel %vm1038_vm6, %v7786_v24, 0 }
 0x80f   :  { %3030 = vmatpush.bf16.msra.mxu1 %v3021_v37 }
 0x811   :  { %v5900_v29 = vpop.eup %5899  ;;  %3231 = vrot.lane.b32.xlu0 %v6590_v14, %s6119_s23 }
 0x812   :  { %v2798_v48 = vmul.f32 %v5900_v29, %v7801_v54  ;;  %v2747_v63 = vpop.xlane.xlu1 %2746  ;;  %v2697_v29 = vsub.f32 %v7770_v32, %v2681_v11 }
 0x813   :  { %5901 = vrcp.f32 %v2747_v63  ;;  %3233 = vrot.lane.b32.xlu1 %v6590_v14, %s6118_s22  ;;  %v7915_v63 = vpop.permute.xlu2 %3210 }
 0x814   :  { %v2814_v53 = vpack.c.bf16 %v2798_v48, %v2798_v48 }
 0x816   :  { %5452 = vmatmul.msk.bf16.vlgmr.msra.gmra.mxu0 %vm461_vm5, %v2814_v53 }
 0x817   :  { %3093 = vmatpush.bf16.msra.mxu0 %v3084_v27 }
 0x819   :  { %v5902_v28 = vpop.eup %5901  ;;  %3302 = vrot.lane.b32.xlu0 %v6607_v57, %s6118_s22 }
 0x81a   :  { %v2799_v54 = vmul.f32 %v5902_v28, %v7806_v59  ;;  %v2756_v34 = vpop.xlane.xlu0 %2755 }
 0x81b   :  { %5903 = vrcp.f32 %v2756_v34  ;;  %3208 = vrot.lane.b32.xlu1 %v6549_v30, %s6119_s23 }
 0x81c   :  { %v2815_v7 = vpack.c.bf16 %v2799_v54, %v2799_v54  ;;  %5905 = vpow2.f32 %v2720_v1 }
 0x81e   :  { %5453 = vmatmul.msk.bf16.vlgmr.msrb.gmra.mxu1 %vm461_vm5, %v2815_v7 }
 0x81f   :  { %3114 = vmatpush.bf16.msrb.mxu1 %v3105_v31 }
 0x821   :  { %v5904_v5 = vpop.eup %5903 }
 0x822   :  { %v2802_v35 = vmul.f32 %v5904_v5, %v7811_v10  ;;  %v2738_v59 = vpop.xlane.xlu1 %2737  ;;  %v7897_v51 = vpop.eup %5905 }
 0x823   :  { %5907 = vrcp.f32 %v2738_v59  ;;  %3279 = vrot.lane.b32.xlu1 %v6619_v47, %s6118_s22  ;;  %v2763_v36 = vsel %vm461_vm5, %v7897_v51, 0.0 }
 0x824   :  { %v2818_v58 = vpack.c.bf16 %v2802_v35, %v2802_v35  ;;  %5909 = vpow2.f32 %v2726_v40  ;;  %v3126_v35 = vsel %vm1038_vm6, %v7788_v6, 0 }
 0x826   :  { %5456 = vmatmul.msk.bf16.vlgmr.msrb.gmra.mxu0 %vm461_vm5, %v2818_v58 }
 0x829   :  { %v5908_v17 = vpop.eup %5907  ;;  %2764 = vadd.xlane.f32.xlu2 %v2763_v36 }
 0x82a   :  { %v2796_v56 = vmul.f32 %v5908_v17, %v7817_v44  ;;  %v7905_v9 = vpop.eup %5909  ;;  %v2728_v44 = vmul.f32 1.442695, %v2697_v29  ;;  %v3063_v17 = vsel %vm1038_vm6, %v7784_v26, 0 }
 0x82b   :  { %3254 = vrot.lane.b32.xlu1 %v6592_v55, %s6119_s23  ;;  %v2772_v37 = vsel %vm461_vm5, %v7905_v9, 0.0 }
 0x82c   :  { %v2812_v10 = vpack.c.bf16 %v2796_v56, %v2796_v56  ;;  %5911 = vpow2.f32 %v2728_v44 }
 0x82d   :  { %v3188_v34 = vpop.permute.xlu0 %3187 }
 0x82e   :  { %5450 = vmatmul.msk.bf16.vlgmr.msra.gmra.mxu2 %vm461_vm5, %v2812_v10  ;;  %v3193_v7 = vsel %vm461_vm5, %v3188_v34, 0 }
 0x82f   :  { %3051 = vmatpush.bf16.msra.mxu2 %v3042_v49 }
 0x831   :  { %2773 = vadd.xlane.f32.xlu2 %v2772_v37 }
 0x832   :  { %v7920_v24 = vpop.eup %5911 }
 0x833   :  { %3323 = vrot.lane.b32.xlu1 %v6621_v61, %s6119_s23  ;;  %v2775_v32 = vsel %vm461_vm5, %v7920_v24, 0.0 }
 0x83a   :  { %v3165_v48 = vpop.permute.xlu1 %3164 }
 0x83b   :  { %v3170_v53 = vsel %vm461_vm5, %v3165_v48, 0  ;;  %3394 = vrot.lane.b32.xlu1 %v6648_v43, %s6118_s22 }
 0x83c   :  { %3179 = vmatpush.bf16.xpose.msrb.mxu0 %v3170_v53 }
 0x843   :  { %v2759_v11 = vpop.xlane.xlu2 %2758  ;;  %2776 = vadd.xlane.f32.xlu0 %v2775_v32  ;;  %3369 = vrot.lane.b32.xlu1 %v6646_v18, %s6119_s23 }
 0x844   :  { %5913 = vrcp.f32 %v2759_v11  ;;  %v3147_v11 = vsel %vm1038_vm6, %v7793_v46, 0 }
 0x849   :  { %3300 = vrot.lane.b32.xlu2 %v6607_v57, %s6119_s23 }
 0x84a   :  { %v5914_v27 = vpop.eup %5913 }
 0x84b   :  { %v2803_v4 = vmul.f32 %v5914_v27, %v7828_v3  ;;  %v2750_v28 = vpop.xlane.xlu2 %2749  ;;  %3440 = vrot.lane.b32.xlu1 %v6558_v45, %s6118_s22  ;;  %v7931_v54 = vpop.f32.mrf.mxu0 }
 0x84c   :  { %5915 = vrcp.f32 %v2750_v28 }
 0x84d   :  { %v2819_v1 = vpack.c.bf16 %v2803_v4, %v2803_v4 }
 0x84f   :  { %5457 = vmatmul.msk.bf16.vlgmr.msra.gmra.mxu1 %vm461_vm5, %v2819_v1 }
 0x850   :  { %3202 = vmatpush.bf16.xpose.msra.mxu1 %v3193_v7 }
 0x851   :  { %3371 = vrot.lane.b32.xlu2 %v6646_v18, %s6118_s22 }
 0x852   :  { %v5916_v31 = vpop.eup %5915 }
 0x853   :  { %v2800_v3 = vmul.f32 %v5916_v31, %v7836_v13  ;;  %3509 = vrot.lane.b32.xlu1 %v6596_v42, %s6118_s22  ;;  %v2845_v15 = vpop.f32.mrf.mxu0  ;;  %v3186_v40 = vpop.permute.xlu2 %3185 }
 0x855   :  { %v2816_v5 = vpack.c.bf16 %v2800_v3, %v2800_v3 }
 0x857   :  { %5454 = vmatmul.msk.bf16.vlgmr.msrb.gmra.mxu2 %vm461_vm5, %v2816_v5  ;;  %3277 = vrot.lane.b32.xlu0 %v6619_v47, %s6119_s23 }
 0x858   :  { %3135 = vmatpush.bf16.msrb.mxu2 %v3126_v35  ;;  %v2741_v59 = vpop.xlane.xlu0 %2740 }
 0x859   :  { %5917 = vrcp.f32 %v2741_v59  ;;  %3346 = vrot.lane.b32.xlu2 %v6632_v25, %s6119_s23 }
 0x85b   :  { %3484 = vrot.lane.b32.xlu1 %v6579_v52, %s6119_s23  ;;  %v3257_v37 = vpop.permute.xlu2 %3256 }
 0x85c   :  { %v3262_v29 = vsel %vm461_vm5, %v3257_v37, 0 }
 0x85f   :  { %v5918_v13 = vpop.eup %5917  ;;  %3348 = vrot.lane.b32.xlu0 %v6632_v25, %s6118_s22 }
 0x860   :  { %v2797_v6 = vmul.f32 %v5918_v13, %v7842_v16  ;;  %v2768_v58 = vpop.xlane.xlu0 %2767 }
 0x861   :  { %5919 = vrcp.f32 %v2768_v58  ;;  %3415 = vrot.lane.b32.xlu2 %v6695_v0, %s6119_s23 }
 0x862   :  { %v2813_v36 = vpack.c.bf16 %v2797_v6, %v2797_v6 }
 0x863   :  { %3722 = vrot.lane.b32.xlu1 %v6540_v23, %s6120_s24  ;;  %v3326_v34 = vpop.permute.xlu2 %3325 }
 0x864   :  { %5451 = vmatmul.msk.bf16.vlgmr.msrb.gmra.mxu3 %vm461_vm5, %v2813_v36 }
 0x865   :  { %3072 = vmatpush.bf16.msrb.mxu3 %v3063_v17  ;;  %v2771_v56 = vpop.xlane.xlu1 %2770 }
 0x866   :  { %5921 = vrcp.f32 %v2771_v56 }
 0x867   :  { %v5920_v10 = vpop.eup %5919  ;;  %3417 = vrot.lane.b32.xlu0 %v6695_v0, %s6118_s22 }
 0x868   :  { %v2806_v16 = vmul.f32 %v5920_v10, %v7848_v41  ;;  %v2753_v49 = vpop.xlane.xlu0 %2752 }
 0x869   :  { %5923 = vrcp.f32 %v2753_v49  ;;  %3486 = vrot.lane.b32.xlu2 %v6579_v52, %s6118_s22 }
 0x86a   :  { %v2822_v23 = vpack.c.bf16 %v2806_v16, %v2806_v16 }
 0x86b   :  { %3764 = vrot.lane.b32.xlu1 %v6549_v30, %s6120_s24 }
 0x86c   :  { %v5922_v26 = vpop.eup %5921  ;;  %5460 = vmatmul.msk.bf16.vlgmr.msra.gmra.mxu0 %vm461_vm5, %v2822_v23 }
 0x86d   :  { %v2807_v44 = vmul.f32 %v5922_v26, %v7852_v50  ;;  %3271 = vmatpush.bf16.xpose.msra.mxu0 %v3262_v29  ;;  %v2762_v48 = vpop.xlane.xlu1 %2761 }
 0x86e   :  { %5925 = vrcp.f32 %v2762_v48 }
 0x86f   :  { %v5924_v41 = vpop.eup %5923  ;;  %v2823_v53 = vpack.c.bf16 %v2807_v44, %v2807_v44  ;;  %3392 = vrot.lane.b32.xlu0 %v6648_v43, %s6119_s23 }
 0x870   :  { %v2801_v32 = vmul.f32 %v5924_v41, %v7856_v62  ;;  %v3216_v62 = vsel %vm461_vm5, %v7915_v63, 0 }
 0x871   :  { %3461 = vrot.lane.b32.xlu2 %v6577_v12, %s6119_s23  ;;  %5461 = vmatmul.msk.bf16.vlgmr.msrb.gmra.mxu1 %vm461_vm5, %v2823_v53 }
 0x872   :  { %v2817_v30 = vpack.c.bf16 %v2801_v32, %v2801_v32 }
 0x873   :  { %3806 = vrot.lane.b32.xlu1 %v6592_v55, %s6120_s24 }
 0x874   :  { %v5926_v50 = vpop.eup %5925  ;;  %5455 = vmatmul.msk.bf16.vlgmr.msra.gmra.mxu3 %vm461_vm5, %v2817_v30 }
 0x875   :  { %v2804_v27 = vmul.f32 %v5926_v50, %v7862_v39  ;;  %3156 = vmatpush.bf16.msra.mxu3 %v3147_v11 }
 0x877   :  { %v2820_v4 = vpack.c.bf16 %v2804_v27, %v2804_v27  ;;  %3463 = vrot.lane.b32.xlu0 %v6577_v12, %s6118_s22 }
 0x879   :  { %3785 = vrot.lane.b32.xlu2 %v6590_v14, %s6120_s24  ;;  %5458 = vmatmul.msk.bf16.vlgmr.msra.gmra.mxu2 %vm461_vm5, %v2820_v4  ;;  %v3331_v4 = vsel %vm461_vm5, %v3326_v34, 0 }
 0x87a   :  { %3225 = vmatpush.bf16.xpose.msra.mxu2 %v3216_v62 }
 0x87b   :  { %v3163_v55 = vpop.permute.xlu0 %3162 }
 0x87c   :  { %5464 = vmatmul.msk.bf16.vlgmr.msrb.gmra.mxu0 %vm461_vm5, %v3163_v55 }
 0x87f   :  { %3438 = vrot.lane.b32.xlu0 %v6558_v45, %s6119_s23 }
 0x881   :  { %3848 = vrot.lane.b32.xlu2 %v6607_v57, %s6120_s24  ;;  %5465 = vmatmul.msk.bf16.vlgmr.msra.gmra.mxu1 %vm461_vm5, %v3186_v40 }
 0x883   :  { %v3232_v5 = vpop.permute.xlu0 %3231 }
 0x885   :  { %v3234_v46 = vpop.permute.xlu1 %3233 }
 0x886   :  { %v3239_v36 = vsel %vm461_vm5, %v3234_v46, 0 }
 0x887   :  { %3507 = vrot.lane.b32.xlu0 %v6596_v42, %s6119_s23 }
 0x889   :  { %3869 = vrot.lane.b32.xlu2 %v6621_v61, %s6120_s24 }
 0x88b   :  { %v7998_v14 = vpop.f32.mrf.mxu1  ;;  %v3303_v49 = vpop.permute.xlu0 %3302 }
 0x88c   :  { %v5590_v39 = vpack.i.bf16 %v7998_v14, %v7931_v54  ;;  %v8994_v54 = vpack.i.bf16 %v7612_v19, %v7614_v21 }
 0x88d   :  { %v3209_v63 = vpop.permute.xlu1 %3208 }
 0x88f   :  { %3743 = vrot.lane.b32.xlu0 %v6563_v33, %s6120_s24 }
 0x893   :  { %v2866_v28 = vpop.f32.mrf.mxu1  ;;  %v8004_v57 = vpop.f32.mrf.mxu0 }
 0x895   :  { %v3280_v1 = vpop.permute.xlu1 %3279 }
 0x896   :  { %v3285_v7 = vsel %vm461_vm5, %v3280_v1, 0 }
 0x897   :  { %3827 = vrot.lane.b32.xlu0 %v6619_v47, %s6120_s24  ;;  %3294 = vmatpush.bf16.xpose.msrb.mxu1 %v3285_v7 }
 0x89b   :  { %v2929_v61 = vpop.f32.mrf.mxu0  ;;  %v8009_v31 = vpop.f32.mrf.mxu1 }
 0x89c   :  { %v5620_v3 = vpack.i.bf16 %v8009_v31, %v8004_v57  ;;  %v2765_v15 = vpop.xlane.xlu2 %2764 }
 0x89d   :  { %5927 = vrcp.f32 %v2765_v15  ;;  %v3255_v33 = vpop.permute.xlu1 %3254 }
 0x89e   :  { %5468 = vmatmul.msk.bf16.vlgmr.msra.gmra.mxu0 %vm461_vm5, %v3255_v33 }
 0x8a3   :  { %v5928_v35 = vpop.eup %5927  ;;  %v2950_v59 = vpop.f32.mrf.mxu1 }
 0x8a4   :  { %v8014_v13 = vpop.f32.mrf.mxu0  ;;  %v2805_v40 = vmul.f32 %v5928_v35, %v7897_v51  ;;  %v2774_v47 = vpop.xlane.xlu2 %2773  ;;  %v3308_v51 = vsel %vm461_vm5, %v3303_v49, 0 }
 0x8a5   :  { %5929 = vrcp.f32 %v2774_v47  ;;  %v8017_v6 = vpop.permute.xlu1 %3323 }
 0x8a6   :  { %v2821_v58 = vpack.c.bf16 %v2805_v40, %v2805_v40 }
 0x8a8   :  { %5459 = vmatmul.msk.bf16.vlgmr.msrb.gmra.mxu3 %vm461_vm5, %v2821_v58 }
 0x8a9   :  { %3248 = vmatpush.bf16.xpose.msrb.mxu3 %v3239_v36 }
 0x8ab   :  { %v5930_v17 = vpop.eup %5929 }
 0x8ac   :  { %v3013_v56 = vpop.f32.mrf.mxu0  ;;  %v2808_v10 = vmul.f32 %v5930_v17, %v7905_v9  ;;  %v3301_v16 = vpop.permute.xlu2 %3300 }
 0x8ad   :  { %v3395_v37 = vpop.permute.xlu1 %3394 }
 0x8ae   :  { %v2824_v23 = vpack.c.bf16 %v2808_v10, %v2808_v10  ;;  %v3400_v11 = vsel %vm461_vm5, %v3395_v37, 0 }
 0x8b0   :  { %5462 = vmatmul.msk.bf16.vlgmr.msrb.gmra.mxu2 %vm461_vm5, %v2824_v23 }
 0x8b1   :  { %3317 = vmatpush.bf16.xpose.msrb.mxu2 %v3308_v51  ;;  %v8024_v26 = vpop.f32.mrf.mxu2 }
 0x8b4   :  { %v3372_v29 = vpop.permute.xlu2 %3371 }
 0x8b5   :  { %v3377_v44 = vsel %vm461_vm5, %v3372_v29, 0  ;;  %v3370_v48 = vpop.permute.xlu1 %3369 }
 0x8b6   :  { %3386 = vmatpush.bf16.xpose.msra.mxu1 %v3377_v44  ;;  %v2777_v41 = vpop.xlane.xlu0 %2776 }
 0x8b7   :  { %5931 = vrcp.f32 %v2777_v41 }
 0x8b9   :  { %v2887_v53 = vpop.f32.mrf.mxu2 }
 0x8bc   :  { %v3347_v9 = vpop.permute.xlu2 %3346 }
 0x8bd   :  { %v5932_v32 = vpop.eup %5931  ;;  %v3441_v30 = vpop.permute.xlu1 %3440 }
 0x8be   :  { %v2809_v50 = vmul.f32 %v5932_v32, %v7920_v24  ;;  %v3446_v15 = vsel %vm461_vm5, %v3441_v30, 0 }
 0x8c0   :  { %v2825_v27 = vpack.c.bf16 %v2809_v50, %v2809_v50  ;;  %5466 = vmatmul.msk.bf16.vlgmr.msra.gmra.mxu2 %vm461_vm5, %v3209_v63 }
 0x8c1   :  { %3409 = vmatpush.bf16.xpose.msra.mxu2 %v3400_v11 }
 0x8c2   :  { %5463 = vmatmul.msk.bf16.vlgmr.msra.gmra.mxu3 %vm461_vm5, %v2825_v27 }
 0x8c3   :  { %3340 = vmatpush.bf16.xpose.msra.mxu3 %v3331_v4 }
 0x8c4   :  { %v3416_v62 = vpop.permute.xlu2 %3415 }
 0x8c5   :  { %v3510_v55 = vpop.permute.xlu1 %3509 }
 0x8c6   :  { %v3515_v56 = vsel %vm461_vm5, %v3510_v55, 0 }
 0x8c9   :  { %v3278_v46 = vpop.permute.xlu0 %3277 }
 0x8ca   :  { %5469 = vmatmul.msk.bf16.vlgmr.msrb.gmra.mxu1 %vm461_vm5, %v3278_v46 }
 0x8cc   :  { %v8033_v28 = vpop.f32.mrf.mxu1  ;;  %v3487_v1 = vpop.permute.xlu2 %3486 }
 0x8cd   :  { %v3485_v7 = vpop.permute.xlu1 %3484  ;;  %v3492_v63 = vsel %vm461_vm5, %v3487_v1, 0 }
 0x8d0   :  { %5470 = vmatmul.msk.bf16.vlgmr.msrb.gmra.mxu2 %vm461_vm5, %v3301_v16 }
 0x8d1   :  { %3501 = vmatpush.bf16.xpose.msrb.mxu2 %v3492_v63  ;;  %v3349_v34 = vpop.permute.xlu0 %3348 }
 0x8d2   :  { %v3354_v61 = vsel %vm461_vm5, %v3349_v34, 0  ;;  %5467 = vmatmul.msk.bf16.vlgmr.msrb.gmra.mxu3 %vm461_vm5, %v3232_v5 }
 0x8d3   :  { %3363 = vmatpush.bf16.xpose.msrb.mxu0 %v3354_v61 }
 0x8d4   :  { %v3034_v33 = vpop.f32.mrf.mxu1  ;;  %v3462_v5 = vpop.permute.xlu2 %3461 }
 0x8d5   :  { %v3723_v35 = vpop.permute.xlu1 %3722 }
 0x8d6   :  { %v3728_v40 = vsel %vm1038_vm6, %v3723_v35, 0 }
 0x8d9   :  { %v3418_v59 = vpop.permute.xlu0 %3417 }
 0x8da   :  { %v3423_v47 = vsel %vm461_vm5, %v3418_v59, 0  ;;  %v8044_v58 = vpop.f32.mrf.mxu2  ;;  %5472 = vmatmul.msk.bf16.vlgmr.msrb.gmra.mxu0 %vm461_vm5, %v3347_v9  ;;  %5473 = vmatmul.msk.bf16.vlgmr.msra.gmra.mxu1 %vm461_vm5, %v3370_v48 }
 0x8db   :  { %3455 = vmatpush.bf16.xpose.msra.mxu0 %v3446_v15  ;;  %3432 = vmatpush.bf16.xpose.msrb.mxu3 %v3423_v47 }
 0x8dc   :  { %v3786_v49 = vpop.permute.xlu2 %3785 }
 0x8dd   :  { %v3765_v36 = vpop.permute.xlu1 %3764  ;;  %v3791_v50 = vsel %vm1038_vm6, %v3786_v49, 0 }
 0x8de   :  { %v3770_v10 = vsel %vm1038_vm6, %v3765_v36, 0 }
 0x8e1   :  { %v3393_v17 = vpop.permute.xlu0 %3392 }
 0x8e2   :  { %v2971_v16 = vpop.f32.mrf.mxu2  ;;  %5471 = vmatmul.msk.bf16.vlgmr.msra.gmra.mxu3 %vm461_vm5, %v8017_v6  ;;  %5474 = vmatmul.msk.bf16.vlgmr.msra.gmra.mxu2 %vm461_vm5, %v3393_v17 }
 0x8e3   :  { %3737 = vmatpush.bf16.msrb.mxu0 %v3728_v40  ;;  %3524 = vmatpush.bf16.xpose.msra.mxu3 %v3515_v56 }
 0x8e4   :  { %3779 = vmatpush.bf16.msra.mxu2 %v3770_v10  ;;  %v3849_v53 = vpop.permute.xlu2 %3848 }
 0x8e5   :  { %v3807_v9 = vpop.permute.xlu1 %3806  ;;  %v3854_v27 = vsel %vm1038_vm6, %v3849_v53, 0 }
 0x8e6   :  { %v3812_v11 = vsel %vm1038_vm6, %v3807_v9, 0 }
 0x8e7   :  { %v8053_v37 = vpop.f32.mrf.mxu3 }
 0x8e8   :  { %v5605_v23 = vpack.i.bf16 %v8053_v37, %v8024_v26 }
 0x8e9   :  { %v8057_v51 = vpop.f32.mrf.mxu0  ;;  %v3464_v29 = vpop.permute.xlu0 %3463 }
 0x8ea   :  { %v3469_v44 = vsel %vm461_vm5, %v3464_v29, 0 }
 0x8eb   :  { %3478 = vmatpush.bf16.xpose.msrb.mxu1 %v3469_v44 }
 0x8ec   :  { %v3870_v61 = vpop.permute.xlu2 %3869 }
 0x8ed   :  { %v3875_v40 = vsel %vm1038_vm6, %v3870_v61, 0 }
 0x8ee   :  { %v8060_v48 = vpop.f32.mrf.mxu1 }
 0x8ef   :  { %v2908_v41 = vpop.f32.mrf.mxu3 }
 0x8f1   :  { %v3097_v32 = vpop.f32.mrf.mxu0  ;;  %v3439_v30 = vpop.permute.xlu0 %3438 }
 0x8f2   :  { %5475 = vmatmul.msk.bf16.vlgmr.msrb.gmra.mxu3 %vm461_vm5, %v3416_v62  ;;  %5476 = vmatmul.msk.bf16.vlgmr.msra.gmra.mxu0 %vm461_vm5, %v3439_v30 }
 0x8f3   :  { %5477 = vmatmul.msk.bf16.vlgmr.msrb.gmra.mxu1 %vm461_vm5, %v3462_v5  ;;  %5478 = vmatmul.msk.bf16.vlgmr.msrb.gmra.mxu2 %vm461_vm5, %v3485_v7 }
 0x8f4   :  { %3800 = vmatpush.bf16.msrb.mxu3 %v3791_v50  ;;  %3821 = vmatpush.bf16.msra.mxu0 %v3812_v11 }
 0x8f5   :  { %3863 = vmatpush.bf16.msrb.mxu2 %v3854_v27 }
 0x8f6   :  { %v3118_v4 = vpop.f32.mrf.mxu1 }
 0x8f7   :  { %v8071_v55 = vpop.f32.mrf.mxu3 }
 0x8f9   :  { %v8075_v46 = vpop.f32.mrf.mxu0  ;;  %v3508_v1 = vpop.permute.xlu0 %3507 }
 0x8fa   :  { %v3530_v63 = vsel %vm461_vm5, %v8075_v46, -inf }
 0x8fb   :  { %3531 = vmax.xlane.f32.xlu2 %v3530_v63 }
 0x8fc   :  { %v8079_v34 = vpop.f32.mrf.mxu2 }
 0x8fe   :  { %v8081_v7 = vpop.f32.mrf.mxu1 }
 0x8ff   :  { %v2992_v15 = vpop.f32.mrf.mxu3  ;;  %v3533_v33 = vsel %vm461_vm5, %v8081_v7, -inf }
 0x900   :  { %3534 = vmax.xlane.f32.xlu1 %v3533_v33 }
 0x901   :  { %v3183_v35 = vpop.f32.mrf.mxu0  ;;  %v3744_v59 = vpop.permute.xlu0 %3743 }
 0x902   :  { %v3749_v47 = vsel %vm1038_vm6, %v3744_v59, 0  ;;  %5479 = vmatmul.msk.bf16.vlgmr.msra.gmra.mxu3 %vm461_vm5, %v3508_v1 }
 0x903   :  { %3884 = vmatpush.bf16.msra.mxu3 %v3875_v40  ;;  %3758 = vmatpush.bf16.msra.mxu1 %v3749_v47 }
 0x904   :  { %v3055_v5 = vpop.f32.mrf.mxu2 }
 0x906   :  { %v3206_v36 = vpop.f32.mrf.mxu1 }
 0x909   :  { %v3828_v17 = vpop.permute.xlu0 %3827 }
 0x90a   :  { %v3833_v56 = vsel %vm1038_vm6, %v3828_v17, 0 }
 0x90b   :  { %3842 = vmatpush.bf16.msrb.mxu1 %v3833_v56 }
 0x91b   :  { %v8089_v10 = vpop.f32.mrf.mxu0 }
 0x91c   :  { %v3542_v16 = vsel %vm461_vm5, %v8089_v10, -inf }
 0x91d   :  { %3543 = vmax.xlane.f32.xlu1 %v3542_v16 }
 0x923   :  { %v3275_v49 = vpop.f32.mrf.mxu0 }
 0x92b   :  { %v8093_v29 = vpop.f32.mrf.mxu3 }
 0x933   :  { %v3076_v41 = vpop.f32.mrf.mxu3  ;;  %v8097_v53 = vpop.f32.mrf.mxu2 }
 0x93b   :  { %v3139_v9 = vpop.f32.mrf.mxu2 }
 0x943   :  { %v8099_v32 = vpop.f32.mrf.mxu2 }
 0x944   :  { %v3536_v16 = vsel %vm461_vm5, %v8099_v32, -inf }
 0x945   :  { %v8101_v30 = vpop.f32.mrf.mxu3 }
 0x947   :  { %v8105_v11 = vpop.f32.mrf.mxu1 }
 0x948   :  { %v3545_v27 = vsel %vm461_vm5, %v8105_v11, -inf }
 0x949   :  { %3546 = vmax.xlane.f32.xlu0 %v3545_v27 }
 0x94b   :  { %v3229_v4 = vpop.f32.mrf.mxu2 }
 0x94d   :  { %v3160_v1 = vpop.f32.mrf.mxu3 }
 0x94f   :  { %v3298_v63 = vpop.f32.mrf.mxu1 }
 0x953   :  { %v8109_v61 = vpop.f32.mrf.mxu2 }
 0x954   :  { %v3548_v9 = vsel %vm461_vm5, %v8109_v61, -inf }
 0x955   :  { %v8111_v15 = vpop.f32.mrf.mxu3 }
 0x956   :  { %v3539_v33 = vsel %vm461_vm5, %v8111_v15, -inf }
 0x957   :  { %3540 = vmax.xlane.f32.xlu2 %v3539_v33  ;;  %v8115_v35 = vpop.f32.mrf.mxu0  ;;  %v8117_v59 = vpop.f32.mrf.mxu1 }
 0x958   :  { %v3554_v40 = vsel %vm461_vm5, %v8115_v35, -inf  ;;  %v3557_v36 = vsel %vm461_vm5, %v8117_v59, -inf }
 0x959   :  { %3555 = vmax.xlane.f32.xlu0 %v3554_v40 }
 0x95b   :  { %v3321_v47 = vpop.f32.mrf.mxu2 }
 0x95d   :  { %v3252_v5 = vpop.f32.mrf.mxu3 }
 0x95f   :  { %3558 = vmax.xlane.f32.xlu2 %v3557_v36  ;;  %v3367_v17 = vpop.f32.mrf.mxu0  ;;  %v3390_v56 = vpop.f32.mrf.mxu1 }
 0x961   :  { %3537 = vmax.xlane.f32.xlu0 %v3536_v16 }
 0x965   :  { %v8125_v49 = vpop.f32.mrf.mxu3  ;;  %v8127_v41 = vpop.f32.mrf.mxu2 }
 0x966   :  { %v3551_v17 = vsel %vm461_vm5, %v8125_v49, -inf }
 0x967   :  { %3549 = vmax.xlane.f32.xlu2 %v3548_v9 }
 0x96d   :  { %v3344_v27 = vpop.f32.mrf.mxu3  ;;  %v3413_v4 = vpop.f32.mrf.mxu2 }
 0x96e   :  { %v3532_v4 = vpop.xlane.xlu2 %3531 }
 0x96f   :  { %v8131_v1 = vpop.f32.mrf.mxu0 }
 0x970   :  { %v8133_v63 = vpop.f32.mrf.mxu1  ;;  %v3566_v33 = vsel %vm461_vm5, %v8131_v1, -inf }
 0x971   :  { %3567 = vmax.xlane.f32.xlu1 %v3566_v33  ;;  %v3578_v33 = vsub.f32 %v8075_v46, %v3532_v4  ;;  %v3569_v46 = vsel %vm461_vm5, %v8133_v63, -inf }
 0x975   :  { %3911 = vrot.lane.b32.xlu0 %v6646_v18, %s6120_s24  ;;  %v8139_v40 = vpop.f32.mrf.mxu3  ;;  %v3535_v18 = vpop.xlane.xlu1 %3534 }
 0x976   :  { %v8141_v47 = vpop.f32.mrf.mxu2 }
 0x977   :  { %v3459_v5 = vpop.f32.mrf.mxu0 }
 0x978   :  { %v3482_v36 = vpop.f32.mrf.mxu1  ;;  %v3594_v5 = vmul.f32 1.442695, %v3578_v33 }
 0x979   :  { %3552 = vmax.xlane.f32.xlu1 %v3551_v17 }
 0x97a   :  { %5933 = vpow2.f32 %v3594_v5  ;;  %v3563_v5 = vsel %vm461_vm5, %v8139_v40, -inf }
 0x97d   :  { %v3436_v56 = vpop.f32.mrf.mxu3 }
 0x97e   :  { %v3505_v16 = vpop.f32.mrf.mxu2  ;;  %v3572_v56 = vsel %vm461_vm5, %v8141_v47, -inf }
 0x97f   :  { %3932 = vrot.lane.b32.xlu2 %v6648_v43, %s6120_s24 }
 0x980   :  { %v8155_v16 = vpop.eup %5933 }
 0x985   :  { %v8147_v9 = vpop.f32.mrf.mxu3 }
 0x98d   :  { %v3528_v27 = vpop.f32.mrf.mxu3 }
 0x98e   :  { %v3579_v27 = vsub.f32 %v8081_v7, %v3535_v18 }
 0x990   :  { %v3544_v36 = vpop.xlane.xlu1 %3543  ;;  %v3596_v4 = vmul.f32 1.442695, %v3579_v27  ;;  %v3575_v27 = vsel %vm461_vm5, %v8147_v9, -inf }
 0x991   :  { %v3582_v17 = vsub.f32 %v8089_v10, %v3544_v36  ;;  %v3560_v36 = vsel %vm461_vm5, %v8127_v41, -inf }
 0x992   :  { %3890 = vrot.lane.b32.xlu1 %v6632_v25, %s6120_s24  ;;  %v3626_v25 = vsel %vm461_vm5, %v8155_v16, 0.0 }
 0x993   :  { %v3602_v43 = vmul.f32 1.442695, %v3582_v17 }
 0x995   :  { %5935 = vpow2.f32 %v3602_v43 }
 0x996   :  { %5937 = vpow2.f32 %v3596_v4 }
 0x99b   :  { %v8162_v10 = vpop.eup %5935 }
 0x99c   :  { %v3638_v33 = vsel %vm461_vm5, %v8162_v10, 0.0  ;;  %v8168_v7 = vpop.eup %5937 }
 0x99d   :  { %v3629_v18 = vsel %vm461_vm5, %v8168_v7, 0.0 }
 0x99f   :  { %3573 = vmax.xlane.f32.xlu0 %v3572_v56 }
 0x9a7   :  { %3627 = vadd.xlane.f32.xlu0 %v3626_v25 }
 0x9a8   :  { %3570 = vmax.xlane.f32.xlu2 %v3569_v46 }
 0x9af   :  { %3639 = vadd.xlane.f32.xlu0 %v3638_v33 }
 0x9b0   :  { %3564 = vmax.xlane.f32.xlu2 %v3563_v5 }
 0x9b8   :  { %3630 = vadd.xlane.f32.xlu2 %v3629_v18 }
 0x9bc   :  { %3561 = vmax.xlane.f32.xlu1 %v3560_v36  ;;  %v3547_v17 = vpop.xlane.xlu0 %3546 }
 0x9bd   :  { %v3583_v56 = vsub.f32 %v8105_v11, %v3547_v17 }
 0x9bf   :  { %v3604_v43 = vmul.f32 1.442695, %v3583_v56 }
 0x9c1   :  { %5939 = vpow2.f32 %v3604_v43 }
 0x9c4   :  { %3576 = vmax.xlane.f32.xlu1 %v3575_v27 }
 0x9c7   :  { %v8177_v25 = vpop.eup %5939 }
 0x9c8   :  { %v3641_v46 = vsel %vm461_vm5, %v8177_v25, 0.0 }
 0x9c9   :  { %3642 = vadd.xlane.f32.xlu0 %v3641_v46 }
 0x9ca   :  { %v3541_v4 = vpop.xlane.xlu2 %3540 }
 0x9cb   :  { %v3581_v50 = vsub.f32 %v8111_v15, %v3541_v4 }
 0x9cc   :  { %v3556_v33 = vpop.xlane.xlu0 %3555 }
 0x9cd   :  { %v3586_v5 = vsub.f32 %v8115_v35, %v3556_v33  ;;  %v3600_v35 = vmul.f32 1.442695, %v3581_v50 }
 0x9cf   :  { %v3610_v18 = vmul.f32 1.442695, %v3586_v5 }
 0x9d1   :  { %5941 = vpow2.f32 %v3610_v18 }
 0x9d2   :  { %v3559_v36 = vpop.xlane.xlu2 %3558 }
 0x9d3   :  { %v3587_v11 = vsub.f32 %v8117_v59, %v3559_v36 }
 0x9d4   :  { %v3538_v17 = vpop.xlane.xlu0 %3537 }
 0x9d5   :  { %v3612_v56 = vmul.f32 1.442695, %v3587_v11  ;;  %v3580_v43 = vsub.f32 %v8099_v32, %v3538_v17 }
 0x9d7   :  { %v8184_v27 = vpop.eup %5941  ;;  %5943 = vpow2.f32 %v3612_v56  ;;  %v3598_v6 = vmul.f32 1.442695, %v3580_v43 }
 0x9d8   :  { %v3650_v46 = vsel %vm461_vm5, %v8184_v27, 0.0 }
 0x9d9   :  { %5945 = vpow2.f32 %v3598_v6  ;;  %3651 = vadd.xlane.f32.xlu2 %v3650_v46 }
 0x9da   :  { %v3550_v33 = vpop.xlane.xlu2 %3549  ;;  %5947 = vpow2.f32 %v3600_v35 }
 0x9db   :  { %v3584_v32 = vsub.f32 %v8109_v61, %v3550_v33 }
 0x9dd   :  { %v8189_v5 = vpop.eup %5943  ;;  %v3606_v4 = vmul.f32 1.442695, %v3584_v32 }
 0x9de   :  { %v3653_v59 = vsel %vm461_vm5, %v8189_v5, 0.0 }
 0x9df   :  { %v8193_v18 = vpop.eup %5945  ;;  %3654 = vadd.xlane.f32.xlu0 %v3653_v59  ;;  %5949 = vpow2.f32 %v3606_v4 }
 0x9e0   :  { %v3632_v15 = vsel %vm461_vm5, %v8193_v18, 0.0  ;;  %v8198_v36 = vpop.eup %5947 }
 0x9e1   :  { %3633 = vadd.xlane.f32.xlu2 %v3632_v15  ;;  %v3635_v50 = vsel %vm461_vm5, %v8198_v36, 0.0 }
 0x9e2   :  { %v8215_v59 = vpop.permute.xlu2 %3932 }
 0x9e4   :  { %v3568_v6 = vpop.xlane.xlu1 %3567 }
 0x9e5   :  { %v8202_v17 = vpop.eup %5949 }
 0x9e6   :  { %v3644_v43 = vsel %vm461_vm5, %v8202_v17, 0.0 }
 0x9e7   :  { %v3912_v33 = vpop.permute.xlu0 %3911 }
 0x9e9   :  { %3636 = vadd.xlane.f32.xlu2 %v3635_v50 }
 0x9ec   :  { %v3553_v11 = vpop.xlane.xlu1 %3552 }
 0x9ed   :  { %v3585_v56 = vsub.f32 %v8125_v49, %v3553_v11  ;;  %v3590_v11 = vsub.f32 %v8131_v1, %v3568_v6 }
 0x9ef   :  { %v3608_v61 = vmul.f32 1.442695, %v3585_v56 }
 0x9f1   :  { %5951 = vpow2.f32 %v3608_v61  ;;  %3645 = vadd.xlane.f32.xlu2 %v3644_v43 }
 0x9f7   :  { %v8207_v46 = vpop.eup %5951 }
 0x9f8   :  { %v3647_v35 = vsel %vm461_vm5, %v8207_v46, 0.0 }
 0x9f9   :  { %3648 = vadd.xlane.f32.xlu0 %v3647_v35  ;;  %v3618_v35 = vmul.f32 1.442695, %v3590_v11 }
 0xa09   :  { %3953 = vrot.lane.b32.xlu2 %v6695_v0, %s6120_s24  ;;  %v3891_v0 = vpop.permute.xlu1 %3890 }
 0xa0d   :  { %3974 = vrot.lane.b32.xlu0 %v6558_v45, %s6120_s24 }
 0xa12   :  { %v3574_v49 = vpop.xlane.xlu0 %3573 }
 0xa1a   :  { %v3628_v32 = vpop.xlane.xlu0 %3627 }
 0xa1b   :  { %5953 = vrcp.f32 %v3628_v32  ;;  %v3571_v15 = vpop.xlane.xlu2 %3570  ;;  %v3896_v32 = vsel %vm1038_vm6, %v3891_v0, 0 }
 0xa1c   :  { %v3591_v4 = vsub.f32 %v8133_v63, %v3571_v15  ;;  %v3592_v15 = vsub.f32 %v8141_v47, %v3574_v49 }
 0xa1e   :  { %v3620_v50 = vmul.f32 1.442695, %v3591_v4  ;;  %v3622_v11 = vmul.f32 1.442695, %v3592_v15  ;;  %v8993_v15 = vpack.i.bf16 %v7591_v38, %v7538_v22 }
 0xa20   :  { %5955 = vpow2.f32 %v3620_v50 }
 0xa21   :  { %v5954_v56 = vpop.eup %5953 }
 0xa22   :  { %v3690_v61 = vmul.f32 %v5954_v56, %v8155_v16  ;;  %v3640_v45 = vpop.xlane.xlu0 %3639 }
 0xa23   :  { %v3565_v43 = vpop.xlane.xlu2 %3564  ;;  %5957 = vrcp.f32 %v3640_v45 }
 0xa24   :  { %v3706_v44 = vpack.c.bf16 %v3690_v61, %v3690_v61  ;;  %v3589_v24 = vsub.f32 %v8139_v40, %v3565_v43  ;;  %5959 = vpow2.f32 %v3618_v35 }
 0xa26   :  { %v8221_v62 = vpop.eup %5955  ;;  %5480 = vmatmul.msk.bf16.vlgmr.msrb.gmra.mxu0 %vm461_vm5, %v3706_v44  ;;  %v3616_v63 = vmul.f32 1.442695, %v3589_v24 }
 0xa27   :  { %3905 = vmatpush.bf16.msrb.mxu0 %v3896_v32  ;;  %v3665_v1 = vsel %vm461_vm5, %v8221_v62, 0.0 }
 0xa28   :  { %3666 = vadd.xlane.f32.xlu1 %v3665_v1 }
 0xa29   :  { %v5958_v6 = vpop.eup %5957 }
 0xa2a   :  { %v8228_v40 = vpop.eup %5959  ;;  %v3694_v50 = vmul.f32 %v5958_v6, %v8162_v10  ;;  %v3917_v10 = vsel %vm1038_vm6, %v3912_v33, 0 }
 0xa2b   :  { %v3631_v16 = vpop.xlane.xlu2 %3630  ;;  %v3662_v56 = vsel %vm461_vm5, %v8228_v40, 0.0 }
 0xa2c   :  { %5961 = vrcp.f32 %v3631_v16  ;;  %v3710_v47 = vpack.c.bf16 %v3694_v50, %v3694_v50 }
 0xa2d   :  { %5963 = vpow2.f32 %v3616_v63 }
 0xa2f   :  { %v3562_v4 = vpop.xlane.xlu1 %3561 }
 0xa30   :  { %v3588_v44 = vsub.f32 %v8127_v41, %v3562_v4 }
 0xa32   :  { %v5962_v61 = vpop.eup %5961  ;;  %v3614_v0 = vmul.f32 1.442695, %v3588_v44  ;;  %3663 = vadd.xlane.f32.xlu2 %v3662_v56 }
 0xa33   :  { %v8234_v24 = vpop.eup %5963  ;;  %v3691_v43 = vmul.f32 %v5962_v61, %v8168_v7 }
 0xa34   :  { %5965 = vpow2.f32 %v3614_v0  ;;  %v3659_v41 = vsel %vm461_vm5, %v8234_v24, 0.0 }
 0xa35   :  { %5967 = vpow2.f32 %v3622_v11  ;;  %v3707_v49 = vpack.c.bf16 %v3691_v43, %v3691_v43 }
 0xa36   :  { %5484 = vmatmul.msk.bf16.vlgmr.msra.gmra.mxu0 %vm461_vm5, %v3710_v47 }
 0xa37   :  { %5481 = vmatmul.msk.bf16.vlgmr.msra.gmra.mxu1 %vm461_vm5, %v3707_v49  ;;  %3660 = vadd.xlane.f32.xlu0 %v3659_v41 }
 0xa38   :  { %3926 = vmatpush.bf16.msra.mxu1 %v3917_v10 }
 0xa3a   :  { %v8242_v35 = vpop.eup %5965 }
 0xa3b   :  { %v8244_v45 = vpop.eup %5967  ;;  %v3656_v7 = vsel %vm461_vm5, %v8242_v35, 0.0 }
 0xa3c   :  { %3657 = vadd.xlane.f32.xlu1 %v3656_v7  ;;  %v3643_v32 = vpop.xlane.xlu0 %3642  ;;  %v3668_v1 = vsel %vm461_vm5, %v8244_v45, 0.0 }
 0xa3d   :  { %5969 = vrcp.f32 %v3643_v32 }
 0xa3f   :  { %3669 = vadd.xlane.f32.xlu0 %v3668_v1 }
 0xa43   :  { %v5970_v63 = vpop.eup %5969 }
 0xa44   :  { %v3695_v33 = vmul.f32 %v5970_v63, %v8177_v25 }
 0xa46   :  { %v3711_v16 = vpack.c.bf16 %v3695_v33, %v3695_v33 }
 0xa48   :  { %5485 = vmatmul.msk.bf16.vlgmr.msrb.gmra.mxu1 %vm461_vm5, %v3711_v16 }
 0xa4a   :  { %4016 = vrot.lane.b32.xlu2 %v6579_v52, %s6120_s24 }
 0xa4c   :  { %v3652_v6 = vpop.xlane.xlu2 %3651 }
 0xa4d   :  { %5971 = vrcp.f32 %v3652_v6 }
 0xa52   :  { %5586 = vrot.lane.b32.xlu2 %v8993_v15, %s6121_s25  ;;  %v3655_v4 = vpop.xlane.xlu0 %3654 }
 0xa53   :  { %v5972_v50 = vpop.eup %5971  ;;  %5973 = vrcp.f32 %v3655_v4  ;;  %4037 = vrot.lane.b32.xlu0 %v6596_v42, %s6120_s24 }
 0xa54   :  { %v3698_v25 = vmul.f32 %v5972_v50, %v8184_v27  ;;  %v3634_v44 = vpop.xlane.xlu2 %3633 }
 0xa55   :  { %5975 = vrcp.f32 %v3634_v44  ;;  %3995 = vrot.lane.b32.xlu1 %v6577_v12, %s6120_s24 }
 0xa56   :  { %v3714_v52 = vpack.c.bf16 %v3698_v25, %v3698_v25 }
 0xa58   :  { %5488 = vmatmul.msk.bf16.vlgmr.msrb.gmra.mxu0 %vm461_vm5, %v3714_v52 }
 0xa59   :  { %v5974_v11 = vpop.eup %5973 }
 0xa5a   :  { %v3699_v22 = vmul.f32 %v5974_v11, %v8189_v5  ;;  %5591 = vrot.lane.b32.xlu2 %v5590_v39, %s6122_s26  ;;  %v3938_v5 = vsel %vm1038_vm6, %v8215_v59, 0  ;;  %v8995_v39 = vpack.i.bf16 %v7616_v2, %v7601_v20 }
 0xa5b   :  { %v5976_v42 = vpop.eup %5975  ;;  %5606 = vrot.lane.b32.xlu0 %v5605_v23, %s6122_s26 }
 0xa5c   :  { %v3715_v38 = vpack.c.bf16 %v3699_v22, %v3699_v22  ;;  %v3692_v12 = vmul.f32 %v5976_v42, %v8193_v18  ;;  %v3637_v27 = vpop.xlane.xlu2 %3636  ;;  %v3577_v18 = vpop.xlane.xlu1 %3576 }
 0xa5d   :  { %5977 = vrcp.f32 %v3637_v27  ;;  %v3593_v21 = vsub.f32 %v8147_v9, %v3577_v18 }
 0xa5e   :  { %v3708_v56 = vpack.c.bf16 %v3692_v12, %v3692_v12  ;;  %5489 = vmatmul.msk.bf16.vlgmr.msra.gmra.mxu1 %vm461_vm5, %v3715_v38 }
 0xa5f   :  { %v3624_v2 = vmul.f32 1.442695, %v3593_v21  ;;  %v9000_v21 = vld [vmem:[#allocation23_spill] sm:$0xff] }
 0xa60   :  { %5482 = vmatmul.msk.bf16.vlgmr.msra.gmra.mxu2 %vm461_vm5, %v3708_v56 }
 0xa61   :  { %3947 = vmatpush.bf16.msra.mxu2 %v3938_v5 }
 0xa62   :  { %5601 = vrot.lane.b32.xlu2 %v8994_v54, %s6121_s25 }
 0xa63   :  { %v5978_v14 = vpop.eup %5977  ;;  %5616 = vrot.lane.b32.xlu0 %v8995_v39, %s6121_s25 }
 0xa64   :  { %v3693_v26 = vmul.f32 %v5978_v14, %v8198_v36  ;;  %v3646_v37 = vpop.xlane.xlu2 %3645 }
 0xa65   :  { %5979 = vrcp.f32 %v3646_v37 }
 0xa66   :  { %v3709_v23 = vpack.c.bf16 %v3693_v26, %v3693_v26 }
 0xa68   :  { %5483 = vmatmul.msk.bf16.vlgmr.msrb.gmra.mxu3 %vm461_vm5, %v3709_v23 }
 0xa6b   :  { %v5980_v59 = vpop.eup %5979 }
 0xa6c   :  { %v3696_v61 = vmul.f32 %v5980_v59, %v8202_v17  ;;  %v3954_v0 = vpop.permute.xlu2 %3953  ;;  %v3649_v19 = vpop.xlane.xlu0 %3648 }
 0xa6d   :  { %v3959_v43 = vsel %vm1038_vm6, %v3954_v0, 0  ;;  %5981 = vrcp.f32 %v3649_v19  ;;  %v8998_v0 = vld [vmem:[#allocation8_spill] sm:$0xff] }
 0xa6e   :  { %v3712_v20 = vpack.c.bf16 %v3696_v61, %v3696_v61  ;;  %3968 = vmatpush.bf16.msrb.mxu3 %v3959_v43  ;;  %5983 = vpow2.f32 %v3624_v2  ;;  %v8997_v61 = vld [vmem:[#allocation4_spill] sm:$0xff]  ;;  %v9001_v43 = vld [vmem:[#allocation21_spill] sm:$0xff]  ;;  %v9003_v2 = vld [vmem:[#allocation22_spill] sm:$0xff] }
 0xa6f   :  { %v8999_v19 = vpack.i.bf16 %v8997_v61, %v8998_v0 }
 0xa70   :  { %5486 = vmatmul.msk.bf16.vlgmr.msrb.gmra.mxu2 %vm461_vm5, %v3712_v20  ;;  %v9002_v20 = vpack.i.bf16 %v9000_v21, %v9001_v43 }
 0xa73   :  { %v5982_v36 = vpop.eup %5981 }
 0xa74   :  { %v3697_v47 = vmul.f32 %v5982_v36, %v8207_v46  ;;  %v8294_v17 = vpop.eup %5983  ;;  %v9004_v36 = vld [vmem:[#allocation24_spill] sm:$0xff] }
 0xa75   :  { %v3671_v9 = vsel %vm461_vm5, %v8294_v17, 0.0 }
 0xa76   :  { %v3713_v49 = vpack.c.bf16 %v3697_v47, %v3697_v47  ;;  %v5675_v47 = vpack.i.bf16 %v9004_v36, %v9003_v2  ;;  %v9015_v2 = vld [vmem:[#allocation16_spill] sm:$0xff] }
 0xa78   :  { %5487 = vmatmul.msk.bf16.vlgmr.msra.gmra.mxu3 %vm461_vm5, %v3713_v49 }
 0xa7f   :  { %3672 = vadd.xlane.f32.xlu1 %v3671_v9  ;;  %v3975_v41 = vpop.permute.xlu0 %3974 }
 0xa80   :  { %v3980_v10 = vsel %vm1038_vm6, %v3975_v41, 0 }
 0xa81   :  { %3989 = vmatpush.bf16.msra.mxu0 %v3980_v10  ;;  %v9005_v10 = vld [vmem:[#allocation25_spill] sm:$0xff] }
 0xa9b   :  { %v3667_v1 = vpop.xlane.xlu1 %3666 }
 0xaa3   :  { %v3739_v7 = vpop.f32.mrf.mxu0 }
 0xaa5   :  { %v3664_v32 = vpop.xlane.xlu2 %3663 }
 0xaa6   :  { %5985 = vrcp.f32 %v3664_v32 }
 0xaaa   :  { %v3661_v63 = vpop.xlane.xlu0 %3660 }
 0xaab   :  { %5987 = vrcp.f32 %v3661_v63  ;;  %v3741_v46 = vpop.f32.mrf.mxu0 }
 0xaac   :  { %v5986_v33 = vpop.eup %5985 }
 0xaad   :  { %v3702_v16 = vmul.f32 %v5986_v33, %v8228_v40  ;;  %v4017_v6 = vpop.permute.xlu2 %4016 }
 0xaae   :  { %v4022_v15 = vsel %vm1038_vm6, %v4017_v6, 0 }
 0xaaf   :  { %v3718_v4 = vpack.c.bf16 %v3702_v16, %v3702_v16  ;;  %v3658_v50 = vpop.xlane.xlu1 %3657  ;;  %4031 = vmatpush.bf16.msrb.mxu2 %v4022_v15 }
 0xab0   :  { %5989 = vrcp.f32 %v3658_v50 }
 0xab1   :  { %v5988_v25 = vpop.eup %5987  ;;  %5492 = vmatmul.msk.bf16.vlgmr.msra.gmra.mxu0 %vm461_vm5, %v3718_v4 }
 0xab2   :  { %v3701_v44 = vmul.f32 %v5988_v25, %v8234_v24  ;;  %v3670_v27 = vpop.xlane.xlu0 %3669  ;;  %v8996_v24 = vpack.i.bf16 %v7633_v8, %v7635_v60 }
 0xab3   :  { %v3823_v52 = vpop.f32.mrf.mxu0  ;;  %5991 = vrcp.f32 %v3670_v27 }
 0xab4   :  { %v3717_v11 = vpack.c.bf16 %v3701_v44, %v3701_v44  ;;  %v3760_v22 = vpop.f32.mrf.mxu1  ;;  %5993 = vrcp.f32 %v3667_v1 }
 0xab5   :  { %v5595_v42 = vpack.i.bf16 %v3760_v22, %v3739_v7  ;;  %v9006_v7 = vld [vmem:[#allocation26_spill] sm:$0xff] }
 0xab6   :  { %v5990_v38 = vpop.eup %5989  ;;  %5491 = vmatmul.msk.bf16.vlgmr.msrb.gmra.mxu3 %vm461_vm5, %v3717_v11  ;;  %v9007_v32 = vpack.i.bf16 %v9005_v10, %v9006_v7 }
 0xab7   :  { %v3700_v40 = vmul.f32 %v5990_v38, %v8242_v35  ;;  %5596 = vrot.lane.b32.xlu1 %v5595_v42, %s6123_s27  ;;  %v9008_v42 = vpack.i.bf16 %v8071_v55, %v8044_v58  ;;  %v5555_v38 = vld [vmem:[%s8929_s3 + $0x8] sm:$0xff]  ;;  %v5554_v58 = vld [vmem:[%s8929_s3] sm:$0xff]  ;;  %v9010_v55 = vpack.i.bf16 %v8093_v29, %v8079_v34 }
 0xab8   :  { %4354 = vmatpush.bf16.msrb.mxu0 %v5555_v38  ;;  %v9013_v29 = vld [vmem:[#allocation10_spill] sm:$0xff]  ;;  %v9018_v38 = vld [vmem:[#allocation11_spill] sm:$0xff] }
 0xab9   :  { %v3716_v12 = vpack.c.bf16 %v3700_v40, %v3700_v40  ;;  %v5992_v54 = vpop.eup %5991  ;;  %v5587_v40 = vpop.permute.xlu2 %5586 }
 0xaba   :  { %v5994_v14 = vpop.eup %5993  ;;  %v3704_v35 = vmul.f32 %v5992_v54, %v8244_v45  ;;  %v5588_v27 = vunpack.i.l.bf16 %v5587_v40  ;;  %v9014_v54 = vld [vmem:[#allocation13_spill] sm:$0xff] }
 0xabb   :  { %v3825_v56 = vpop.f32.mrf.mxu0  ;;  %5490 = vmatmul.msk.bf16.vlgmr.msra.gmra.mxu2 %vm461_vm5, %v3716_v12  ;;  %v3703_v26 = vmul.f32 %v5994_v14, %v8221_v62  ;;  %v5589_v12 = vunpack.i.h.bf16 %v5587_v40 }
 0xabc   :  { %v3762_v5 = vpop.f32.mrf.mxu1  ;;  %v3720_v60 = vpack.c.bf16 %v3704_v35, %v3704_v35  ;;  %4355 = vmatpush.bf16.msrb.mxu0 %v5554_v58 }
 0xabd   :  { %v3719_v45 = vpack.c.bf16 %v3703_v26, %v3703_v26 }
 0xabf   :  { %5631 = vrot.lane.b32.xlu1 %v8996_v24, %s6121_s25  ;;  %v4251_v24 = vsel %vm461_vm5, %v9013_v29, %v5589_v12 }
 0xac5   :  { %v3844_v39 = vpop.f32.mrf.mxu1  ;;  %v4038_v23 = vpop.permute.xlu0 %4037 }
 0xac6   :  { %v5625_v37 = vpack.i.bf16 %v3844_v39, %v3823_v52  ;;  %v4043_v18 = vsel %vm1038_vm6, %v4038_v23, 0 }
 0xac7   :  { %v3996_v59 = vpop.permute.xlu1 %3995  ;;  %5646 = vrot.lane.b32.xlu1 %v8999_v19, %s6121_s25  ;;  %4052 = vmatpush.bf16.msra.mxu3 %v4043_v18 }
 0xac8   :  { %v4001_v8 = vsel %vm1038_vm6, %v3996_v59, 0  ;;  %5626 = vrot.lane.b32.xlu0 %v5625_v37, %s6123_s27 }
 0xac9   :  { %4010 = vmatpush.bf16.msrb.mxu1 %v4001_v8 }
 0xacb   :  { %5494 = vmatmul.msk.bf16.vlgmr.msrb.gmra.mxu2 %vm461_vm5, %v3720_v60 }
 0xacc   :  { %5493 = vmatmul.msk.bf16.vlgmr.msrb.gmra.mxu1 %vm461_vm5, %v3719_v45 }
 0xacd   :  { %v3846_v62 = vpop.f32.mrf.mxu1  ;;  %v5607_v8 = vpop.permute.xlu0 %5606 }
 0xace   :  { %v5609_v62 = vunpack.i.h.bf16 %v5607_v8  ;;  %v5608_v21 = vunpack.i.l.bf16 %v5607_v8 }
 0xacf   :  { %5661 = vrot.lane.b32.xlu1 %v9002_v20, %s6121_s25 }
 0xad5   :  { %v3907_v49 = vpop.f32.mrf.mxu0 }
 0xad7   :  { %5676 = vrot.lane.b32.xlu1 %v5675_v47, %s6121_s25  ;;  %v9016_v47 = vld [vmem:[#allocation14_spill] sm:$0xff] }
 0xadb   :  { %v3928_v9 = vpop.f32.mrf.mxu1 }
 0xadc   :  { %v5655_v31 = vpack.i.bf16 %v3928_v9, %v3907_v49 }
 0xadd   :  { %v3909_v41 = vpop.f32.mrf.mxu0 }
 0xadf   :  { %5691 = vrot.lane.b32.xlu1 %v9007_v32, %s6121_s25 }
 0xae3   :  { %v3781_v1 = vpop.f32.mrf.mxu2  ;;  %v3930_v63 = vpop.f32.mrf.mxu1 }
 0xaeb   :  { %v3783_v46 = vpop.f32.mrf.mxu2  ;;  %v3802_v33 = vpop.f32.mrf.mxu3 }
 0xaec   :  { %v5610_v16 = vpack.i.bf16 %v3802_v33, %v3781_v1  ;;  %v5617_v33 = vpop.permute.xlu0 %5616 }
 0xaee   :  { %5611 = vrot.lane.b32.xlu2 %v5610_v16, %s6123_s27 }
 0xaf2   :  { %v3673_v6 = vpop.xlane.xlu1 %3672 }
 0xaf3   :  { %5995 = vrcp.f32 %v3673_v6  ;;  %v3804_v15 = vpop.f32.mrf.mxu3  ;;  %v3865_v4 = vpop.f32.mrf.mxu2 }
 0xaf6   :  { %5621 = vrot.lane.b32.xlu2 %v5620_v3, %s6122_s26  ;;  %v9009_v3 = vpack.i.bf16 %v8033_v28, %v8014_v13  ;;  %v9012_v13 = vpack.i.bf16 %v8101_v30, %v8097_v53  ;;  %v5592_v28 = vpop.permute.xlu2 %5591 }
 0xaf7   :  { %v5594_v56 = vunpack.i.h.bf16 %v5592_v28  ;;  %v5593_v5 = vunpack.i.l.bf16 %v5592_v28 }
 0xaf9   :  { %v5996_v50 = vpop.eup %5995  ;;  %v4268_v53 = vsel %vm4266_vm7, %v4251_v24, %v5594_v56 }
 0xafa   :  { %v3705_v25 = vmul.f32 %v5996_v50, %v8294_v17  ;;  %v9011_v17 = vpack.i.bf16 %v8060_v48, %v8057_v51  ;;  %v4250_v51 = vsel %vm461_vm5, %v9014_v54, %v5588_v27  ;;  %v5618_v50 = vunpack.i.l.bf16 %v5617_v33  ;;  %v9019_v54 = vld [vmem:[#allocation12_spill] sm:$0xff] }
 0xafb   :  { %v3867_v44 = vpop.f32.mrf.mxu2  ;;  %v3886_v52 = vpop.f32.mrf.mxu3  ;;  %v4267_v35 = vsel %vm4266_vm7, %v4250_v51, %v5593_v5 }
 0xafc   :  { %v3721_v11 = vpack.c.bf16 %v3705_v25, %v3705_v25  ;;  %v5640_v22 = vpack.i.bf16 %v3886_v52, %v3865_v4  ;;  %v5619_v4 = vunpack.i.h.bf16 %v5617_v33 }
 0xafe   :  { %5636 = vrot.lane.b32.xlu2 %v9008_v42, %s6122_s26  ;;  %5641 = vrot.lane.b32.xlu0 %v5640_v22, %s6123_s27  ;;  %v5602_v0 = vpop.permute.xlu2 %5601  ;;  %v9017_v22 = vld [vmem:[#allocation17_spill] sm:$0xff] }
 0xaff   :  { %5495 = vmatmul.msk.bf16.vlgmr.msra.gmra.mxu3 %vm461_vm5, %v3721_v11  ;;  %v5604_v60 = vunpack.i.h.bf16 %v5602_v0  ;;  %v5603_v45 = vunpack.i.l.bf16 %v5602_v0  ;;  %v4255_v42 = vsel %vm461_vm5, %v9017_v22, %v5619_v4 }
 0xb01   :  { %v4253_v36 = vsel %vm461_vm5, %v9015_v2, %v5604_v60  ;;  %v4252_v49 = vsel %vm461_vm5, %v9016_v47, %v5603_v45 }
 0xb02   :  { %v4270_v7 = vsel %vm4266_vm7, %v4253_v36, %v5609_v62  ;;  %v4269_v32 = vsel %vm4266_vm7, %v4252_v49, %v5608_v21  ;;  %v9021_v21 = vld [vmem:[#allocation19_spill] sm:$0xff] }
 0xb03   :  { %v3888_v57 = vpop.f32.mrf.mxu3 }
 0xb04   :  { %v4254_v57 = vsel %vm461_vm5, %v9018_v38, %v5618_v50 }
 0xb06   :  { %5651 = vrot.lane.b32.xlu2 %v9009_v3, %s6122_s26  ;;  %5656 = vrot.lane.b32.xlu0 %v5655_v31, %s6123_s27 }
 0xb0e   :  { %5666 = vrot.lane.b32.xlu2 %v9010_v55, %s6122_s26 }
 0xb16   :  { %5681 = vrot.lane.b32.xlu2 %v9011_v17, %s6122_s26 }
 0xb1e   :  { %5696 = vrot.lane.b32.xlu2 %v9012_v13, %s6122_s26 }
 0xb29   :  { %v5597_v34 = vpop.permute.xlu1 %5596 }
 0xb2a   :  { %v5599_v48 = vunpack.i.h.bf16 %v5597_v34  ;;  %v5598_v14 = vunpack.i.l.bf16 %v5597_v34 }
 0xb2c   :  { %v4285_v30 = vsel %vm4283_vm8, %v4268_v53, %v5599_v48  ;;  %v4284_v39 = vsel %vm4283_vm8, %v4267_v35, %v5598_v14  ;;  %v9020_v48 = vld [vmem:[#allocation18_spill] sm:$0xff] }
 0xb2d   :  { %v4300_v26 = vpack.c.bf16 %v4285_v30, %v4284_v39 }
 0xb2e   :  { %v3991_v37 = vpop.f32.mrf.mxu0 }
 0xb2f   :  { %5504 = vmatmul.msk.bf16.vlgmr.msrb.gmra.mxu0 %vm59_vm0, %v4300_v26 }
 0xb31   :  { %v5632_v12 = vpop.permute.xlu1 %5631 }
 0xb32   :  { %v5634_v56 = vunpack.i.h.bf16 %v5632_v12  ;;  %v5633_v5 = vunpack.i.l.bf16 %v5632_v12 }
 0xb34   :  { %v4257_v51 = vsel %vm461_vm5, %v9019_v54, %v5634_v56  ;;  %v4256_v14 = vsel %vm461_vm5, %v9020_v48, %v5633_v5 }
 0xb36   :  { %v3993_v23 = vpop.f32.mrf.mxu0 }
 0xb39   :  { %v3970_v18 = vpop.f32.mrf.mxu3 }
 0xb3a   :  { %v5627_v11 = vpop.permute.xlu0 %5626 }
 0xb3b   :  { %v5629_v55 = vunpack.i.h.bf16 %v5627_v11  ;;  %v5628_v17 = vunpack.i.l.bf16 %v5627_v11  ;;  %v9023_v11 = vld [vmem:[#allocation5_spill] sm:$0xff] }
 0xb3e   :  { %v3949_v59 = vpop.f32.mrf.mxu2 }
 0xb3f   :  { %v5670_v61 = vpack.i.bf16 %v3970_v18, %v3949_v59  ;;  %v5647_v18 = vpop.permute.xlu1 %5646 }
 0xb40   :  { %v5649_v0 = vunpack.i.h.bf16 %v5647_v18 }
 0xb41   :  { %5671 = vrot.lane.b32.xlu0 %v5670_v61, %s6123_s27  ;;  %v3972_v19 = vpop.f32.mrf.mxu3 }
 0xb42   :  { %v5648_v19 = vunpack.i.l.bf16 %v5647_v18 }
 0xb46   :  { %v3951_v43 = vpop.f32.mrf.mxu2 }
 0xb47   :  { %v4259_v43 = vsel %vm461_vm5, %v9021_v21, %v5649_v0  ;;  %v6096_v21 = vld [vmem:[%s8926_s0 + $0x18] sm:$0xff] }
 0xb48   :  { %v5612_v20 = vpop.permute.xlu2 %5611 }
 0xb49   :  { %v5614_v9 = vunpack.i.h.bf16 %v5612_v20  ;;  %v5613_v41 = vunpack.i.l.bf16 %v5612_v20  ;;  %v4012_v10 = vpop.f32.mrf.mxu1  ;;  %v9022_v20 = vld [vmem:[#allocation15_spill] sm:$0xff] }
 0xb4a   :  { %v5685_v1 = vpack.i.bf16 %v4012_v10, %v3991_v37  ;;  %v4258_v2 = vsel %vm461_vm5, %v9022_v20, %v5648_v19  ;;  %v6095_v19 = vld [vmem:[%s8926_s0 + $0x10] sm:$0xff] }
 0xb4b   :  { %v4286_v63 = vsel %vm4283_vm8, %v4269_v32, %v5613_v41  ;;  %v4287_v46 = vsel %vm4283_vm8, %v4270_v7, %v5614_v9 }
 0xb4c   :  { %v4301_v16 = vpack.c.bf16 %v4287_v46, %v4286_v63  ;;  %5686 = vrot.lane.b32.xlu0 %v5685_v1, %s6123_s27  ;;  %v5662_v63 = vpop.permute.xlu1 %5661  ;;  %v6093_v46 = vld [vmem:[%s8926_s0] sm:$0xff] }
 0xb4d   :  { %v5664_v4 = vunpack.i.h.bf16 %v5662_v63 }
 0xb4e   :  { %v4033_v6 = vpop.f32.mrf.mxu2  ;;  %5505 = vmatmul.msk.bf16.gmra.mxu0 %vm59_vm0, %v4301_v16 }
 0xb4f   :  { %v4261_v22 = vsel %vm461_vm5, %v9023_v11, %v5664_v4 }
 0xb50   :  { %v5622_v15 = vpop.permute.xlu2 %5621 }
 0xb51   :  { %v4014_v25 = vpop.f32.mrf.mxu1  ;;  %v5624_v44 = vunpack.i.h.bf16 %v5622_v15  ;;  %v5623_v52 = vunpack.i.l.bf16 %v5622_v15 }
 0xb53   :  { %v4271_v31 = vsel %vm4266_vm7, %v4254_v57, %v5623_v52  ;;  %v4272_v3 = vsel %vm4266_vm7, %v4255_v42, %v5624_v44  ;;  %v9024_v42 = vld [vmem:[#allocation7_spill] sm:$0xff] }
 0xb54   :  { %v4288_v40 = vsel %vm4283_vm8, %v4271_v31, %v5628_v17  ;;  %v4289_v13 = vsel %vm4283_vm8, %v4272_v3, %v5629_v55  ;;  %v6094_v17 = vld [vmem:[%s8926_s0 + $0x8] sm:$0xff]  ;;  %v5677_v5 = vpop.permute.xlu1 %5676 }
 0xb55   :  { %v4302_v28 = vpack.c.bf16 %v4289_v13, %v4288_v40 }
 0xb56   :  { %v4035_v58 = vpop.f32.mrf.mxu2 }
 0xb58   :  { %v5637_v27 = vpop.permute.xlu2 %5636 }
 0xb59   :  { %v5639_v34 = vunpack.i.h.bf16 %v5637_v27  ;;  %v5638_v29 = vunpack.i.l.bf16 %v5637_v27 }
 0xb5b   :  { %v4273_v30 = vsel %vm4266_vm7, %v4256_v14, %v5638_v29  ;;  %v4274_v39 = vsel %vm4266_vm7, %v4257_v51, %v5639_v34  ;;  %v5679_v29 = vunpack.i.h.bf16 %v5677_v5 }
 0xb5e   :  { %5506 = vmatmul.msk.bf16.gmra.mxu0 %vm59_vm0, %v4302_v28 }
 0xb60   :  { %v5652_v59 = vpop.permute.xlu2 %5651 }
 0xb61   :  { %v5654_v8 = vunpack.i.h.bf16 %v5652_v59  ;;  %v5653_v60 = vunpack.i.l.bf16 %v5652_v59 }
 0xb63   :  { %v4275_v36 = vsel %vm4266_vm7, %v4258_v2, %v5653_v60  ;;  %v4276_v47 = vsel %vm4266_vm7, %v4259_v43, %v5654_v8 }
 0xb68   :  { %v5667_v16 = vpop.permute.xlu2 %5666 }
 0xb69   :  { %v5669_v50 = vunpack.i.h.bf16 %v5667_v16  ;;  %v5668_v25 = vunpack.i.l.bf16 %v5667_v16 }
 0xb6b   :  { %v4278_v55 = vsel %vm4266_vm7, %v4261_v22, %v5669_v50  ;;  %v6099_v50 = vld [vmem:[%s8926_s0 + $0x30] sm:$0xff]  ;;  %v9027_v22 = vld [vmem:[#allocation6_spill] sm:$0xff] }
 0xb70   :  { %v5642_v24 = vpop.permute.xlu0 %5641  ;;  %v5682_v34 = vpop.permute.xlu2 %5681 }
 0xb71   :  { %v5644_v35 = vunpack.i.h.bf16 %v5642_v24  ;;  %v5643_v53 = vunpack.i.l.bf16 %v5642_v24  ;;  %v5678_v24 = vunpack.i.l.bf16 %v5677_v5  ;;  %v5684_v51 = vunpack.i.h.bf16 %v5682_v34  ;;  %v6100_v5 = vld [vmem:[%s8926_s0 + $0x38] sm:$0xff] }
 0xb72   :  { %v5683_v48 = vunpack.i.l.bf16 %v5682_v34 }
 0xb73   :  { %v4291_v26 = vsel %vm4283_vm8, %v4274_v39, %v5644_v35  ;;  %v4290_v37 = vsel %vm4283_vm8, %v4273_v30, %v5643_v53  ;;  %v9025_v53 = vld [vmem:[#allocation9_spill] sm:$0xff]  ;;  %v9026_v39 = vld [vmem:[#allocation20_spill] sm:$0xff] }
 0xb74   :  { %v4303_v23 = vpack.c.bf16 %v4291_v26, %v4290_v37  ;;  %v4263_v30 = vsel %vm461_vm5, %v9025_v53, %v5679_v29  ;;  %v4262_v26 = vsel %vm461_vm5, %v9026_v39, %v5678_v24 }
 0xb75   :  { %v4279_v37 = vsel %vm4266_vm7, %v4262_v26, %v5683_v48 }
 0xb76   :  { %5507 = vmatmul.msk.bf16.gmra.mxu0 %vm59_vm0, %v4303_v23  ;;  %v4280_v23 = vsel %vm4266_vm7, %v4263_v30, %v5684_v51  ;;  %v6101_v51 = vld [vmem:[%s8926_s0 + $0x40] sm:$0xff] }
 0xb77   :  { %v9029_v30 = vld [vmem:[#allocation2_spill] sm:$0xff] }
 0xb78   :  { %v5657_v61 = vpop.permute.xlu0 %5656  ;;  %v5697_v16 = vpop.permute.xlu2 %5696 }
 0xb79   :  { %v5659_v45 = vunpack.i.h.bf16 %v5657_v61  ;;  %v5658_v62 = vunpack.i.l.bf16 %v5657_v61 }
 0xb7b   :  { %v4293_v49 = vsel %vm4283_vm8, %v4276_v47, %v5659_v45  ;;  %v4292_v9 = vsel %vm4283_vm8, %v4275_v36, %v5658_v62  ;;  %v6097_v47 = vld [vmem:[%s8926_s0 + $0x20] sm:$0xff] }
 0xb7c   :  { %v4304_v7 = vpack.c.bf16 %v4293_v49, %v4292_v9 }
 0xb82   :  { %v4054_v41 = vpop.f32.mrf.mxu3 }
 0xb83   :  { %v5700_v10 = vpack.i.bf16 %v4054_v41, %v4033_v6  ;;  %v5663_v6 = vunpack.i.l.bf16 %v5662_v63 }
 0xb85   :  { %5701 = vrot.lane.b32.xlu0 %v5700_v10, %s6123_s27  ;;  %v4260_v38 = vsel %vm461_vm5, %v9024_v42, %v5663_v6 }
 0xb86   :  { %5508 = vmatmul.msk.bf16.gmra.mxu0 %vm59_vm0, %v4304_v7  ;;  %v4277_v58 = vsel %vm4266_vm7, %v4260_v38, %v5668_v25  ;;  %v6098_v7 = vld [vmem:[%s8926_s0 + $0x28] sm:$0xff] }
 0xb8a   :  { %v4056_v32 = vpop.f32.mrf.mxu3 }
 0xbac   :  { %v4357_v1 = vpop.f32.mrf.mxu0 }
 0xbad   :  { %v8419_v33 = vadd.f32 %v6093_v46, %v4357_v1  ;;  %v5692_v46 = vpop.permute.xlu1 %5691 }
 0xbae   :  { %v5693_v6 = vunpack.i.l.bf16 %v5692_v46 }
 0xbaf   :  { %v4413_v15 = vmul.f32 %v8419_v33, %v8419_v33 }
 0xbb1   :  { %v4429_v44 = vsel %vm59_vm0, %v4413_v15, 0.0  ;;  %v5694_v15 = vunpack.i.h.bf16 %v5692_v46  ;;  %v8528_v46 = vld [vmem:[%s8930_s4] ss:$0 sm:$0xff] }
 0xbb2   :  { %4430 = vadd.xlane.f32.xlu1 %v4429_v44  ;;  %v5699_v44 = vunpack.i.h.bf16 %v5697_v16 }
 0xbb3   :  { %v5672_v52 = vpop.permute.xlu0 %5671  ;;  %v4265_v42 = vsel %vm461_vm5, %v9027_v22, %v5694_v15 }
 0xbb4   :  { %v5674_v57 = vunpack.i.h.bf16 %v5672_v52  ;;  %v5673_v31 = vunpack.i.l.bf16 %v5672_v52  ;;  %v4359_v3 = vpop.f32.mrf.mxu0  ;;  %v5698_v52 = vunpack.i.l.bf16 %v5697_v16 }
 0xbb5   :  { %v8433_v40 = vadd.f32 %v6094_v17, %v4359_v3 }
 0xbb6   :  { %v4295_v13 = vsel %vm4283_vm8, %v4278_v55, %v5674_v57  ;;  %v4294_v28 = vsel %vm4283_vm8, %v4277_v58, %v5673_v31  ;;  %v9028_v57 = vld [vmem:[#allocation3_spill] sm:$0xff] }
 0xbb7   :  { %v4305_v12 = vpack.c.bf16 %v4295_v13, %v4294_v28  ;;  %v4414_v27 = vmul.f32 %v8433_v40, %v8433_v40  ;;  %v4264_v31 = vsel %vm461_vm5, %v9028_v57, %v5693_v6  ;;  %v4282_v13 = vsel %vm4266_vm7, %v4265_v42, %v5699_v44  ;;  %v6102_v42 = vld [vmem:[%s8926_s0 + $0x60] sm:$0xff] }
 0xbb8   :  { %v4281_v17 = vsel %vm4266_vm7, %v4264_v31, %v5698_v52 }
 0xbb9   :  { %5509 = vmatmul.msk.bf16.gmra.mxu0 %vm59_vm0, %v4305_v12  ;;  %v4432_v56 = vsel %vm59_vm0, %v4414_v27, 0.0 }
 0xbba   :  { %4433 = vadd.xlane.f32.xlu2 %v4432_v56 }
 0xbbe   :  { %v5687_v54 = vpop.permute.xlu0 %5686 }
 0xbbf   :  { %v5689_v14 = vunpack.i.h.bf16 %v5687_v54  ;;  %v5688_v35 = vunpack.i.l.bf16 %v5687_v54 }
 0xbc1   :  { %v4297_v18 = vsel %vm4283_vm8, %v4280_v23, %v5689_v14  ;;  %v4296_v59 = vsel %vm4283_vm8, %v4279_v37, %v5688_v35  ;;  %v5557_v37 = vld [vmem:[%s8931_s5 + $0x8] sm:$0xff] }
 0xbc2   :  { %v4306_v61 = vpack.c.bf16 %v4297_v18, %v4296_v59  ;;  %4759 = vmatpush.bf16.msra.mxu1 %v5557_v37  ;;  %5564 = vmatpush.bf16.msrb.mxu3 %v5557_v37 }
 0xbc9   :  { %5510 = vmatmul.msk.bf16.gmra.mxu0 %vm59_vm0, %v4306_v61 }
 0xbcb   :  { %v4362_v0 = vpop.f32.mrf.mxu0 }
 0xbcc   :  { %v8453_v8 = vadd.f32 %v6095_v19, %v4362_v0 }
 0xbce   :  { %v4415_v60 = vmul.f32 %v8453_v8, %v8453_v8 }
 0xbd0   :  { %v4435_v45 = vsel %vm59_vm0, %v4415_v60, 0.0 }
 0xbd1   :  { %4436 = vadd.xlane.f32.xlu0 %v4435_v45 }
 0xbd3   :  { %v4364_v62 = vpop.f32.mrf.mxu0 }
 0xbd4   :  { %v8461_v43 = vadd.f32 %v6096_v21, %v4364_v62  ;;  %v5556_v21 = vld [vmem:[%s8931_s5] sm:$0xff] }
 0xbd5   :  { %4760 = vmatpush.bf16.msra.mxu1 %v5556_v21  ;;  %5565 = vmatpush.bf16.msrb.mxu3 %v5556_v21 }
 0xbd6   :  { %v4416_v20 = vmul.f32 %v8461_v43, %v8461_v43 }
 0xbd8   :  { %v4438_v2 = vsel %vm59_vm0, %v4416_v20, 0.0 }
 0xbd9   :  { %4439 = vadd.xlane.f32.xlu1 %v4438_v2 }
 0xbdb   :  { %v4367_v36 = vpop.f32.mrf.mxu0 }
 0xbdc   :  { %v8469_v49 = vadd.f32 %v6097_v47, %v4367_v36 }
 0xbde   :  { %v4417_v9 = vmul.f32 %v8469_v49, %v8469_v49 }
 0xbe0   :  { %v4441_v41 = vsel %vm59_vm0, %v4417_v9, 0.0 }
 0xbe1   :  { %4442 = vadd.xlane.f32.xlu2 %v4441_v41 }
 0xbe3   :  { %v4369_v10 = vpop.f32.mrf.mxu0 }
 0xbe4   :  { %v8477_v32 = vadd.f32 %v6098_v7, %v4369_v10 }
 0xbe6   :  { %v4418_v1 = vmul.f32 %v8477_v32, %v8477_v32 }
 0xbe8   :  { %v4444_v63 = vsel %vm59_vm0, %v4418_v1, 0.0 }
 0xbe9   :  { %4445 = vadd.xlane.f32.xlu0 %v4444_v63 }
 0xbf3   :  { %v4372_v4 = vpop.f32.mrf.mxu0 }
 0xbf4   :  { %v8485_v25 = vadd.f32 %v6099_v50, %v4372_v4 }
 0xbf6   :  { %v4419_v11 = vmul.f32 %v8485_v25, %v8485_v25 }
 0xbf7   :  { %v5702_v38 = vpop.permute.xlu0 %5701 }
 0xbf8   :  { %v5704_v3 = vunpack.i.h.bf16 %v5702_v38  ;;  %v5703_v58 = vunpack.i.l.bf16 %v5702_v38  ;;  %v4447_v55 = vsel %vm59_vm0, %v4419_v11, 0.0 }
 0xbf9   :  { %4448 = vadd.xlane.f32.xlu1 %v4447_v55 }
 0xbfa   :  { %v4299_v28 = vsel %vm4283_vm8, %v4282_v13, %v5704_v3  ;;  %v4298_v12 = vsel %vm4283_vm8, %v4281_v17, %v5703_v58  ;;  %v6103_v3 = vld [vmem:[%s8926_s0 + $0x48] sm:$0xff] }
 0xbfb   :  { %v4307_v27 = vpack.c.bf16 %v4299_v28, %v4298_v12  ;;  %v4374_v56 = vpop.f32.mrf.mxu0 }
 0xbfc   :  { %v8501_v34 = vadd.f32 %v6100_v5, %v4374_v56  ;;  %v6104_v56 = vld [vmem:[%s8926_s0 + $0x68] sm:$0xff] }
 0xbfd   :  { %5511 = vmatmul.msk.bf16.gmra.mxu0 %vm59_vm0, %v4307_v27 }
 0xbfe   :  { %v4420_v29 = vmul.f32 %v8501_v34, %v8501_v34 }
 0xc00   :  { %v4450_v24 = vsel %vm59_vm0, %v4420_v29, 0.0 }
 0xc01   :  { %4451 = vadd.xlane.f32.xlu2 %v4450_v24 }
 0xc03   :  { %v4377_v54 = vpop.f32.mrf.mxu0 }
 0xc04   :  { %v8510_v48 = vadd.f32 %v6101_v51, %v4377_v54 }
 0xc06   :  { %v4421_v14 = vmul.f32 %v8510_v48, %v8510_v48 }
 0xc08   :  { %v4453_v35 = vsel %vm59_vm0, %v4421_v14, 0.0  ;;  %v6105_v14 = vld [vmem:[%s8926_s0 + $0x50] sm:$0xff] }
 0xc09   :  { %4454 = vadd.xlane.f32.xlu2 %v4453_v35 }
 0xc0b   :  { %v4379_v18 = vpop.f32.mrf.mxu0 }
 0xc0c   :  { %v8546_v58 = vadd.f32 %v6103_v3, %v4379_v18 }
 0xc0e   :  { %v4422_v29 = vmul.f32 %v8546_v58, %v8546_v58 }
 0xc25   :  { %v4431_v53 = vpop.xlane.xlu1 %4430 }
 0xc26   :  { %v4477_v39 = vmul.f32 %v4431_v53, %v9029_v30  ;;  %v4456_v53 = vsel %vm59_vm0, %v4422_v29, 0.0 }
 0xc28   :  { %v4493_v26 = vadd.f32 1e-05, %v4477_v39 }
 0xc2a   :  { %5997 = vrsqrt.f32 %v4493_v26  ;;  %vm4515_vm10 = vweird.f32 %v4493_v26 }
 0xc2d   :  { %v4434_v23 = vpop.xlane.xlu2 %4433 }
 0xc2e   :  { %v4478_v59 = vmul.f32 %v4434_v23, %v9029_v30 }
 0xc30   :  { %v5998_v61 = vpop.eup %5997  ;;  %v4494_v0 = vadd.f32 1e-05, %v4478_v59 }
 0xc31   :  { %v4510_v19 = vmul.f32 %v5998_v61, %v4493_v26  ;;  %vm4516_vm9 = vweird.f32 %v5998_v61 }
 0xc32   :  { %5999 = vrsqrt.f32 %v4494_v0  ;;  %vm4517_vm11 = vmor %vm4515_vm10, %vm4516_vm9  ;;  %vm4525_vm13 = vweird.f32 %v4494_v0 }
 0xc33   :  { %v4511_v60 = vmul.f32 %v5998_v61, %v4510_v19 }
 0xc35   :  { %v4512_v45 = vmul.f32 0.5, %v4511_v60 }
 0xc36   :  { %v4382_v62 = vpop.f32.mrf.mxu0 }
 0xc37   :  { %v4513_v20 = vsub.f32 1.5, %v4512_v45  ;;  %v8562_v35 = vadd.f32 %v6105_v14, %v4382_v62 }
 0xc38   :  { %v6000_v2 = vpop.eup %5999 }
 0xc39   :  { %v4520_v36 = vmul.f32 %v6000_v2, %v4494_v0  ;;  %v4514_v47 = vmul.f32 %v5998_v61, %v4513_v20  ;;  %vm4526_vm12 = vweird.f32 %v6000_v2  ;;  %v4423_v0 = vmul.f32 %v8562_v35, %v8562_v35 }
 0xc3a   :  { %vm4527_vm14 = vmor %vm4525_vm13, %vm4526_vm12 }
 0xc3b   :  { %v4521_v9 = vmul.f32 %v6000_v2, %v4520_v36  ;;  %v4518_v7 = vsel %vm4517_vm11, %v5998_v61, %v4514_v47  ;;  %v4459_v62 = vsel %vm59_vm0, %v4423_v0, 0.0 }
 0xc3c   :  { %v4669_v16 = vmul.f32 %v4518_v7, %v8419_v33 }
 0xc3d   :  { %v4522_v41 = vmul.f32 0.5, %v4521_v9 }
 0xc3e   :  { %v8523_v10 = vpop.f32.mrf.mxu0  ;;  %v4689_v44 = vmul.f32 %v8528_v46, %v4669_v16 }
 0xc3f   :  { %v4523_v1 = vsub.f32 1.5, %v4522_v41 }
 0xc41   :  { %v4524_v63 = vmul.f32 %v6000_v2, %v4523_v1 }
 0xc43   :  { %v4528_v15 = vsel %vm4527_vm14, %v6000_v2, %v4524_v63 }
 0xc44   :  { %v4670_v4 = vmul.f32 %v4528_v15, %v8433_v40  ;;  %v4437_v6 = vpop.xlane.xlu0 %4436 }
 0xc45   :  { %v4479_v50 = vmul.f32 %v4437_v6, %v9029_v30 }
 0xc46   :  { %v4690_v52 = vmul.f32 %v8528_v46, %v4670_v4  ;;  %v4387_v11 = vpop.f32.mrf.mxu0 }
 0xc47   :  { %v4495_v22 = vadd.f32 1e-05, %v4479_v50  ;;  %v8538_v38 = vadd.f32 %v6102_v42, %v4387_v11 }
 0xc48   :  { %v4705_v57 = vpack.c.bf16 %v4690_v52, %v4689_v44 }
 0xc49   :  { %6001 = vrsqrt.f32 %v4495_v22  ;;  %v4425_v31 = vmul.f32 %v8538_v38, %v8538_v38  ;;  %vm4535_vm1 = vweird.f32 %v4495_v22 }
 0xc4a   :  { %5520 = vmatmul.msk.bf16.vlgmr.msra.gmra.mxu1 %vm59_vm0, %v4705_v57 }
 0xc4b   :  { %v4465_v55 = vsel %vm59_vm0, %v4425_v31, 0.0 }
 0xc4c   :  { %v4440_v17 = vpop.xlane.xlu1 %4439  ;;  %4466 = vadd.xlane.f32.xlu0 %v4465_v55 }
 0xc4d   :  { %v4480_v13 = vmul.f32 %v4440_v17, %v9029_v30 }
 0xc4e   :  { %v4389_v28 = vpop.f32.mrf.mxu0 }
 0xc4f   :  { %v6002_v12 = vpop.eup %6001  ;;  %v4496_v27 = vadd.f32 1e-05, %v4480_v13  ;;  %v8553_v5 = vadd.f32 %v6104_v56, %v4389_v28 }
 0xc50   :  { %v4530_v24 = vmul.f32 %v6002_v12, %v4495_v22  ;;  %vm4536_vm15 = vweird.f32 %v6002_v12 }
 0xc51   :  { %6003 = vrsqrt.f32 %v4496_v27  ;;  %v4426_v54 = vmul.f32 %v8553_v5, %v8553_v5  ;;  %vm4537_vm2 = vmor %vm4535_vm1, %vm4536_vm15  ;;  %vm4545_vm4 = vweird.f32 %v4496_v27 }
 0xc52   :  { %v4531_v51 = vmul.f32 %v6002_v12, %v4530_v24 }
 0xc53   :  { %v4468_v39 = vsel %vm59_vm0, %v4426_v54, 0.0 }
 0xc54   :  { %v4532_v26 = vmul.f32 0.5, %v4531_v51  ;;  %v4443_v37 = vpop.xlane.xlu2 %4442  ;;  %4457 = vadd.xlane.f32.xlu0 %v4456_v53  ;;  %4469 = vadd.xlane.f32.xlu1 %v4468_v39 }
 0xc55   :  { %v4481_v23 = vmul.f32 %v4443_v37, %v9029_v30 }
 0xc56   :  { %v4533_v18 = vsub.f32 1.5, %v4532_v26 }
 0xc57   :  { %v6004_v59 = vpop.eup %6003  ;;  %v4497_v61 = vadd.f32 1e-05, %v4481_v23 }
 0xc58   :  { %v4540_v19 = vmul.f32 %v6004_v59, %v4496_v27  ;;  %v4534_v60 = vmul.f32 %v6002_v12, %v4533_v18  ;;  %vm4546_vm3 = vweird.f32 %v6004_v59 }
 0xc59   :  { %6005 = vrsqrt.f32 %v4497_v61  ;;  %vm4547_vm5 = vmor %vm4545_vm4, %vm4546_vm3  ;;  %vm4555_vm7 = vweird.f32 %v4497_v61 }
 0xc5a   :  { %v4541_v45 = vmul.f32 %v6004_v59, %v4540_v19  ;;  %v4538_v36 = vsel %vm4537_vm2, %v6002_v12, %v4534_v60 }
 0xc5b   :  { %v4671_v63 = vmul.f32 %v4538_v36, %v8453_v8 }
 0xc5c   :  { %v4542_v21 = vmul.f32 0.5, %v4541_v45  ;;  %v4446_v20 = vpop.xlane.xlu0 %4445  ;;  %4460 = vadd.xlane.f32.xlu0 %v4459_v62 }
 0xc5d   :  { %v4482_v2 = vmul.f32 %v4446_v20, %v9029_v30  ;;  %v4691_v50 = vmul.f32 %v8528_v46, %v4671_v63 }
 0xc5e   :  { %v4543_v47 = vsub.f32 1.5, %v4542_v21  ;;  %v6107_v21 = vld [vmem:[%s8926_s0 + $0x58] sm:$0xff] }
 0xc5f   :  { %v6006_v9 = vpop.eup %6005  ;;  %v4498_v41 = vadd.f32 1e-05, %v4482_v2  ;;  %v8594_v20 = vadd.f32 %v6107_v21, %v8523_v10 }
 0xc60   :  { %v4544_v7 = vmul.f32 %v6004_v59, %v4543_v47  ;;  %v4550_v1 = vmul.f32 %v6006_v9, %v4497_v61  ;;  %vm4556_vm6 = vweird.f32 %v6006_v9  ;;  %v6106_v61 = vld [vmem:[%s8926_s0 + $0x70] sm:$0xff] }
 0xc61   :  { %6007 = vrsqrt.f32 %v4498_v41  ;;  %vm4557_vm8 = vmor %vm4555_vm7, %vm4556_vm6  ;;  %vm4565_vm10 = vweird.f32 %v4498_v41  ;;  %v4424_v63 = vmul.f32 %v8594_v20, %v8594_v20 }
 0xc62   :  { %v4548_v16 = vsel %vm4547_vm5, %v6004_v59, %v4544_v7  ;;  %v4551_v15 = vmul.f32 %v6006_v9, %v4550_v1  ;;  %v6108_v7 = vld [vmem:[%s8926_s0 + $0x78] sm:$0xff] }
 0xc63   :  { %v4672_v4 = vmul.f32 %v4548_v16, %v8461_v43 }
 0xc64   :  { %v4552_v6 = vmul.f32 0.5, %v4551_v15 }
 0xc65   :  { %v4692_v44 = vmul.f32 %v8528_v46, %v4672_v4 }
 0xc66   :  { %v4553_v52 = vsub.f32 1.5, %v4552_v6  ;;  %v4462_v6 = vsel %vm59_vm0, %v4424_v63, 0.0 }
 0xc67   :  { %v6008_v11 = vpop.eup %6007  ;;  %v4706_v22 = vpack.c.bf16 %v4692_v44, %v4691_v50 }
 0xc68   :  { %v4560_v42 = vmul.f32 %v6008_v11, %v4498_v41  ;;  %v4554_v57 = vmul.f32 %v6006_v9, %v4553_v52  ;;  %vm4566_vm9 = vweird.f32 %v6008_v11 }
 0xc69   :  { %5521 = vmatmul.msk.bf16.gmra.mxu1 %vm59_vm0, %v4706_v22  ;;  %vm4567_vm11 = vmor %vm4565_vm10, %vm4566_vm9 }
 0xc6a   :  { %v4561_v31 = vmul.f32 %v6008_v11, %v4560_v42  ;;  %v4558_v13 = vsel %vm4557_vm8, %v6006_v9, %v4554_v57 }
 0xc6b   :  { %v4673_v56 = vmul.f32 %v4558_v13, %v8469_v49 }
 0xc6c   :  { %v4562_v3 = vmul.f32 0.5, %v4561_v31  ;;  %v4449_v55 = vpop.xlane.xlu1 %4448 }
 0xc6d   :  { %v4483_v17 = vmul.f32 %v4449_v55, %v9029_v30  ;;  %v4693_v14 = vmul.f32 %v8528_v46, %v4673_v56 }
 0xc6e   :  { %v4563_v28 = vsub.f32 1.5, %v4562_v3 }
 0xc6f   :  { %v4499_v12 = vadd.f32 1e-05, %v4483_v17 }
 0xc70   :  { %v4564_v27 = vmul.f32 %v6008_v11, %v4563_v28 }
 0xc71   :  { %6009 = vrsqrt.f32 %v4499_v12  ;;  %vm4575_vm13 = vweird.f32 %v4499_v12 }
 0xc72   :  { %v4568_v29 = vsel %vm4567_vm11, %v6008_v11, %v4564_v27 }
 0xc73   :  { %v4674_v24 = vmul.f32 %v4568_v29, %v8477_v32 }
 0xc74   :  { %v4452_v54 = vpop.xlane.xlu2 %4451 }
 0xc75   :  { %v4484_v51 = vmul.f32 %v4452_v54, %v9029_v30  ;;  %v4694_v53 = vmul.f32 %v8528_v46, %v4674_v24 }
 0xc77   :  { %v6010_v39 = vpop.eup %6009  ;;  %v4500_v26 = vadd.f32 1e-05, %v4484_v51  ;;  %v4707_v37 = vpack.c.bf16 %v4694_v53, %v4693_v14 }
 0xc78   :  { %v4570_v23 = vmul.f32 %v6010_v39, %v4499_v12  ;;  %vm4576_vm12 = vweird.f32 %v6010_v39 }
 0xc79   :  { %6011 = vrsqrt.f32 %v4500_v26  ;;  %5522 = vmatmul.msk.bf16.gmra.mxu1 %vm59_vm0, %v4707_v37  ;;  %vm4577_vm14 = vmor %vm4575_vm13, %vm4576_vm12  ;;  %vm4585_vm1 = vweird.f32 %v4500_v26 }
 0xc7a   :  { %v4571_v18 = vmul.f32 %v6010_v39, %v4570_v23  ;;  %v4392_v59 = vpop.f32.mrf.mxu0 }
 0xc7b   :  { %v8586_v0 = vadd.f32 %v6106_v61, %v4392_v59 }
 0xc7c   :  { %v4572_v19 = vmul.f32 0.5, %v4571_v18  ;;  %v4455_v3 = vpop.xlane.xlu2 %4454 }
 0xc7d   :  { %v4427_v60 = vmul.f32 %v8586_v0, %v8586_v0  ;;  %v4485_v55 = vmul.f32 %v4455_v3, %v9029_v30 }
 0xc7e   :  { %v4573_v45 = vsub.f32 1.5, %v4572_v19 }
 0xc7f   :  { %v6012_v62 = vpop.eup %6011  ;;  %v4471_v2 = vsel %vm59_vm0, %v4427_v60, 0.0  ;;  %v4501_v17 = vadd.f32 1e-05, %v4485_v55 }
 0xc80   :  { %v4580_v36 = vmul.f32 %v6012_v62, %v4500_v26  ;;  %4472 = vadd.xlane.f32.xlu1 %v4471_v2  ;;  %v4574_v47 = vmul.f32 %v6010_v39, %v4573_v45  ;;  %vm4586_vm15 = vweird.f32 %v6012_v62 }
 0xc81   :  { %vm4587_vm2 = vmor %vm4585_vm1, %vm4586_vm15  ;;  %6013 = vrsqrt.f32 %v4501_v17  ;;  %vm4595_vm5 = vweird.f32 %v4501_v17 }
 0xc82   :  { %v4581_v9 = vmul.f32 %v6012_v62, %v4580_v36  ;;  %v4394_v41 = vpop.f32.mrf.mxu0  ;;  %v4578_v15 = vsel %vm4577_vm14, %v6010_v39, %v4574_v47 }
 0xc83   :  { %v8600_v1 = vadd.f32 %v6108_v7, %v4394_v41  ;;  %v4675_v52 = vmul.f32 %v4578_v15, %v8485_v25 }
 0xc84   :  { %v4582_v10 = vmul.f32 0.5, %v4581_v9 }
 0xc85   :  { %v4428_v16 = vmul.f32 %v8600_v1, %v8600_v1  ;;  %v4695_v42 = vmul.f32 %v8528_v46, %v4675_v52 }
 0xc86   :  { %v4583_v4 = vsub.f32 1.5, %v4582_v10 }
 0xc87   :  { %v4474_v50 = vsel %vm59_vm0, %v4428_v16, 0.0  ;;  %v6014_v27 = vpop.eup %6013 }
 0xc88   :  { %v4584_v44 = vmul.f32 %v6012_v62, %v4583_v4  ;;  %4463 = vadd.xlane.f32.xlu1 %v4462_v6  ;;  %4475 = vadd.xlane.f32.xlu2 %v4474_v50  ;;  %v4590_v56 = vmul.f32 %v6014_v27, %v4501_v17  ;;  %vm4596_vm3 = vweird.f32 %v6014_v27 }
 0xc89   :  { %vm8623_vm6 = vmor %vm4595_vm5, %vm4596_vm3 }
 0xc8a   :  { %v4588_v11 = vsel %vm4587_vm2, %v6012_v62, %v4584_v44  ;;  %v4591_v26 = vmul.f32 %v6014_v27, %v4590_v56 }
 0xc8b   :  { %v4676_v22 = vmul.f32 %v4588_v11, %v8501_v34 }
 0xc8c   :  { %v4592_v19 = vmul.f32 0.5, %v4591_v26 }
 0xc8d   :  { %v4696_v57 = vmul.f32 %v8528_v46, %v4676_v22 }
 0xc8e   :  { %v4593_v2 = vsub.f32 1.5, %v4592_v19 }
 0xc8f   :  { %v4708_v31 = vpack.c.bf16 %v4696_v57, %v4695_v42 }
 0xc90   :  { %v4594_v10 = vmul.f32 %v6014_v27, %v4593_v2 }
 0xc91   :  { %5523 = vmatmul.msk.bf16.gmra.mxu1 %vm59_vm0, %v4708_v31 }
 0xc92   :  { %v4598_v11 = vsel %vm8623_vm6, %v6014_v27, %v4594_v10 }
 0xcbf   :  { %v4467_v13 = vpop.xlane.xlu0 %4466 }
 0xcc0   :  { %v4489_v28 = vmul.f32 %v4467_v13, %v9029_v30 }
 0xcc2   :  { %v4505_v12 = vadd.f32 1e-05, %v4489_v28 }
 0xcc4   :  { %6015 = vrsqrt.f32 %v4505_v12  ;;  %vm4635_vm7 = vweird.f32 %v4505_v12 }
 0xcc7   :  { %v8615_v29 = vpop.f32.mrf.mxu1  ;;  %v4458_v24 = vpop.xlane.xlu0 %4457 }
 0xcc8   :  { %v4802_v54 = vsub.f32 0.0, %v8615_v29  ;;  %v4486_v51 = vmul.f32 %v4458_v24, %v9029_v30  ;;  %v4470_v14 = vpop.xlane.xlu1 %4469 }
 0xcc9   :  { %v4490_v53 = vmul.f32 %v4470_v14, %v9029_v30 }
 0xcca   :  { %v6016_v39 = vpop.eup %6015  ;;  %v4818_v37 = vmul.f32 1.442695, %v4802_v54  ;;  %v4502_v23 = vadd.f32 1e-05, %v4486_v51 }
 0xccb   :  { %v4630_v18 = vmul.f32 %v6016_v39, %v4505_v12  ;;  %v4506_v59 = vadd.f32 1e-05, %v4490_v53  ;;  %vm4636_vm4 = vweird.f32 %v6016_v39  ;;  %v4677_v12 = vmul.f32 %v4598_v11, %v8510_v48 }
 0xccc   :  { %6017 = vpow2.f32 %v4818_v37  ;;  %vm8629_vm8 = vmor %vm4635_vm7, %vm4636_vm4  ;;  %vm4605_vm10 = vweird.f32 %v4502_v23 }
 0xccd   :  { %v4631_v61 = vmul.f32 %v6016_v39, %v4630_v18  ;;  %6019 = vrsqrt.f32 %v4502_v23  ;;  %vm4645_vm13 = vweird.f32 %v4506_v59  ;;  %v4697_v18 = vmul.f32 %v8528_v46, %v4677_v12 }
 0xcce   :  { %6021 = vrsqrt.f32 %v4506_v59 }
 0xccf   :  { %v4632_v60 = vmul.f32 0.5, %v4631_v61  ;;  %v8620_v45 = vpop.f32.mrf.mxu1  ;;  %v4461_v53 = vpop.xlane.xlu0 %4460 }
 0xcd0   :  { %v4803_v62 = vsub.f32 0.0, %v8620_v45 }
 0xcd1   :  { %v4633_v9 = vsub.f32 1.5, %v4632_v60 }
 0xcd2   :  { %v6018_v21 = vpop.eup %6017  ;;  %v4820_v36 = vmul.f32 1.442695, %v4803_v62 }
 0xcd3   :  { %v6020_v47 = vpop.eup %6019  ;;  %v4850_v41 = vadd.f32 1.0, %v6018_v21  ;;  %v4634_v4 = vmul.f32 %v6016_v39, %v4633_v9 }
 0xcd4   :  { %v6022_v7 = vpop.eup %6021  ;;  %v4600_v63 = vmul.f32 %v6020_v47, %v4502_v23  ;;  %6023 = vpow2.f32 %v4820_v36  ;;  %vm4606_vm9 = vweird.f32 %v6020_v47 }
 0xcd5   :  { %6025 = vrcp.f32 %v4850_v41  ;;  %v4640_v15 = vmul.f32 %v6022_v7, %v4506_v59  ;;  %v4638_v3 = vsel %vm8629_vm8, %v6016_v39, %v4634_v4  ;;  %vm4646_vm11 = vweird.f32 %v6022_v7  ;;  %vm4607_vm12 = vmor %vm4605_vm10, %vm4606_vm9 }
 0xcd6   :  { %v4601_v16 = vmul.f32 %v6020_v47, %v4600_v63  ;;  %v4681_v54 = vmul.f32 %v4638_v3, %v8538_v38  ;;  %v4877_v51 = vand.u32 2147483648, %v4850_v41  ;;  %vm4647_vm14 = vmor %vm4645_vm13, %vm4646_vm11  ;;  %v4875_v26 = vand.u32 2147483647, %v4850_v41 }
 0xcd7   :  { %v4641_v50 = vmul.f32 %v6022_v7, %v4640_v15  ;;  %vm4871_vm1 = vweird.f32 %v4850_v41  ;;  %v4487_v59 = vmul.f32 %v4461_v53, %v9029_v30 }
 0xcd8   :  { %v4602_v6 = vmul.f32 0.5, %v4601_v16  ;;  %v4701_v62 = vmul.f32 %v8528_v46, %v4681_v54  ;;  %v4878_v21 = vor.u32 1.1754944e-38, %v4877_v51  ;;  %vm4876_vm3 = vcmp.eq.f32.partialorder %v4875_v26, 8.507059e+37 }
 0xcd9   :  { %v4642_v57 = vmul.f32 0.5, %v4641_v50  ;;  %v8646_v16 = vadd.f32 1e-05, %v4487_v59 }
 0xcda   :  { %v6024_v52 = vpop.eup %6023  ;;  %v4603_v42 = vsub.f32 1.5, %v4602_v6 }
 0xcdb   :  { %v6026_v31 = vpop.eup %6025  ;;  %v4851_v55 = vadd.f32 1.0, %v6024_v52  ;;  %v4643_v28 = vsub.f32 1.5, %v4642_v57  ;;  %vm4615_vm13 = vweird.f32 %v8646_v16 }
 0xcdc   :  { %v4867_v17 = vmul.f32 %v6026_v31, %v4850_v41  ;;  %v4604_v13 = vmul.f32 %v6020_v47, %v4603_v42  ;;  %vm4872_vm15 = vweird.f32 %v6026_v31 }
 0xcdd   :  { %6027 = vrcp.f32 %v4851_v55  ;;  %v4644_v24 = vmul.f32 %v6022_v7, %v4643_v28  ;;  %vm4873_vm2 = vmor %vm4871_vm1, %vm4872_vm15  ;;  %v4892_v4 = vand.u32 2147483648, %v4851_v55  ;;  %v4890_v44 = vand.u32 2147483647, %v4851_v55 }
 0xcde   :  { %v4868_v27 = vsub.f32 1.0, %v4867_v17  ;;  %v4608_v56 = vsel %vm4607_vm12, %v6020_v47, %v4604_v13  ;;  %vm4886_vm5 = vweird.f32 %v4851_v55  ;;  %6029 = vrsqrt.f32 %v8646_v16 }
 0xcdf   :  { %v4678_v14 = vmul.f32 %v4608_v56, %v8546_v58  ;;  %v4648_v37 = vsel %vm4647_vm14, %v6022_v7, %v4644_v24  ;;  %v4893_v22 = vor.u32 1.1754944e-38, %v4892_v4  ;;  %vm4891_vm7 = vcmp.eq.f32.partialorder %v4890_v44, 8.507059e+37 }
 0xce0   :  { %v4869_v39 = vmul.f32 %v6026_v31, %v4868_v27  ;;  %v4682_v23 = vmul.f32 %v4648_v37, %v8553_v5 }
 0xce1   :  { %v4698_v61 = vmul.f32 %v8528_v46, %v4678_v14 }
 0xce2   :  { %v4870_v19 = vadd.f32 %v6026_v31, %v4869_v39  ;;  %v4702_v2 = vmul.f32 %v8528_v46, %v4682_v23 }
 0xce3   :  { %v6028_v60 = vpop.eup %6027  ;;  %v4709_v36 = vpack.c.bf16 %v4698_v61, %v4697_v18 }
 0xce4   :  { %v4874_v47 = vsel %vm4873_vm2, %v6026_v31, %v4870_v19  ;;  %v4882_v9 = vmul.f32 %v6028_v60, %v4851_v55  ;;  %v4711_v63 = vpack.c.bf16 %v4702_v2, %v4701_v62  ;;  %vm4887_vm4 = vweird.f32 %v6028_v60  ;;  %v8658_v13 = vpop.eup %6029 }
 0xce5   :  { %v4879_v7 = vsel %vm4876_vm3, %v4878_v21, %v4874_v47  ;;  %5524 = vmatmul.msk.bf16.gmra.mxu1 %vm59_vm0, %v4709_v36  ;;  %vm4888_vm6 = vmor %vm4886_vm5, %vm4887_vm4  ;;  %v4610_v56 = vmul.f32 %v8658_v13, %v8646_v16  ;;  %vm4616_vm12 = vweird.f32 %v8658_v13 }
 0xce6   :  { %v5106_v10 = vmul.f32 %v4879_v7, %v8615_v29  ;;  %v4883_v41 = vsub.f32 1.0, %v4882_v9  ;;  %v8648_v15 = vpop.f32.mrf.mxu1  ;;  %5526 = vmatmul.msk.bf16.vlgmr.msrb.gmra.mxu3 %vm59_vm0, %v4711_v63  ;;  %vm8698_vm15 = vmor %vm4615_vm13, %vm4616_vm12 }
 0xce7   :  { %v4804_v6 = vsub.f32 0.0, %v8648_v15  ;;  %v4611_v53 = vmul.f32 %v8658_v13, %v4610_v56 }
 0xce8   :  { %v4884_v50 = vmul.f32 %v6028_v60, %v4883_v41  ;;  %5138 = vrot.lane.b32.xlu2 %v5106_v10, %s6110_s1 }
 0xce9   :  { %v4822_v52 = vmul.f32 1.442695, %v4804_v6  ;;  %v4612_v59 = vmul.f32 0.5, %v4611_v53 }
 0xcea   :  { %v4885_v11 = vadd.f32 %v6028_v60, %v4884_v50 }
 0xceb   :  { %6031 = vpow2.f32 %v4822_v52  ;;  %v4613_v4 = vsub.f32 1.5, %v4612_v59 }
 0xcec   :  { %v4889_v42 = vsel %vm4888_vm6, %v6028_v60, %v4885_v11 }
 0xced   :  { %v4894_v57 = vsel %vm4891_vm7, %v4893_v22, %v4889_v42 }
 0xcee   :  { %v5107_v31 = vmul.f32 %v4894_v57, %v8620_v45  ;;  %v8655_v3 = vpop.f32.mrf.mxu1 }
 0xcef   :  { %v4805_v17 = vsub.f32 0.0, %v8655_v3 }
 0xcf0   :  { %5140 = vrot.lane.b32.xlu0 %v5107_v31, %s6110_s1 }
 0xcf1   :  { %v6032_v28 = vpop.eup %6031  ;;  %v4824_v55 = vmul.f32 1.442695, %v4805_v17 }
 0xcf2   :  { %v4852_v12 = vadd.f32 1.0, %v6032_v28 }
 0xcf3   :  { %6033 = vpow2.f32 %v4824_v55  ;;  %v4473_v27 = vpop.xlane.xlu1 %4472  ;;  %v4614_v55 = vmul.f32 %v8658_v13, %v4613_v4 }
 0xcf4   :  { %6035 = vrcp.f32 %v4852_v12  ;;  %v4491_v24 = vmul.f32 %v4473_v27, %v9029_v30  ;;  %v4907_v62 = vand.u32 2147483648, %v4852_v12  ;;  %v4905_v36 = vand.u32 2147483647, %v4852_v12 }
 0xcf5   :  { %vm4901_vm9 = vweird.f32 %v4852_v12 }
 0xcf6   :  { %v8664_v54 = vpop.f32.mrf.mxu1  ;;  %v8666_v51 = vadd.f32 1e-05, %v4491_v24  ;;  %vm4906_vm11 = vcmp.eq.f32.partialorder %v4905_v36, 8.507059e+37 }
 0xcf7   :  { %v4806_v14 = vsub.f32 0.0, %v8664_v54 }
 0xcf8   :  { %6037 = vrsqrt.f32 %v8666_v51  ;;  %vm4655_vm4 = vweird.f32 %v8666_v51 }
 0xcf9   :  { %v6034_v39 = vpop.eup %6033  ;;  %v4826_v26 = vmul.f32 1.442695, %v4806_v14 }
 0xcfa   :  { %v6036_v37 = vpop.eup %6035  ;;  %v4853_v23 = vadd.f32 1.0, %v6034_v39 }
 0xcfb   :  { %v4897_v18 = vmul.f32 %v6036_v37, %v4852_v12  ;;  %6039 = vpow2.f32 %v4826_v26  ;;  %v4464_v61 = vpop.xlane.xlu1 %4463  ;;  %v4476_v19 = vpop.xlane.xlu2 %4475  ;;  %vm4902_vm8 = vweird.f32 %v6036_v37 }
 0xcfc   :  { %6041 = vrcp.f32 %v4853_v23  ;;  %v4488_v21 = vmul.f32 %v4464_v61, %v9029_v30  ;;  %v4492_v2 = vmul.f32 %v4476_v19, %v9029_v30  ;;  %v4908_v30 = vor.u32 1.1754944e-38, %v4907_v62  ;;  %vm4903_vm10 = vmor %vm4901_vm9, %vm4902_vm8 }
 0xcfd   :  { %v4898_v60 = vsub.f32 1.0, %v4897_v18  ;;  %v4920_v56 = vand.u32 2147483647, %v4853_v23  ;;  %v4922_v24 = vand.u32 2147483648, %v4853_v23  ;;  %v4618_v61 = vsel %vm8698_vm15, %v8658_v13, %v4614_v55 }
 0xcfe   :  { %v8673_v47 = vpop.f32.mrf.mxu1  ;;  %v8675_v9 = vpop.eup %6037  ;;  %v8677_v63 = vadd.f32 1e-05, %v4488_v21  ;;  %v8679_v10 = vadd.f32 1e-05, %v4492_v2  ;;  %vm4916_vm1 = vweird.f32 %v4853_v23 }
 0xcff   :  { %v4899_v7 = vmul.f32 %v6036_v37, %v4898_v60  ;;  %v4807_v41 = vsub.f32 0.0, %v8673_v47  ;;  %v4650_v6 = vmul.f32 %v8675_v9, %v8666_v51  ;;  %vm4921_vm3 = vcmp.eq.f32.partialorder %v4920_v56, 8.507059e+37 }
 0xd00   :  { %6043 = vrsqrt.f32 %v8677_v63  ;;  %v4923_v60 = vor.u32 1.1754944e-38, %v4922_v24  ;;  %vm4656_vm5 = vweird.f32 %v8675_v9  ;;  %vm4625_vm6 = vweird.f32 %v8677_v63 }
 0xd01   :  { %v6040_v50 = vpop.eup %6039  ;;  %v4900_v44 = vadd.f32 %v6036_v37, %v4899_v7  ;;  %v4651_v11 = vmul.f32 %v8675_v9, %v4650_v6  ;;  %6045 = vrsqrt.f32 %v8679_v10  ;;  %v4828_v42 = vmul.f32 1.442695, %v4807_v41  ;;  %vm8725_vm8 = vmor %vm4655_vm4, %vm4656_vm5 }
 0xd02   :  { %v6042_v52 = vpop.eup %6041  ;;  %v8687_v22 = vadd.f32 1.0, %v6040_v50  ;;  %vm4665_vm13 = vweird.f32 %v8679_v10 }
 0xd03   :  { %v4904_v57 = vsel %vm4903_vm10, %v6036_v37, %v4900_v44  ;;  %v4912_v31 = vmul.f32 %v6042_v52, %v4853_v23  ;;  %v4652_v28 = vmul.f32 0.5, %v4651_v11  ;;  %vm4917_vm14 = vweird.f32 %v6042_v52 }
 0xd04   :  { %v4909_v17 = vsel %vm4906_vm11, %v4908_v30, %v4904_v57  ;;  %6047 = vrcp.f32 %v8687_v22  ;;  %vm4918_vm2 = vmor %vm4916_vm1, %vm4917_vm14  ;;  %v4935_v50 = vand.u32 2147483647, %v8687_v22  ;;  %v4937_v30 = vand.u32 2147483648, %v8687_v22 }
 0xd05   :  { %v5108_v12 = vmul.f32 %v4909_v17, %v8648_v15  ;;  %v4913_v27 = vsub.f32 1.0, %v4912_v31  ;;  %6049 = vpow2.f32 %v4828_v42  ;;  %v4653_v37 = vsub.f32 1.5, %v4652_v28 }
 0xd06   :  { %v6044_v14 = vpop.eup %6043  ;;  %vm4931_vm11 = vweird.f32 %v8687_v22  ;;  %v4938_v56 = vor.u32 1.1754944e-38, %v4937_v30  ;;  %vm4936_vm15 = vcmp.eq.f32.partialorder %v4935_v50, 8.507059e+37 }
 0xd07   :  { %v4914_v53 = vmul.f32 %v6042_v52, %v4913_v27  ;;  %5142 = vrot.lane.b32.xlu1 %v5108_v12, %s6110_s1  ;;  %v8696_v39 = vpop.eup %6045  ;;  %v4620_v18 = vmul.f32 %v6044_v14, %v8677_v63  ;;  %v4654_v23 = vmul.f32 %v8675_v9, %v4653_v37  ;;  %vm4626_vm7 = vweird.f32 %v6044_v14 }
 0xd08   :  { %v4660_v16 = vmul.f32 %v8696_v39, %v8679_v10  ;;  %vm4666_vm10 = vweird.f32 %v8696_v39  ;;  %v4679_v12 = vmul.f32 %v4618_v61, %v8562_v35  ;;  %vm4627_vm12 = vmor %vm4625_vm6, %vm4626_vm7 }
 0xd09   :  { %v4915_v19 = vadd.f32 %v6042_v52, %v4914_v53  ;;  %v4621_v62 = vmul.f32 %v6044_v14, %v4620_v18  ;;  %v4658_v17 = vsel %vm8725_vm8, %v8675_v9, %v4654_v23  ;;  %vm4667_vm1 = vmor %vm4665_vm13, %vm4666_vm10 }
 0xd0a   :  { %v6048_v59 = vpop.eup %6047  ;;  %v4661_v41 = vmul.f32 %v8696_v39, %v4660_v16  ;;  %v4683_v26 = vmul.f32 %v4658_v17, %v8586_v0 }
 0xd0b   :  { %v4919_v21 = vsel %vm4918_vm2, %v6042_v52, %v4915_v19  ;;  %v4927_v2 = vmul.f32 %v6048_v59, %v8687_v22  ;;  %v6050_v13 = vpop.eup %6049  ;;  %v4622_v7 = vmul.f32 0.5, %v4621_v62  ;;  %vm4932_vm9 = vweird.f32 %v6048_v59 }
 0xd0c   :  { %v4924_v36 = vsel %vm4921_vm3, %v4923_v60, %v4919_v21  ;;  %v8716_v44 = vadd.f32 1.0, %v6050_v13  ;;  %v4662_v11 = vmul.f32 0.5, %v4661_v41  ;;  %vm4933_vm14 = vmor %vm4931_vm11, %vm4932_vm9  ;;  %v4699_v19 = vmul.f32 %v8528_v46, %v4679_v12 }
 0xd0d   :  { %v5109_v4 = vmul.f32 %v4924_v36, %v8655_v3  ;;  %v4928_v6 = vsub.f32 1.0, %v4927_v2  ;;  %v4623_v52 = vsub.f32 1.5, %v4622_v7 }
 0xd0e   :  { %v8719_v42 = vpop.f32.mrf.mxu1  ;;  %6051 = vrcp.f32 %v8716_v44  ;;  %v4663_v55 = vsub.f32 1.5, %v4662_v11  ;;  %v4952_v36 = vand.u32 2147483648, %v8716_v44  ;;  %vm4946_vm3 = vweird.f32 %v8716_v44 }
 0xd0f   :  { %v4929_v31 = vmul.f32 %v6048_v59, %v4928_v6  ;;  %5144 = vrot.lane.b32.xlu2 %v5109_v4, %s6110_s1  ;;  %v4624_v28 = vmul.f32 %v6044_v14, %v4623_v52  ;;  %v4808_v51 = vsub.f32 0.0, %v8719_v42  ;;  %v4950_v6 = vand.u32 2147483647, %v8716_v44 }
 0xd10   :  { %v4664_v9 = vmul.f32 %v8696_v39, %v4663_v55  ;;  %v5561_v55 = vld [vmem:[%s8932_s6 + $0x18] sm:$0xff] }
 0xd11   :  { %v4930_v27 = vadd.f32 %v6048_v59, %v4929_v31  ;;  %v4628_v24 = vsel %vm4627_vm12, %v6044_v14, %v4624_v28  ;;  %v4830_v53 = vmul.f32 1.442695, %v4808_v51  ;;  %vm4951_vm5 = vcmp.eq.f32.partialorder %v4950_v6, 8.507059e+37  ;;  %5271 = vmatpush.bf16.msra.mxu2 %v5561_v55  ;;  %5566 = vmatpush.bf16.msra.mxu3 %v5561_v55 }
 0xd12   :  { %v4680_v18 = vmul.f32 %v4628_v24, %v8594_v20  ;;  %v4668_v63 = vsel %vm4667_vm1, %v8696_v39, %v4664_v9  ;;  %v4703_v39 = vmul.f32 %v8528_v46, %v4683_v26  ;;  %v5559_v9 = vld [vmem:[%s8932_s6 + $0x8] sm:$0xff] }
 0xd13   :  { %v4934_v37 = vsel %vm4933_vm14, %v6048_v59, %v4930_v27  ;;  %6053 = vpow2.f32 %v4830_v53  ;;  %v4684_v14 = vmul.f32 %v4668_v63, %v8600_v1  ;;  %vm5242_vm14 = vcmask 523264  }
 0xd14   :  { %v4939_v22 = vsel %vm4936_vm15, %v4938_v56, %v4934_v37  ;;  %v6052_v10 = vpop.eup %6051  ;;  %v4700_v16 = vmul.f32 %v8528_v46, %v4680_v18 }
 0xd15   :  { %v5110_v61 = vmul.f32 %v4939_v22, %v8664_v54  ;;  %v4942_v59 = vmul.f32 %v6052_v10, %v8716_v44  ;;  %v4704_v2 = vmul.f32 %v8528_v46, %v4684_v14  ;;  %vm4947_vm2 = vweird.f32 %v6052_v10  ;;  %v5560_v44 = vld [vmem:[%s8932_s6 + $0x10] sm:$0xff] }
 0xd16   :  { %v8753_v60 = vpop.f32.mrf.mxu1  ;;  %v4710_v21 = vpack.c.bf16 %v4700_v16, %v4699_v19  ;;  %vm4948_vm4 = vmor %vm4946_vm3, %vm4947_vm2  ;;  %v4953_v46 = vor.u32 1.1754944e-38, %v4952_v36  ;;  %5272 = vmatpush.bf16.msra.mxu2 %v5560_v44  ;;  %5567 = vmatpush.bf16.msra.mxu3 %v5560_v44 }
 0xd17   :  { %v4809_v62 = vsub.f32 0.0, %v8753_v60  ;;  %5146 = vrot.lane.b32.xlu0 %v5110_v61, %s6110_s1  ;;  %v4943_v13 = vsub.f32 1.0, %v4942_v59  ;;  %v4712_v7 = vpack.c.bf16 %v4704_v2, %v4703_v39 }
 0xd18   :  { %5525 = vmatmul.msk.bf16.gmra.mxu1 %vm59_vm0, %v4710_v21 }
 0xd19   :  { %v4832_v23 = vmul.f32 1.442695, %v4809_v62  ;;  %v6054_v41 = vpop.eup %6053  ;;  %v4944_v4 = vmul.f32 %v6052_v10, %v4943_v13  ;;  %5527 = vmatmul.msk.bf16.gmra.mxu3 %vm59_vm0, %v4712_v7  ;;  %v5558_v13 = vld [vmem:[%s8932_s6] sm:$0xff] }
 0xd1a   :  { %v4856_v50 = vadd.f32 1.0, %v6054_v41  ;;  %5273 = vmatpush.bf16.msra.mxu2 %v5559_v9  ;;  %5568 = vmatpush.bf16.msra.mxu3 %v5559_v9 }
 0xd1b   :  { %6055 = vpow2.f32 %v4832_v23  ;;  %v4945_v30 = vadd.f32 %v6052_v10, %v4944_v4 }
 0xd1c   :  { %6057 = vrcp.f32 %v4856_v50  ;;  %v4967_v27 = vand.u32 2147483648, %v4856_v50  ;;  %v4965_v24 = vand.u32 2147483647, %v4856_v50  ;;  %vm4961_vm7 = vweird.f32 %v4856_v50 }
 0xd1d   :  { %v4949_v52 = vsel %vm4948_vm4, %v6052_v10, %v4945_v30 }
 0xd1e   :  { %v4954_v11 = vsel %vm4951_vm5, %v4953_v46, %v4949_v52  ;;  %v4968_v37 = vor.u32 1.1754944e-38, %v4967_v27  ;;  %vm4966_vm9 = vcmp.eq.f32.partialorder %v4965_v24, 8.507059e+37  ;;  %5274 = vmatpush.bf16.msra.mxu2 %v5558_v13  ;;  %5569 = vmatpush.bf16.msra.mxu3 %v5558_v13 }
 0xd1f   :  { %v5111_v57 = vmul.f32 %v4954_v11, %v8673_v47 }
 0xd21   :  { %v6056_v31 = vpop.eup %6055  ;;  %5148 = vrot.lane.b32.xlu1 %v5111_v57, %s6110_s1 }
 0xd22   :  { %v4857_v17 = vadd.f32 1.0, %v6056_v31  ;;  %v6058_v28 = vpop.eup %6057 }
 0xd23   :  { %v4957_v51 = vmul.f32 %v6058_v28, %v4856_v50  ;;  %vm4962_vm6 = vweird.f32 %v6058_v28 }
 0xd24   :  { %6059 = vrcp.f32 %v4857_v17  ;;  %vm4963_vm8 = vmor %vm4961_vm7, %vm4962_vm6  ;;  %v4982_v14 = vand.u32 2147483648, %v4857_v17  ;;  %v4980_v16 = vand.u32 2147483647, %v4857_v17  ;;  %vm4976_vm11 = vweird.f32 %v4857_v17 }
 0xd25   :  { %v4958_v12 = vsub.f32 1.0, %v4957_v51 }
 0xd26   :  { %v4983_v62 = vor.u32 1.1754944e-38, %v4982_v14  ;;  %vm4981_vm13 = vcmp.eq.f32.partialorder %v4980_v16, 8.507059e+37 }
 0xd27   :  { %v4959_v56 = vmul.f32 %v6058_v28, %v4958_v12 }
 0xd29   :  { %v4960_v26 = vadd.f32 %v6058_v28, %v4959_v56 }
 0xd2a   :  { %v6060_v53 = vpop.eup %6059 }
 0xd2b   :  { %v4972_v18 = vmul.f32 %v6060_v53, %v4857_v17  ;;  %v4964_v22 = vsel %vm4963_vm8, %v6058_v28, %v4960_v26  ;;  %vm4977_vm10 = vweird.f32 %v6060_v53 }
 0xd2c   :  { %v4969_v63 = vsel %vm4966_vm9, %v4968_v37, %v4964_v22  ;;  %vm4978_vm12 = vmor %vm4976_vm11, %vm4977_vm10 }
 0xd2d   :  { %v4973_v10 = vsub.f32 1.0, %v4972_v18  ;;  %v5112_v61 = vmul.f32 %v4969_v63, %v8719_v42 }
 0xd2f   :  { %v4974_v19 = vmul.f32 %v6060_v53, %v4973_v10  ;;  %5150 = vrot.lane.b32.xlu2 %v5112_v61, %s6110_s1 }
 0xd31   :  { %v4975_v59 = vadd.f32 %v6060_v53, %v4974_v19 }
 0xd33   :  { %v4979_v21 = vsel %vm4978_vm12, %v6060_v53, %v4975_v59 }
 0xd34   :  { %v4984_v39 = vsel %vm4981_vm13, %v4983_v62, %v4979_v21 }
 0xd35   :  { %v5113_v2 = vmul.f32 %v4984_v39, %v8753_v60 }
 0xd37   :  { %5152 = vrot.lane.b32.xlu0 %v5113_v2, %s6110_s1 }
 0xd42   :  { %v5139_v36 = vpop.permute.xlu2 %5138 }
 0xd43   :  { %v5186_v41 = vmul.f32 %v5139_v36, %v8615_v29 }
 0xd62   :  { %v8782_v23 = vpop.f32.mrf.mxu1  ;;  %v5141_v7 = vpop.permute.xlu0 %5140 }
 0xd63   :  { %v4810_v4 = vsub.f32 0.0, %v8782_v23  ;;  %v5187_v6 = vmul.f32 %v5141_v7, %v8620_v45 }
 0xd65   :  { %v4834_v50 = vmul.f32 1.442695, %v4810_v4  ;;  %v5202_v30 = vpack.c.bf16 %v5187_v6, %v5186_v41 }
 0xd67   :  { %6061 = vpow2.f32 %v4834_v50  ;;  %5544 = vmatmul.msk.bf16.vlgmr.msra.gmra.mxu2 %vm5242_vm14, %v5202_v30 }
 0xd69   :  { %v8788_v46 = vpop.f32.mrf.mxu3  ;;  %v5145_v9 = vpop.permute.xlu2 %5144 }
 0xd6a   :  { %v8790_v52 = vpop.f32.mrf.mxu1  ;;  %v4814_v11 = vsub.f32 0.0, %v8788_v46  ;;  %v5189_v22 = vmul.f32 %v5145_v9, %v8655_v3 }
 0xd6b   :  { %v4811_v57 = vsub.f32 0.0, %v8790_v52 }
 0xd6c   :  { %v4842_v29 = vmul.f32 1.442695, %v4814_v11 }
 0xd6d   :  { %v6062_v31 = vpop.eup %6061  ;;  %v4836_v17 = vmul.f32 1.442695, %v4811_v57 }
 0xd6e   :  { %v4858_v28 = vadd.f32 1.0, %v6062_v31  ;;  %6063 = vpow2.f32 %v4842_v29 }
 0xd70   :  { %6065 = vrcp.f32 %v4858_v28  ;;  %v4997_v18 = vand.u32 2147483648, %v4858_v28  ;;  %v4995_v61 = vand.u32 2147483647, %v4858_v28  ;;  %vm4991_vm1 = vweird.f32 %v4858_v28 }
 0xd71   :  { %6067 = vpow2.f32 %v4836_v17  ;;  %v8794_v45 = vpop.f32.mrf.mxu3 }
 0xd72   :  { %v4815_v55 = vsub.f32 0.0, %v8794_v45  ;;  %v4998_v62 = vor.u32 1.1754944e-38, %v4997_v18  ;;  %vm4996_vm3 = vcmp.eq.f32.partialorder %v4995_v61, 8.507059e+37 }
 0xd74   :  { %v6064_v51 = vpop.eup %6063  ;;  %v4844_v44 = vmul.f32 1.442695, %v4815_v55 }
 0xd75   :  { %v4862_v27 = vadd.f32 1.0, %v6064_v51 }
 0xd76   :  { %v6066_v12 = vpop.eup %6065  ;;  %6069 = vpow2.f32 %v4844_v44 }
 0xd77   :  { %v6068_v56 = vpop.eup %6067  ;;  %v4987_v24 = vmul.f32 %v6066_v12, %v4858_v28  ;;  %6071 = vrcp.f32 %v4862_v27  ;;  %vm4992_vm15 = vweird.f32 %v6066_v12  ;;  %v5057_v7 = vand.u32 2147483648, %v4862_v27 }
 0xd78   :  { %v4859_v26 = vadd.f32 1.0, %v6068_v56  ;;  %vm4993_vm2 = vmor %vm4991_vm1, %vm4992_vm15  ;;  %v5055_v6 = vand.u32 2147483647, %v4862_v27  ;;  %vm5051_vm5 = vweird.f32 %v4862_v27 }
 0xd79   :  { %v4988_v53 = vsub.f32 1.0, %v4987_v24  ;;  %v5143_v37 = vpop.permute.xlu1 %5142  ;;  %v5058_v31 = vor.u32 1.1754944e-38, %v5057_v7 }
 0xd7a   :  { %v5188_v63 = vmul.f32 %v5143_v37, %v8648_v15  ;;  %6073 = vrcp.f32 %v4859_v26  ;;  %v5012_v11 = vand.u32 2147483648, %v4859_v26  ;;  %v5010_v17 = vand.u32 2147483647, %v4859_v26 }
 0xd7b   :  { %v4989_v10 = vmul.f32 %v6066_v12, %v4988_v53  ;;  %vm5056_vm8 = vcmp.eq.f32.partialorder %v5055_v6, 8.507059e+37  ;;  %vm5006_vm9 = vweird.f32 %v4859_v26 }
 0xd7c   :  { %v5203_v14 = vpack.c.bf16 %v5189_v22, %v5188_v63  ;;  %v6070_v19 = vpop.eup %6069  ;;  %v5013_v56 = vor.u32 1.1754944e-38, %v5012_v11  ;;  %vm5011_vm11 = vcmp.eq.f32.partialorder %v5010_v17, 8.507059e+37 }
 0xd7d   :  { %v4990_v16 = vadd.f32 %v6066_v12, %v4989_v10  ;;  %v6072_v59 = vpop.eup %6071  ;;  %v4863_v21 = vadd.f32 1.0, %v6070_v19 }
 0xd7e   :  { %5545 = vmatmul.msk.bf16.gmra.mxu2 %vm5242_vm14, %v5203_v14  ;;  %v5047_v2 = vmul.f32 %v6072_v59, %v4862_v27  ;;  %vm5052_vm4 = vweird.f32 %v6072_v59 }
 0xd7f   :  { %v4994_v39 = vsel %vm4993_vm2, %v6066_v12, %v4990_v16  ;;  %6075 = vrcp.f32 %v4863_v21  ;;  %vm5053_vm6 = vmor %vm5051_vm5, %vm5052_vm4  ;;  %v5072_v27 = vand.u32 2147483648, %v4863_v21  ;;  %v5070_v18 = vand.u32 2147483647, %v4863_v21 }
 0xd80   :  { %v4999_v3 = vsel %vm4996_vm3, %v4998_v62, %v4994_v39  ;;  %v6074_v15 = vpop.eup %6073  ;;  %v5048_v36 = vsub.f32 1.0, %v5047_v2  ;;  %vm5066_vm13 = vweird.f32 %v4863_v21 }
 0xd81   :  { %v5114_v13 = vmul.f32 %v4999_v3, %v8782_v23  ;;  %v5002_v41 = vmul.f32 %v6074_v15, %v4859_v26  ;;  %vm5007_vm7 = vweird.f32 %v6074_v15  ;;  %v5073_v26 = vor.u32 1.1754944e-38, %v5072_v27 }
 0xd82   :  { %v5049_v4 = vmul.f32 %v6072_v59, %v5048_v36  ;;  %vm5008_vm10 = vmor %vm5006_vm9, %vm5007_vm7  ;;  %vm5071_vm1 = vcmp.eq.f32.partialorder %v5070_v18, 8.507059e+37 }
 0xd83   :  { %5154 = vrot.lane.b32.xlu1 %v5114_v13, %s6110_s1  ;;  %v5003_v50 = vsub.f32 1.0, %v5002_v41 }
 0xd84   :  { %v5050_v30 = vadd.f32 %v6072_v59, %v5049_v4 }
 0xd85   :  { %v6076_v57 = vpop.eup %6075  ;;  %v5004_v29 = vmul.f32 %v6074_v15, %v5003_v50 }
 0xd86   :  { %v5054_v28 = vsel %vm5053_vm6, %v6072_v59, %v5050_v30  ;;  %v5062_v55 = vmul.f32 %v6076_v57, %v4863_v21  ;;  %vm5067_vm12 = vweird.f32 %v6076_v57 }
 0xd87   :  { %v5059_v51 = vsel %vm5056_vm8, %v5058_v31, %v5054_v28  ;;  %v5005_v44 = vadd.f32 %v6074_v15, %v5004_v29  ;;  %vm5068_vm15 = vmor %vm5066_vm13, %vm5067_vm12 }
 0xd88   :  { %v5118_v12 = vmul.f32 %v5059_v51, %v8788_v46  ;;  %v5063_v24 = vsub.f32 1.0, %v5062_v55 }
 0xd89   :  { %v5009_v9 = vsel %vm5008_vm10, %v6074_v15, %v5005_v44  ;;  %v5147_v19 = vpop.permute.xlu0 %5146  ;;  %v5151_v30 = vpop.permute.xlu2 %5150 }
 0xd8a   :  { %v5014_v53 = vsel %vm5011_vm11, %v5013_v56, %v5009_v9  ;;  %v5064_v37 = vmul.f32 %v6076_v57, %v5063_v24  ;;  %5162 = vrot.lane.b32.xlu0 %v5118_v12, %s6110_s1  ;;  %v5190_v59 = vmul.f32 %v5147_v19, %v8664_v54  ;;  %v5192_v51 = vmul.f32 %v5151_v30, %v8719_v42 }
 0xd8b   :  { %v5115_v22 = vmul.f32 %v5014_v53, %v8790_v52 }
 0xd8c   :  { %v5065_v63 = vadd.f32 %v6076_v57, %v5064_v37 }
 0xd8d   :  { %5156 = vrot.lane.b32.xlu2 %v5115_v22, %s6110_s1 }
 0xd8e   :  { %v5069_v10 = vsel %vm5068_vm15, %v6076_v57, %v5065_v63 }
 0xd8f   :  { %v5074_v61 = vsel %vm5071_vm1, %v5073_v26, %v5069_v10 }
 0xd90   :  { %v5119_v14 = vmul.f32 %v5074_v61, %v8794_v45 }
 0xd92   :  { %5164 = vrot.lane.b32.xlu1 %v5119_v14, %s6110_s1 }
 0xd93   :  { %v5149_v16 = vpop.permute.xlu1 %5148 }
 0xd94   :  { %v5191_v62 = vmul.f32 %v5149_v16, %v8673_v47 }
 0xd95   :  { %v8810_v39 = vpop.f32.mrf.mxu1 }
 0xd96   :  { %v5204_v21 = vpack.c.bf16 %v5191_v62, %v5190_v59  ;;  %v4812_v2 = vsub.f32 0.0, %v8810_v39 }
 0xd98   :  { %v4838_v3 = vmul.f32 1.442695, %v4812_v2  ;;  %5546 = vmatmul.msk.bf16.gmra.mxu2 %vm5242_vm14, %v5204_v21 }
 0xd9a   :  { %6077 = vpow2.f32 %v4838_v3 }
 0xd9c   :  { %v8814_v15 = vpop.f32.mrf.mxu3 }
 0xd9d   :  { %v8816_v13 = vpop.f32.mrf.mxu1  ;;  %v4816_v36 = vsub.f32 0.0, %v8814_v15 }
 0xd9e   :  { %v4813_v7 = vsub.f32 0.0, %v8816_v13 }
 0xd9f   :  { %v4846_v41 = vmul.f32 1.442695, %v4816_v36 }
 0xda0   :  { %v6078_v54 = vpop.eup %6077  ;;  %v4840_v47 = vmul.f32 1.442695, %v4813_v7 }
 0xda1   :  { %v4860_v4 = vadd.f32 1.0, %v6078_v54  ;;  %6079 = vpow2.f32 %v4846_v41 }
 0xda3   :  { %6081 = vrcp.f32 %v4860_v4  ;;  %v5027_v9 = vand.u32 2147483648, %v4860_v4  ;;  %v5025_v53 = vand.u32 2147483647, %v4860_v4  ;;  %vm5021_vm3 = vweird.f32 %v4860_v4 }
 0xda4   :  { %6083 = vpow2.f32 %v4840_v47  ;;  %v8820_v6 = vpop.f32.mrf.mxu3 }
 0xda5   :  { %v4817_v50 = vsub.f32 0.0, %v8820_v6  ;;  %v5028_v22 = vor.u32 1.1754944e-38, %v5027_v9  ;;  %vm5026_vm5 = vcmp.eq.f32.partialorder %v5025_v53, 8.507059e+37 }
 0xda7   :  { %v6080_v11 = vpop.eup %6079  ;;  %v4848_v57 = vmul.f32 1.442695, %v4817_v50 }
 0xda8   :  { %v4864_v17 = vadd.f32 1.0, %v6080_v11 }
 0xda9   :  { %v5153_v31 = vpop.permute.xlu0 %5152  ;;  %v6082_v29 = vpop.eup %6081  ;;  %6085 = vpow2.f32 %v4848_v57 }
 0xdaa   :  { %v5193_v28 = vmul.f32 %v5153_v31, %v8753_v60  ;;  %v6084_v55 = vpop.eup %6083  ;;  %v5017_v44 = vmul.f32 %v6082_v29, %v4860_v4  ;;  %6087 = vrcp.f32 %v4864_v17  ;;  %vm5022_vm2 = vweird.f32 %v6082_v29 }
 0xdab   :  { %v4861_v56 = vadd.f32 1.0, %v6084_v55  ;;  %vm5023_vm4 = vmor %vm5021_vm3, %vm5022_vm2  ;;  %v5087_v16 = vand.u32 2147483648, %v4864_v17  ;;  %v5085_v21 = vand.u32 2147483647, %v4864_v17  ;;  %vm5081_vm7 = vweird.f32 %v4864_v17 }
 0xdac   :  { %v5018_v12 = vsub.f32 1.0, %v5017_v44  ;;  %v5205_v24 = vpack.c.bf16 %v5193_v28, %v5192_v51 }
 0xdad   :  { %6089 = vrcp.f32 %v4861_v56  ;;  %v5042_v36 = vand.u32 2147483648, %v4861_v56  ;;  %v5088_v54 = vor.u32 1.1754944e-38, %v5087_v16  ;;  %v5040_v47 = vand.u32 2147483647, %v4861_v56 }
 0xdae   :  { %v5019_v27 = vmul.f32 %v6082_v29, %v5018_v12  ;;  %5547 = vmatmul.msk.bf16.gmra.mxu2 %vm5242_vm14, %v5205_v24  ;;  %vm5086_vm10 = vcmp.eq.f32.partialorder %v5085_v21, 8.507059e+37  ;;  %vm5036_vm11 = vweird.f32 %v4861_v56 }
 0xdaf   :  { %v6086_v37 = vpop.eup %6085  ;;  %v5043_v31 = vor.u32 1.1754944e-38, %v5042_v36  ;;  %vm5041_vm13 = vcmp.eq.f32.partialorder %v5040_v47, 8.507059e+37 }
 0xdb0   :  { %v5020_v18 = vadd.f32 %v6082_v29, %v5019_v27  ;;  %v6088_v60 = vpop.eup %6087  ;;  %v4865_v42 = vadd.f32 1.0, %v6086_v37 }
 0xdb1   :  { %v5077_v26 = vmul.f32 %v6088_v60, %v4864_v17  ;;  %vm5082_vm6 = vweird.f32 %v6088_v60 }
 0xdb2   :  { %v5024_v63 = vsel %vm5023_vm4, %v6082_v29, %v5020_v18  ;;  %6091 = vrcp.f32 %v4865_v42  ;;  %vm5083_vm8 = vmor %vm5081_vm7, %vm5082_vm6  ;;  %v5102_v17 = vand.u32 2147483648, %v4865_v42  ;;  %v5100_v44 = vand.u32 2147483647, %v4865_v42 }
 0xdb3   :  { %v5029_v10 = vsel %vm5026_vm5, %v5028_v22, %v5024_v63  ;;  %v6090_v61 = vpop.eup %6089  ;;  %v5078_v19 = vsub.f32 1.0, %v5077_v26  ;;  %vm5096_vm1 = vweird.f32 %v4865_v42 }
 0xdb4   :  { %v5116_v14 = vmul.f32 %v5029_v10, %v8810_v39  ;;  %v5032_v59 = vmul.f32 %v6090_v61, %v4861_v56  ;;  %vm5037_vm9 = vweird.f32 %v6090_v61  ;;  %v5103_v56 = vor.u32 1.1754944e-38, %v5102_v17 }
 0xdb5   :  { %v5079_v62 = vmul.f32 %v6088_v60, %v5078_v19  ;;  %vm5038_vm12 = vmor %vm5036_vm11, %vm5037_vm9  ;;  %vm5101_vm3 = vcmp.eq.f32.partialorder %v5100_v44, 8.507059e+37 }
 0xdb6   :  { %5158 = vrot.lane.b32.xlu2 %v5116_v14, %s6110_s1  ;;  %v5033_v2 = vsub.f32 1.0, %v5032_v59 }
 0xdb7   :  { %v5080_v3 = vadd.f32 %v6088_v60, %v5079_v62 }
 0xdb8   :  { %v6092_v7 = vpop.eup %6091  ;;  %v5034_v41 = vmul.f32 %v6090_v61, %v5033_v2 }
 0xdb9   :  { %v5084_v4 = vsel %vm5083_vm8, %v6088_v60, %v5080_v3  ;;  %v5092_v50 = vmul.f32 %v6092_v7, %v4865_v42  ;;  %vm5097_vm15 = vweird.f32 %v6092_v7 }
 0xdba   :  { %v5089_v30 = vsel %vm5086_vm10, %v5088_v54, %v5084_v4  ;;  %v5035_v11 = vadd.f32 %v6090_v61, %v5034_v41  ;;  %vm5098_vm2 = vmor %vm5096_vm1, %vm5097_vm15 }
 0xdbb   :  { %v5120_v57 = vmul.f32 %v5089_v30, %v8814_v15  ;;  %v5093_v29 = vsub.f32 1.0, %v5092_v50 }
 0xdbc   :  { %v5039_v28 = vsel %vm5038_vm12, %v6090_v61, %v5035_v11 }
 0xdbd   :  { %v5044_v55 = vsel %vm5041_vm13, %v5043_v31, %v5039_v28  ;;  %v5094_v51 = vmul.f32 %v6092_v7, %v5093_v29  ;;  %5166 = vrot.lane.b32.xlu1 %v5120_v57, %s6110_s1 }
 0xdbe   :  { %v5117_v12 = vmul.f32 %v5044_v55, %v8816_v13 }
 0xdbf   :  { %v5095_v24 = vadd.f32 %v6092_v7, %v5094_v51 }
 0xdc0   :  { %5160 = vrot.lane.b32.xlu0 %v5117_v12, %s6110_s1 }
 0xdc1   :  { %v5099_v9 = vsel %vm5098_vm2, %v6092_v7, %v5095_v24 }
 0xdc2   :  { %v5104_v27 = vsel %vm5101_vm3, %v5103_v56, %v5099_v9 }
 0xdc3   :  { %v5121_v53 = vmul.f32 %v5104_v27, %v8820_v6 }
 0xdc5   :  { %5168 = vrot.lane.b32.xlu2 %v5121_v53, %s6110_s1 }
 0xde7   :  { %v5157_v22 = vpop.permute.xlu2 %5156 }
 0xde8   :  { %v5195_v26 = vmul.f32 %v5157_v22, %v8790_v52 }
 0xdea   :  { %v5276_v37 = vpop.f32.mrf.mxu2 }
 0xdeb   :  { %v5316_v18 = vadd.f32 %v5276_v37, %v8419_v33 }
 0xded   :  { %5332 = vst.msk [vmem:[%s8933_s7] sm:$0xff] %vm59_vm0, %v5316_v18 }
 0xdf2   :  { %v5278_v60 = vpop.f32.mrf.mxu2 }
 0xdf3   :  { %v5317_v42 = vadd.f32 %v5278_v60, %v8433_v40 }
 0xdf5   :  { %5333 = vst.msk [vmem:[%s8933_s7 + $0x8] sm:$0xff] %vm59_vm0, %v5317_v42  ;;  %v5155_v63 = vpop.permute.xlu1 %5154 }
 0xdf6   :  { %v5194_v10 = vmul.f32 %v5155_v63, %v8782_v23 }
 0xdf8   :  { %v5206_v33 = vpack.c.bf16 %v5195_v26, %v5194_v10 }
 0xdfa   :  { %5548 = vmatmul.msk.bf16.gmra.mxu2 %vm5242_vm14, %v5206_v33 }
 0xdfc   :  { %v5163_v19 = vpop.permute.xlu0 %5162 }
 0xdfd   :  { %v5198_v16 = vmul.f32 %v5163_v19, %v8788_v46 }
 0xe01   :  { %v5281_v61 = vpop.f32.mrf.mxu2 }
 0xe02   :  { %v5318_v14 = vadd.f32 %v5281_v61, %v8453_v8 }
 0xe04   :  { %5334 = vst.msk [vmem:[%s8933_s7 + $0x10] sm:$0xff] %vm59_vm0, %v5318_v14  ;;  %v5165_v40 = vpop.permute.xlu1 %5164 }
 0xe05   :  { %v5199_v59 = vmul.f32 %v5165_v40, %v8794_v45 }
 0xe07   :  { %v5208_v52 = vpack.c.bf16 %v5199_v59, %v5198_v16 }
 0xe09   :  { %v5283_v62 = vpop.f32.mrf.mxu2  ;;  %5550 = vmatmul.msk.bf16.vlgmr.msra.gmra.mxu3 %vm5242_vm14, %v5208_v52 }
 0xe0a   :  { %v5319_v23 = vadd.f32 %v5283_v62, %v8461_v43 }
 0xe0c   :  { %5335 = vst.msk [vmem:[%s8933_s7 + $0x18] sm:$0xff] %vm59_vm0, %v5319_v23 }
 0xe10   :  { %v5159_v2 = vpop.permute.xlu2 %5158 }
 0xe11   :  { %v5196_v4 = vmul.f32 %v5159_v2, %v8810_v39 }
 0xe1b   :  { %v5286_v8 = vpop.f32.mrf.mxu2 }
 0xe1c   :  { %v5320_v21 = vadd.f32 %v5286_v8, %v8469_v49 }
 0xe1e   :  { %5336 = vst.msk [vmem:[%s8933_s7 + $0x20] sm:$0xff] %vm59_vm0, %v5320_v21 }
 0xe1f   :  { %v5169_v43 = vpop.permute.xlu2 %5168 }
 0xe20   :  { %v5201_v36 = vmul.f32 %v5169_v43, %v8820_v6 }
 0xe23   :  { %v5288_v46 = vpop.f32.mrf.mxu2 }
 0xe24   :  { %v5321_v45 = vadd.f32 %v5288_v46, %v8477_v32 }
 0xe26   :  { %5337 = vst.msk [vmem:[%s8933_s7 + $0x28] sm:$0xff] %vm59_vm0, %v5321_v45 }
 0xe2f   :  { %v5167_v3 = vpop.permute.xlu1 %5166 }
 0xe30   :  { %v5200_v49 = vmul.f32 %v5167_v3, %v8814_v15 }
 0xe31   :  { %v5291_v7 = vpop.f32.mrf.mxu2 }
 0xe32   :  { %v5322_v54 = vadd.f32 %v5291_v7, %v8485_v25  ;;  %v5209_v41 = vpack.c.bf16 %v5201_v36, %v5200_v49  ;;  %v5161_v47 = vpop.permute.xlu0 %5160 }
 0xe33   :  { %v5197_v32 = vmul.f32 %v5161_v47, %v8816_v13 }
 0xe34   :  { %5338 = vst.msk [vmem:[%s8933_s7 + $0x30] sm:$0xff] %vm59_vm0, %v5322_v54  ;;  %5551 = vmatmul.msk.bf16.gmra.mxu3 %vm5242_vm14, %v5209_v41 }
 0xe35   :  { %v5207_v50 = vpack.c.bf16 %v5197_v32, %v5196_v4 }
 0xe37   :  { %5549 = vmatmul.msk.bf16.gmra.mxu2 %vm5242_vm14, %v5207_v50 }
 0xe39   :  { %v5293_v15 = vpop.f32.mrf.mxu2 }
 0xe3a   :  { %v5323_v6 = vadd.f32 %v5293_v15, %v8501_v34 }
 0xe3c   :  { %5339 = vst.msk [vmem:[%s8933_s7 + $0x38] sm:$0xff] %vm59_vm0, %v5323_v6 }
 0xe7d   :  { %v5296_v25 = vpop.f32.mrf.mxu2 }
 0xe7e   :  { %v5324_v39 = vadd.f32 %v5296_v25, %v8510_v48 }
 0xe80   :  { %5340 = vst.msk [vmem:[%s8933_s7 + $0x40] sm:$0xff] %vm59_vm0, %v5324_v39 }
 0xe85   :  { %v5298_v13 = vpop.f32.mrf.mxu2 }
 0xe86   :  { %v5325_v30 = vadd.f32 %v5298_v13, %v8546_v58 }
 0xe88   :  { %5341 = vst.msk [vmem:[%s8933_s7 + $0x48] sm:$0xff] %vm59_vm0, %v5325_v30 }
 0xe8c   :  { %v5306_v34 = vpop.f32.mrf.mxu3 }
 0xe8d   :  { %v5328_v11 = vadd.f32 %v5306_v34, %v8538_v38 }
 0xe8f   :  { %5344 = vst.msk [vmem:[%s8933_s7 + $0x60] sm:$0xff] %vm59_vm0, %v5328_v11 }
 0xe94   :  { %v5308_v48 = vpop.f32.mrf.mxu3 }
 0xe95   :  { %v5329_v57 = vadd.f32 %v5308_v48, %v8553_v5 }
 0xe97   :  { %5345 = vst.msk [vmem:[%s8933_s7 + $0x68] sm:$0xff] %vm59_vm0, %v5329_v57 }
 0xeb7   :  { %v5311_v58 = vpop.f32.mrf.mxu3 }
 0xeb8   :  { %v5330_v31 = vadd.f32 %v5311_v58, %v8586_v0 }
 0xeba   :  { %5346 = vst.msk [vmem:[%s8933_s7 + $0x70] sm:$0xff] %vm59_vm0, %v5330_v31  ;;  %v5301_v38 = vpop.f32.mrf.mxu2 }
 0xebb   :  { %v5326_v29 = vadd.f32 %v5301_v38, %v8562_v35 }
 0xebd   :  { %5342 = vst.msk [vmem:[%s8933_s7 + $0x50] sm:$0xff] %vm59_vm0, %v5326_v29 }
 0xebf   :  { %v5313_v5 = vpop.f32.mrf.mxu3 }
 0xec0   :  { %v5331_v28 = vadd.f32 %v5313_v5, %v8600_v1 }
 0xec2   :  { %5347 = vst.msk [vmem:[%s8933_s7 + $0x78] sm:$0xff] %vm59_vm0, %v5331_v28  ;;  %v5303_v0 = vpop.f32.mrf.mxu2 }
 0xec3   :  { %v5327_v17 = vadd.f32 %v5303_v0, %v8594_v20 }
 0xec5   :  { %5343 = vst.msk [vmem:[%s8933_s7 + $0x58] sm:$0xff] %vm59_vm0, %v5327_v17 }

</bundles_post_ra>
